<compile_context>
chip_gen: v5e
topology: v5e:2x2
jax: 0.10.0
libtpu: 0.0.40
codegen_flags: <defaults>
</compile_context>

<pallas_src>
import math
import functools
import numpy as np
import jax
import jax.numpy as jnp
from jax.experimental import pallas as pl
from jax.experimental.pallas import tpu as pltpu


# ----------------------------- in-kernel helpers -----------------------------

def _layernorm(x, w, b, eps=1e-5):
    mu = jnp.mean(x, axis=-1, keepdims=True)
    xc = x - mu
    var = jnp.mean(xc * xc, axis=-1, keepdims=True)
    return xc * jax.lax.rsqrt(var + eps) * w + b


def _gelu_tanh(x):
    # torch.nn.GELU(approximate='tanh')
    c = 0.7978845608028654  # sqrt(2/pi)
    return 0.5 * x * (1.0 + jnp.tanh(c * (x + 0.044715 * x * x * x)))


# ------------------------------- fused kernel --------------------------------

def _transformer_kernel(Bb, T, C, H,
                        x_ref, cos_ref, sin_ref, bias_ref,
                        ln1w_ref, ln1b_ref,
                        wq_ref, bq_ref, wk_ref, bk_ref, wv_ref, bv_ref,
                        wo_ref, bo_ref,
                        ln2w_ref, ln2b_ref,
                        w1_ref, b1_ref, w2_ref, b2_ref,
                        lnfw_ref, lnfb_ref,
                        out_ref, x_acc):
    l = pl.program_id(1)
    R = Bb * T                     # rows per step (fills the MXU / packs bf16)
    D = C // H
    D2 = D // 2
    C2 = C // 2
    H2 = 2 * H                     # even/odd pseudo-heads
    bf = jnp.bfloat16

    @pl.when(l == 0)               # new batch block: load residual stream
    def _():
        x_acc[...] = x_ref[...].reshape(R, C)

    x = x_acc[...]                 # (R, C) f32 residual
    cosf = cos_ref[...]            # (T, C)  per-head tiled, duplicated halves
    sinf = sin_ref[...]            # (T, C)  [-sin | +sin] per-head tiled

    def rope(z):
        # Flat RoPE on the [even-half | odd-half] column layout: the rotation
        # partner of every column is exactly C/2 lanes away, so one XLU roll
        # (direction-agnostic for shift = C/2) + full-width FMAs do the job.
        zr = pltpu.roll(z, C2, axis=1)                       # swap halves
        return z.reshape(Bb, T, C) * cosf + zr.reshape(Bb, T, C) * sinf

    def to_heads(z3, nh, hd):
        # (Bb, T, nh*hd) -> (Bb*nh, T, hd) bf16, head-batched for the MXU.
        zh = jnp.swapaxes(z3.reshape(Bb, T, nh, hd), 1, 2)   # (Bb, nh, T, hd)
        return zh.reshape(Bb * nh, T, hd).astype(bf)

    # ---------------- attention branch (pre-LN, RoPE, causal softmax) --------
    xn = _layernorm(x, ln1w_ref[0], ln1b_ref[0]).astype(bf)
    # 1/sqrt(D) is folded into wq/bq at init time.
    q = jnp.dot(xn, wq_ref[0], preferred_element_type=jnp.float32) + bq_ref[0]
    k = jnp.dot(xn, wk_ref[0], preferred_element_type=jnp.float32) + bk_ref[0]
    v = jnp.dot(xn, wv_ref[0], preferred_element_type=jnp.float32) + bv_ref[0]

    qh = to_heads(rope(q), H2, D2)                 # (Bb*2H, T, D/2)
    kh = to_heads(rope(k), H2, D2)
    vh = to_heads(v.reshape(Bb, T, C), H, D)       # (Bb*H,  T, D)

    # One batched score einsum over all (batch, even/odd pseudo-head) pairs,
    # then the even/odd partials are summed -> per-head rotated q.kT scores.
    att = jnp.einsum('bqd,bkd->bqk', qh, kh,
                     preferred_element_type=jnp.float32)     # (Bb*2H, T, T)
    att = att.reshape(Bb, H2, T, T)
    att = (att[:, :H] + att[:, H:]).reshape(Bb * H, T, T)    # (Bb*H, T, T)
    att = att + bias_ref[...]                                # additive causal bias

    m = jnp.max(att, axis=-1, keepdims=True)
    e = jnp.exp(att - m)
    p = e * pl.reciprocal(jnp.sum(e, axis=-1, keepdims=True), approx=True)

    y = jnp.einsum('bqk,bkd->bqd', p.astype(bf), vh,
                   preferred_element_type=jnp.float32)       # (Bb*H, T, D)
    y = jnp.swapaxes(y.reshape(Bb, H, T, D), 1, 2).reshape(R, C)
    y = jnp.dot(y.astype(bf), wo_ref[0], preferred_element_type=jnp.float32) + bo_ref[0]
    x = x + y                                                # residual (GRU gating off)

    # ---------------- MLP branch ----------------
    xn2 = _layernorm(x, ln2w_ref[0], ln2b_ref[0]).astype(bf)
    h1 = jnp.dot(xn2, w1_ref[0], preferred_element_type=jnp.float32) + b1_ref[0]
    h1 = _gelu_tanh(h1).astype(bf)
    h2 = jnp.dot(h1, w2_ref[0], preferred_element_type=jnp.float32) + b2_ref[0]
    x = x + h2                                               # residual (dropout = identity)

    x_acc[...] = x

    @pl.when(l == pl.num_programs(1) - 1)                    # final LayerNorm fused
    def _():
        out_ref[...] = _layernorm(x, lnfw_ref[...], lnfb_ref[...]).reshape(Bb, T, C)


# ------------------------------ wrappers / glue ------------------------------

def _vmem_cap_bytes():
    try:
        info = pltpu.get_tpu_info()
        for name in ("vmem_capacity_bytes", "vmem_bytes", "vmem_size_bytes"):
            v = getattr(info, name, None)
            if v:
                return int(v)
    except Exception:
        pass
    return 64 * 1024 * 1024          # conservative (v7x) fallback


def _pick_block_batch(B, T, C, H, vmem_budget):
    """Largest batch block that divides B, targets >=512 rows, fits the budget."""
    bb = max(1, min(B, max(1, 512 // max(T, 1))))
    while B % bb:
        bb -= 1

    def footprint(bbb):
        R = bbb * T
        acts = 12 * R * C * 4 + 2 * R * 4 * C * 4        # f32 activation temporaries
        att = 4 * bbb * H * T * T * 4                    # scores / exp / probs
        io = 2 * 2 * bbb * T * C * 4                     # double-buffered x/out blocks
        wts = 2 * (12 * C * C * 2 + 20 * C * 4)          # double-buffered layer weights
        return acts + att + io + wts + R * C * 4         # + residual scratch

    while bb > 1 and footprint(bb) > vmem_budget:
        bb -= 1
        while B % bb:
            bb -= 1
    return bb


def transformer_forward(x, cos_full, sin_full, causal_bias, params, *,
                        num_heads, block_batch=None):
    B, T, C = x.shape
    H = num_heads
    L = params['wq'].shape[0]

    vmem_cap = _vmem_cap_bytes()
    vmem_limit = int(max(32 * 2 ** 20, min(0.8 * vmem_cap, 100 * 2 ** 20)))
    Bb = block_batch if block_batch is not None else \
        _pick_block_batch(B, T, C, H, vmem_budget=vmem_limit // 2)
    nb = B // Bb

    flops = int(B * L * (24 * T * C * C + 4 * T * T * C))
    transcendentals = int(B * L * (H * T * T + 4 * T * C))
    bytes_accessed = int(nb * L * (12 * C * C * 2 + 20 * C * 4)   # weights per batch block
                         + 2 * B * T * C * 4                      # residual in + out
                         + 2 * T * C * 4 + T * T * 4)             # cos/sin + mask (once)

    kernel = functools.partial(_transformer_kernel, Bb, T, C, H)

    def batch_spec():
        return pl.BlockSpec((Bb, T, C), lambda b, l: (b, 0, 0))

    def layer_spec(*tail):
        zeros = (0,) * len(tail)
        return pl.BlockSpec((1, *tail), lambda b, l: (l, *zeros))

    def const_spec(*shape):
        zeros = (0,) * len(shape)
        return pl.BlockSpec(tuple(shape), lambda b, l: zeros)

    return pl.pallas_call(
        kernel,
        out_shape=jax.ShapeDtypeStruct((B, T, C), jnp.float32),
        grid=(nb, L),
        in_specs=[
            batch_spec(),                                   # x (residual stream)
            const_spec(T, C), const_spec(T, C),             # cos / sin (shared over B, L)
            const_spec(T, T),                               # additive causal bias
            layer_spec(1, C), layer_spec(1, C),             # ln1 w, b
            layer_spec(C, C), layer_spec(1, C),             # wq, bq
            layer_spec(C, C), layer_spec(1, C),             # wk, bk
            layer_spec(C, C), layer_spec(1, C),             # wv, bv
            layer_spec(C, C), layer_spec(1, C),             # wo, bo
            layer_spec(1, C), layer_spec(1, C),             # ln2 w, b
            layer_spec(C, 4 * C), layer_spec(1, 4 * C),     # w1, b1
            layer_spec(4 * C, C), layer_spec(1, C),         # w2, b2
            const_spec(1, C), const_spec(1, C),             # ln_f w, b
        ],
        out_specs=batch_spec(),
        scratch_shapes=[pltpu.VMEM((Bb * T, C), jnp.float32)],   # residual carry
        compiler_params=pltpu.CompilerParams(
            dimension_semantics=("parallel", "arbitrary"),  # batch blocks || cores, layers sequential
            vmem_limit_bytes=vmem_limit),
        cost_estimate=pl.CostEstimate(flops=flops,
                                      transcendentals=transcendentals,
                                      bytes_accessed=bytes_accessed),
    )(x, cos_full, sin_full, causal_bias,
      params['ln1_w'], params['ln1_b'],
      params['wq'], params['bq'], params['wk'], params['bk'],
      params['wv'], params['bv'], params['wo'], params['bo'],
      params['ln2_w'], params['ln2_b'],
      params['w1'], params['b1'], params['w2'], params['b2'],
      params['lnf_w'], params['lnf_b'])


# ------------------------- deterministic parameter init -------------------------

def init_params(key, C, H, L):
    D = C // H
    D2 = D // 2
    attn_scale = 1.0 / math.sqrt(D)
    evens = np.asarray([h * D + 2 * j for h in range(H) for j in range(D2)], np.int32)
    perm = np.concatenate([evens, evens + 1])   # [all even pair members | all odd]

    def normal(k, shape):
        return 0.02 * jax.random.normal(k, shape, dtype=jnp.float32)

    names = ['ln1_w', 'ln1_b', 'wq', 'bq', 'wk', 'bk', 'wv', 'bv', 'wo', 'bo',
             'ln2_w', 'ln2_b', 'w1', 'b1', 'w2', 'b2']
    stacks = {n: [] for n in names}
    ref_layers = []
    for _ in range(L):
        keys = jax.random.split(key, 13)
        key = keys[0]
        layer = dict(
            ln1_w=jnp.ones((1, C), jnp.float32), ln1_b=jnp.zeros((1, C), jnp.float32),
            wq=normal(keys[1], (C, C)), bq=normal(keys[2], (1, C)),
            wk=normal(keys[3], (C, C)), bk=normal(keys[4], (1, C)),
            wv=normal(keys[5], (C, C)), bv=normal(keys[6], (1, C)),
            wo=normal(keys[7], (C, C)), bo=normal(keys[8], (1, C)),
            ln2_w=jnp.ones((1, C), jnp.float32), ln2_b=jnp.zeros((1, C), jnp.float32),
            w1=normal(keys[9], (C, 4 * C)), b1=normal(keys[10], (1, 4 * C)),
            w2=normal(keys[11], (4 * C, C)), b2=normal(keys[12], (1, C)),
        )
        ref_layers.append(layer)            # original layout (for the pure-JAX reference)
        kl = dict(layer)
        # fold the 1/sqrt(D) attention scale into the q projection, then permute q/k
        # columns into the RoPE [even-half | odd-half] layout (q.kT is invariant).
        kl['wq'] = (layer['wq'] * attn_scale)[:, perm]
        kl['bq'] = (layer['bq'] * attn_scale)[:, perm]
        kl['wk'] = layer['wk'][:, perm]
        kl['bk'] = layer['bk'][:, perm]
        for n in names:
            stacks[n].append(kl[n])

    params = {n: jnp.stack(stacks[n]) for n in names}
    for n in ('wq', 'wk', 'wv', 'wo', 'w1', 'w2'):     # bf16 MXU operands, f32 accum
        params[n] = params[n].astype(jnp.bfloat16)
    params['lnf_w'] = jnp.ones((1, C), jnp.float32)
    params['lnf_b'] = jnp.zeros((1, C), jnp.float32)
    return params, ref_layers


def precompute_freqs_cos_sin(head_dim, end, theta=10000.0):
    freqs = 1.0 / theta ** (np.arange(0, head_dim, 2)[: head_dim // 2]
                            .astype(np.float32) / head_dim)
    t = np.arange(end, dtype=np.float32)
    f = np.outer(t, freqs)
    return np.cos(f).astype(np.float32), np.sin(f).astype(np.float32)


# --------------------------- pure-JAX reference (f32) ---------------------------

def reference_forward(x, cos, sin, ref_layers, lnf_w, lnf_b, H):
    B, T, C = x.shape
    D = C // H

    def ln(v, w, b, eps=1e-5):
        mu = jnp.mean(v, -1, keepdims=True)
        var = jnp.mean((v - mu) ** 2, -1, keepdims=True)
        return (v - mu) * jax.lax.rsqrt(var + eps) * w + b

    mask = np.tril(np.ones((T, T), dtype=bool))
    cb = cos[:, :, None, :]
    sb = sin[:, :, None, :]
    for p in ref_layers:
        xn = ln(x, p['ln1_w'], p['ln1_b'])
        q = (xn @ p['wq'] + p['bq']).reshape(B, T, H, D // 2, 2)
        k = (xn @ p['wk'] + p['bk']).reshape(B, T, H, D // 2, 2)
        v = (xn @ p['wv'] + p['bv']).reshape(B, T, H, D)
        qr = jnp.stack([q[..., 0] * cb - q[..., 1] * sb,
                        q[..., 0] * sb + q[..., 1] * cb], axis=-1).reshape(B, T, H, D)
        kr = jnp.stack([k[..., 0] * cb - k[..., 1] * sb,
                        k[..., 0] * sb + k[..., 1] * cb], axis=-1).reshape(B, T, H, D)
        att = jnp.einsum('bqhd,bkhd->bhqk', qr, kr) / math.sqrt(D)
        att = jnp.where(mask, att, -jnp.inf)
        att = jax.nn.softmax(att, axis=-1)
        y = jnp.einsum('bhqk,bkhd->bqhd', att, v).reshape(B, T, C)
        x = x + y @ p['wo'] + p['bo']
        h = ln(x, p['ln2_w'], p['ln2_b']) @ p['w1'] + p['b1']
        h = 0.5 * h * (1.0 + jnp.tanh(0.7978845608028654 * (h + 0.044715 * h ** 3)))
        x = x + h @ p['w2'] + p['b2']
    return ln(x, lnf_w, lnf_b)


# ----------------------------------- main -----------------------------------

if __name__ == "__main__":
    B, T, C, H, L = 2, 8, 128, 4, 2        # batch, seq, embed, heads, layers
    D = C // H
    max_seq_len, rope_theta, start_pos = 16, 10000.0, 0

    # freqs_cis as cos/sin, sliced exactly like the module (scalar start_pos)
    cos_all, sin_all = precompute_freqs_cos_sin(D, max_seq_len * 2, rope_theta)
    pos = start_pos % max_seq_len
    cos = cos_all[pos:pos + T]                             # (T, D/2)
    sin = sin_all[pos:pos + T]

    # kernel-side constants (shared across batch): per-head tiled cos duplicated
    # over both halves, and [-sin | +sin] for the roll-based rotation.
    cos_full = jnp.asarray(np.tile(cos, (1, 2 * H)))                         # (T, C)
    sin_full = jnp.asarray(np.concatenate([-np.tile(sin, (1, H)),
                                           np.tile(sin, (1, H))], axis=1))   # (T, C)
    causal_bias = jnp.asarray(
        np.where(np.tril(np.ones((T, T), dtype=bool)), 0.0, -1e30).astype(np.float32))

    key = jax.random.PRNGKey(0)
    kx, kp = jax.random.split(key)
    x = jax.random.normal(kx, (B, T, C), dtype=jnp.float32)
    params, ref_layers = init_params(kp, C, H, L)

    fwd = jax.jit(functools.partial(transformer_forward, num_heads=H))
    out = jax.block_until_ready(fwd(x, cos_full, sin_full, causal_bias, params))

    assert out.shape == (B, T, C) and out.dtype == jnp.float32
    assert bool(jnp.all(jnp.isfinite(out)))

    # numerical check vs. the f32 interleaved-RoPE reference (bf16/approx-recip slack)
    cos_b = jnp.asarray(np.tile(cos[None], (B, 1, 1)))     # (B, T, D/2)
    sin_b = jnp.asarray(np.tile(sin[None], (B, 1, 1)))
    ref = reference_forward(x, cos_b, sin_b, ref_layers,
                            params['lnf_w'], params['lnf_b'], H)
    err = float(jnp.max(jnp.abs(out - ref)))
    assert err < 5e-2, f"kernel/reference mismatch: max abs err = {err}"

    print("KERNEL_OK")
</pallas_src>

<mosaic_0001>
module attributes {stable_mosaic.version = 11 : i64} {
  func.func @_transformer_kernel(%arg0: i32, %arg1: i32, %arg2: memref<2x8x128xf32, #tpu.memory_space<vmem>>, %arg3: memref<8x128xf32, #tpu.memory_space<vmem>>, %arg4: memref<8x128xf32, #tpu.memory_space<vmem>>, %arg5: memref<8x8xf32, #tpu.memory_space<vmem>>, %arg6: memref<1x1x128xf32, #tpu.memory_space<vmem>>, %arg7: memref<1x1x128xf32, #tpu.memory_space<vmem>>, %arg8: memref<1x128x128xbf16, #tpu.memory_space<vmem>>, %arg9: memref<1x1x128xf32, #tpu.memory_space<vmem>>, %arg10: memref<1x128x128xbf16, #tpu.memory_space<vmem>>, %arg11: memref<1x1x128xf32, #tpu.memory_space<vmem>>, %arg12: memref<1x128x128xbf16, #tpu.memory_space<vmem>>, %arg13: memref<1x1x128xf32, #tpu.memory_space<vmem>>, %arg14: memref<1x128x128xbf16, #tpu.memory_space<vmem>>, %arg15: memref<1x1x128xf32, #tpu.memory_space<vmem>>, %arg16: memref<1x1x128xf32, #tpu.memory_space<vmem>>, %arg17: memref<1x1x128xf32, #tpu.memory_space<vmem>>, %arg18: memref<1x128x512xbf16, #tpu.memory_space<vmem>>, %arg19: memref<1x1x512xf32, #tpu.memory_space<vmem>>, %arg20: memref<1x512x128xbf16, #tpu.memory_space<vmem>>, %arg21: memref<1x1x128xf32, #tpu.memory_space<vmem>>, %arg22: memref<1x128xf32, #tpu.memory_space<vmem>>, %arg23: memref<1x128xf32, #tpu.memory_space<vmem>>, %arg24: memref<2x8x128xf32, #tpu.memory_space<vmem>>, %arg25: memref<16x128xf32, #tpu.memory_space<vmem>>) attributes {dimension_semantics = [#tpu.dimension_semantics<parallel>, #tpu.dimension_semantics<arbitrary>], iteration_bounds = array<i64: 1, 2>, scalar_prefetch = 0 : i64, scratch_operands = 1 : i64, tpu.core_type = #tpu.core_type<tc>, window_params = [{transform_indices = @transform_0, window_bounds = array<i64: 2, 8, 128>}, {pipeline_mode = #tpu.pipeline_mode<synchronous>, transform_indices = @transform_1, window_bounds = array<i64: 8, 128>}, {pipeline_mode = #tpu.pipeline_mode<synchronous>, transform_indices = @transform_2, window_bounds = array<i64: 8, 128>}, {pipeline_mode = #tpu.pipeline_mode<synchronous>, transform_indices = @transform_3, window_bounds = array<i64: 8, 8>}, {transform_indices = @transform_4, window_bounds = array<i64: 1, 1, 128>}, {transform_indices = @transform_5, window_bounds = array<i64: 1, 1, 128>}, {transform_indices = @transform_6, window_bounds = array<i64: 1, 128, 128>}, {transform_indices = @transform_7, window_bounds = array<i64: 1, 1, 128>}, {transform_indices = @transform_8, window_bounds = array<i64: 1, 128, 128>}, {transform_indices = @transform_9, window_bounds = array<i64: 1, 1, 128>}, {transform_indices = @transform_10, window_bounds = array<i64: 1, 128, 128>}, {transform_indices = @transform_11, window_bounds = array<i64: 1, 1, 128>}, {transform_indices = @transform_12, window_bounds = array<i64: 1, 128, 128>}, {transform_indices = @transform_13, window_bounds = array<i64: 1, 1, 128>}, {transform_indices = @transform_14, window_bounds = array<i64: 1, 1, 128>}, {transform_indices = @transform_15, window_bounds = array<i64: 1, 1, 128>}, {transform_indices = @transform_16, window_bounds = array<i64: 1, 128, 512>}, {transform_indices = @transform_17, window_bounds = array<i64: 1, 1, 512>}, {transform_indices = @transform_18, window_bounds = array<i64: 1, 512, 128>}, {transform_indices = @transform_19, window_bounds = array<i64: 1, 1, 128>}, {pipeline_mode = #tpu.pipeline_mode<synchronous>, transform_indices = @transform_20, window_bounds = array<i64: 1, 128>}, {pipeline_mode = #tpu.pipeline_mode<synchronous>, transform_indices = @transform_21, window_bounds = array<i64: 1, 128>}, {transform_indices = @transform_22, window_bounds = array<i64: 2, 8, 128>}]} {
    %c0_i32 = arith.constant 0 : i32
    %0 = arith.cmpi eq, %arg1, %c0_i32 : i32
    %1 = arith.extui %0 : i1 to i32
    %c0_i32_0 = arith.constant 0 : i32
    %2 = arith.cmpi ne, %1, %c0_i32_0 : i32
    scf.if %2 {
      %c0_83 = arith.constant 0 : index
      %c0_84 = arith.constant 0 : index
      %c0_85 = arith.constant 0 : index
      %177 = vector.load %arg2[%c0_83, %c0_84, %c0_85] : memref<2x8x128xf32, #tpu.memory_space<vmem>>, vector<2x8x128xf32>
      %178 = vector.shape_cast %177 : vector<2x8x128xf32> to vector<16x128xf32>
      %c0_86 = arith.constant 0 : index
      %c0_87 = arith.constant 0 : index
      %179 = vector.load %arg25[%c0_86, %c0_87] : memref<16x128xf32, #tpu.memory_space<vmem>>, vector<16x128xf32>
      tpu.vector_store %arg25[%c0_86, %c0_87], %178 {strides = array<i32>} : memref<16x128xf32, #tpu.memory_space<vmem>>, vector<16x128xf32>,
    } else {
    }
    %c0 = arith.constant 0 : index
    %c0_1 = arith.constant 0 : index
    %3 = vector.load %arg25[%c0, %c0_1] : memref<16x128xf32, #tpu.memory_space<vmem>>, vector<16x128xf32>
    %c0_2 = arith.constant 0 : index
    %c0_3 = arith.constant 0 : index
    %4 = vector.load %arg3[%c0_2, %c0_3] : memref<8x128xf32, #tpu.memory_space<vmem>>, vector<8x128xf32>
    %c0_4 = arith.constant 0 : index
    %c0_5 = arith.constant 0 : index
    %5 = vector.load %arg4[%c0_4, %c0_5] : memref<8x128xf32, #tpu.memory_space<vmem>>, vector<8x128xf32>
    %c0_6 = arith.constant 0 : index
    %c0_7 = arith.constant 0 : index
    %c0_8 = arith.constant 0 : index
    %6 = vector.load %arg6[%c0_6, %c0_7, %c0_8] : memref<1x1x128xf32, #tpu.memory_space<vmem>>, vector<1x1x128xf32>
    %7 = vector.shape_cast %6 : vector<1x1x128xf32> to vector<1x128xf32>
    %c0_9 = arith.constant 0 : index
    %c0_10 = arith.constant 0 : index
    %c0_11 = arith.constant 0 : index
    %8 = vector.load %arg7[%c0_9, %c0_10, %c0_11] : memref<1x1x128xf32, #tpu.memory_space<vmem>>, vector<1x1x128xf32>
    %9 = vector.shape_cast %8 : vector<1x1x128xf32> to vector<1x128xf32>
    %cst = arith.constant dense<0.000000e+00> : vector<16xf32>
    %10 = vector.multi_reduction <add>, %3, %cst [1] : vector<16x128xf32> to vector<16xf32>
    %11 = vector.shape_cast %10 : vector<16xf32> to vector<16x1xf32>
    %cst_12 = arith.constant 1.280000e+02 : f32
    %12 = vector.broadcast %cst_12 : f32 to vector<16x1xf32>
    %13 = arith.divf %11, %12 : vector<16x1xf32>
    %14 = vector.broadcast %13 : vector<16x1xf32> to vector<16x128xf32>
    %15 = arith.subf %3, %14 : vector<16x128xf32>
    %16 = arith.mulf %15, %15 : vector<16x128xf32>
    %cst_13 = arith.constant dense<0.000000e+00> : vector<16xf32>
    %17 = vector.multi_reduction <add>, %16, %cst_13 [1] : vector<16x128xf32> to vector<16xf32>
    %18 = vector.shape_cast %17 : vector<16xf32> to vector<16x1xf32>
    %cst_14 = arith.constant 1.280000e+02 : f32
    %19 = vector.broadcast %cst_14 : f32 to vector<16x1xf32>
    %20 = arith.divf %18, %19 : vector<16x1xf32>
    %cst_15 = arith.constant 9.99999974E-6 : f32
    %21 = vector.broadcast %cst_15 : f32 to vector<16x1xf32>
    %22 = arith.addf %20, %21 : vector<16x1xf32>
    %23 = math.rsqrt %22 : vector<16x1xf32>
    %24 = vector.broadcast %23 : vector<16x1xf32> to vector<16x128xf32>
    %25 = arith.mulf %15, %24 : vector<16x128xf32>
    %26 = vector.broadcast %7 : vector<1x128xf32> to vector<16x128xf32>
    %27 = arith.mulf %25, %26 : vector<16x128xf32>
    %28 = vector.broadcast %9 : vector<1x128xf32> to vector<16x128xf32>
    %29 = arith.addf %27, %28 : vector<16x128xf32>
    %30 = arith.truncf %29 : vector<16x128xf32> to vector<16x128xbf16>
    %c0_16 = arith.constant 0 : index
    %c0_17 = arith.constant 0 : index
    %c0_18 = arith.constant 0 : index
    %31 = vector.load %arg8[%c0_16, %c0_17, %c0_18] : memref<1x128x128xbf16, #tpu.memory_space<vmem>>, vector<1x128x128xbf16>
    %32 = vector.shape_cast %31 : vector<1x128x128xbf16> to vector<128x128xbf16>
    %cst_19 = arith.constant dense<0.000000e+00> : vector<16x128xf32>
    %33 = tpu.matmul %30, %32, %cst_19 {dimension_numbers = #tpu.dot_dimension_numbers<[1], [0], [0], [1], [0, 0, 1, 1], [], []>} : vector<16x128xbf16>, vector<128x128xbf16>, vector<16x128xf32> -> vector<16x128xf32>
    %c0_20 = arith.constant 0 : index
    %c0_21 = arith.constant 0 : index
    %c0_22 = arith.constant 0 : index
    %34 = vector.load %arg9[%c0_20, %c0_21, %c0_22] : memref<1x1x128xf32, #tpu.memory_space<vmem>>, vector<1x1x128xf32>
    %35 = vector.shape_cast %34 : vector<1x1x128xf32> to vector<1x128xf32>
    %36 = vector.broadcast %35 : vector<1x128xf32> to vector<16x128xf32>
    %37 = arith.addf %33, %36 : vector<16x128xf32>
    %c0_23 = arith.constant 0 : index
    %c0_24 = arith.constant 0 : index
    %c0_25 = arith.constant 0 : index
    %38 = vector.load %arg10[%c0_23, %c0_24, %c0_25] : memref<1x128x128xbf16, #tpu.memory_space<vmem>>, vector<1x128x128xbf16>
    %39 = vector.shape_cast %38 : vector<1x128x128xbf16> to vector<128x128xbf16>
    %cst_26 = arith.constant dense<0.000000e+00> : vector<16x128xf32>
    %40 = tpu.matmul %30, %39, %cst_26 {dimension_numbers = #tpu.dot_dimension_numbers<[1], [0], [0], [1], [0, 0, 1, 1], [], []>} : vector<16x128xbf16>, vector<128x128xbf16>, vector<16x128xf32> -> vector<16x128xf32>
    %c0_27 = arith.constant 0 : index
    %c0_28 = arith.constant 0 : index
    %c0_29 = arith.constant 0 : index
    %41 = vector.load %arg11[%c0_27, %c0_28, %c0_29] : memref<1x1x128xf32, #tpu.memory_space<vmem>>, vector<1x1x128xf32>
    %42 = vector.shape_cast %41 : vector<1x1x128xf32> to vector<1x128xf32>
    %43 = vector.broadcast %42 : vector<1x128xf32> to vector<16x128xf32>
    %44 = arith.addf %40, %43 : vector<16x128xf32>
    %c0_30 = arith.constant 0 : index
    %c0_31 = arith.constant 0 : index
    %c0_32 = arith.constant 0 : index
    %45 = vector.load %arg12[%c0_30, %c0_31, %c0_32] : memref<1x128x128xbf16, #tpu.memory_space<vmem>>, vector<1x128x128xbf16>
    %46 = vector.shape_cast %45 : vector<1x128x128xbf16> to vector<128x128xbf16>
    %cst_33 = arith.constant dense<0.000000e+00> : vector<16x128xf32>
    %47 = tpu.matmul %30, %46, %cst_33 {dimension_numbers = #tpu.dot_dimension_numbers<[1], [0], [0], [1], [0, 0, 1, 1], [], []>} : vector<16x128xbf16>, vector<128x128xbf16>, vector<16x128xf32> -> vector<16x128xf32>
    %c0_34 = arith.constant 0 : index
    %c0_35 = arith.constant 0 : index
    %c0_36 = arith.constant 0 : index
    %48 = vector.load %arg13[%c0_34, %c0_35, %c0_36] : memref<1x1x128xf32, #tpu.memory_space<vmem>>, vector<1x1x128xf32>
    %49 = vector.shape_cast %48 : vector<1x1x128xf32> to vector<1x128xf32>
    %50 = vector.broadcast %49 : vector<1x128xf32> to vector<16x128xf32>
    %51 = arith.addf %47, %50 : vector<16x128xf32>
    %c64_i32 = arith.constant 64 : i32
    %52 = tpu.dynamic_rotate %37 by %c64_i32 dim 1 : vector<16x128xf32>, i32 -> vector<16x128xf32>
    %53 = vector.shape_cast %37 : vector<16x128xf32> to vector<2x8x128xf32>
    %54 = vector.shape_cast %4 : vector<8x128xf32> to vector<1x8x128xf32>
    %55 = vector.broadcast %54 : vector<1x8x128xf32> to vector<2x8x128xf32>
    %56 = arith.mulf %53, %55 : vector<2x8x128xf32>
    %57 = vector.shape_cast %52 : vector<16x128xf32> to vector<2x8x128xf32>
    %58 = vector.shape_cast %5 : vector<8x128xf32> to vector<1x8x128xf32>
    %59 = vector.broadcast %58 : vector<1x8x128xf32> to vector<2x8x128xf32>
    %60 = arith.mulf %57, %59 : vector<2x8x128xf32>
    %61 = arith.addf %56, %60 : vector<2x8x128xf32>
    %62 = vector.shape_cast %61 : vector<2x8x128xf32> to vector<2x8x8x16xf32>
    %63 = tpu.transpose %62, [0, 2, 1, 3] : vector<2x8x8x16xf32> -> vector<2x8x8x16xf32>
    %64 = vector.shape_cast %63 : vector<2x8x8x16xf32> to vector<16x8x16xf32>
    %65 = arith.truncf %64 : vector<16x8x16xf32> to vector<16x8x16xbf16>
    %c64_i32_37 = arith.constant 64 : i32
    %66 = tpu.dynamic_rotate %44 by %c64_i32_37 dim 1 : vector<16x128xf32>, i32 -> vector<16x128xf32>
    %67 = vector.shape_cast %44 : vector<16x128xf32> to vector<2x8x128xf32>
    %68 = vector.shape_cast %4 : vector<8x128xf32> to vector<1x8x128xf32>
    %69 = vector.broadcast %68 : vector<1x8x128xf32> to vector<2x8x128xf32>
    %70 = arith.mulf %67, %69 : vector<2x8x128xf32>
    %71 = vector.shape_cast %66 : vector<16x128xf32> to vector<2x8x128xf32>
    %72 = vector.shape_cast %5 : vector<8x128xf32> to vector<1x8x128xf32>
    %73 = vector.broadcast %72 : vector<1x8x128xf32> to vector<2x8x128xf32>
    %74 = arith.mulf %71, %73 : vector<2x8x128xf32>
    %75 = arith.addf %70, %74 : vector<2x8x128xf32>
    %76 = vector.shape_cast %75 : vector<2x8x128xf32> to vector<2x8x8x16xf32>
    %77 = tpu.transpose %76, [0, 2, 1, 3] : vector<2x8x8x16xf32> -> vector<2x8x8x16xf32>
    %78 = vector.shape_cast %77 : vector<2x8x8x16xf32> to vector<16x8x16xf32>
    %79 = arith.truncf %78 : vector<16x8x16xf32> to vector<16x8x16xbf16>
    %80 = vector.shape_cast %51 : vector<16x128xf32> to vector<2x8x128xf32>
    %81 = vector.shape_cast %80 : vector<2x8x128xf32> to vector<2x8x4x32xf32>
    %82 = tpu.transpose %81, [0, 2, 1, 3] : vector<2x8x4x32xf32> -> vector<2x4x8x32xf32>
    %83 = vector.shape_cast %82 : vector<2x4x8x32xf32> to vector<8x8x32xf32>
    %84 = arith.truncf %83 : vector<8x8x32xf32> to vector<8x8x32xbf16>
    "tpu.trace_start"() <{level = 10 : i32, message = "bqd,bkd->bqk"}> : () -> ()
    %cst_38 = arith.constant dense<0.000000e+00> : vector<16x8x8xf32>
    %85 = tpu.matmul %65, %79, %cst_38 {dimension_numbers = #tpu.dot_dimension_numbers<[2], [2], [1], [1], [0, 0, 0, 1, 1, 1], [0], [0]>} : vector<16x8x16xbf16>, vector<16x8x16xbf16>, vector<16x8x8xf32> -> vector<16x8x8xf32>
    "tpu.trace_stop"() : () -> ()
    %86 = vector.shape_cast %85 : vector<16x8x8xf32> to vector<2x8x8x8xf32>
    %87 = vector.extract_strided_slice %86 {offsets = [0, 0, 0, 0], sizes = [2, 4, 8, 8], strides = [1, 1, 1, 1]} : vector<2x8x8x8xf32> to vector<2x4x8x8xf32>
    %88 = vector.extract_strided_slice %86 {offsets = [0, 4, 0, 0], sizes = [2, 4, 8, 8], strides = [1, 1, 1, 1]} : vector<2x8x8x8xf32> to vector<2x4x8x8xf32>
    %89 = arith.addf %87, %88 : vector<2x4x8x8xf32>
    %90 = vector.shape_cast %89 : vector<2x4x8x8xf32> to vector<8x8x8xf32>
    %c0_39 = arith.constant 0 : index
    %c0_40 = arith.constant 0 : index
    %91 = vector.load %arg5[%c0_39, %c0_40] : memref<8x8xf32, #tpu.memory_space<vmem>>, vector<8x8xf32>
    %92 = vector.shape_cast %91 : vector<8x8xf32> to vector<1x8x8xf32>
    %93 = vector.broadcast %92 : vector<1x8x8xf32> to vector<8x8x8xf32>
    %94 = arith.addf %90, %93 : vector<8x8x8xf32>
    %cst_41 = arith.constant dense<0xFF800000> : vector<8x8xf32>
    %95 = vector.multi_reduction <maximumf>, %94, %cst_41 [2] : vector<8x8x8xf32> to vector<8x8xf32>
    %96 = vector.shape_cast %95 : vector<8x8xf32> to vector<8x8x1xf32>
    %97 = vector.broadcast %96 : vector<8x8x1xf32> to vector<8x8x8xf32>
    %98 = arith.subf %94, %97 : vector<8x8x8xf32>
    %99 = math.exp %98 : vector<8x8x8xf32>
    %cst_42 = arith.constant dense<0.000000e+00> : vector<8x8xf32>
    %100 = vector.multi_reduction <add>, %99, %cst_42 [2] : vector<8x8x8xf32> to vector<8x8xf32>
    %101 = vector.shape_cast %100 : vector<8x8xf32> to vector<8x8x1xf32>
    %102 = tpu.reciprocal %101 {approx = true} : vector<8x8x1xf32> -> vector<8x8x1xf32>
    %103 = vector.broadcast %102 : vector<8x8x1xf32> to vector<8x8x8xf32>
    %104 = arith.mulf %99, %103 : vector<8x8x8xf32>
    %105 = arith.truncf %104 : vector<8x8x8xf32> to vector<8x8x8xbf16>
    "tpu.trace_start"() <{level = 10 : i32, message = "bqk,bkd->bqd"}> : () -> ()
    %cst_43 = arith.constant dense<0.000000e+00> : vector<8x8x32xf32>
    %106 = tpu.matmul %105, %84, %cst_43 {dimension_numbers = #tpu.dot_dimension_numbers<[2], [1], [1], [2], [0, 0, 0, 1, 1, 2], [0], [0]>} : vector<8x8x8xbf16>, vector<8x8x32xbf16>, vector<8x8x32xf32> -> vector<8x8x32xf32>
    "tpu.trace_stop"() : () -> ()
    %107 = vector.shape_cast %106 : vector<8x8x32xf32> to vector<2x4x8x32xf32>
    %108 = tpu.transpose %107, [0, 2, 1, 3] : vector<2x4x8x32xf32> -> vector<2x8x4x32xf32>
    %109 = vector.shape_cast %108 : vector<2x8x4x32xf32> to vector<16x128xf32>
    %110 = arith.truncf %109 : vector<16x128xf32> to vector<16x128xbf16>
    %c0_44 = arith.constant 0 : index
    %c0_45 = arith.constant 0 : index
    %c0_46 = arith.constant 0 : index
    %111 = vector.load %arg14[%c0_44, %c0_45, %c0_46] : memref<1x128x128xbf16, #tpu.memory_space<vmem>>, vector<1x128x128xbf16>
    %112 = vector.shape_cast %111 : vector<1x128x128xbf16> to vector<128x128xbf16>
    %cst_47 = arith.constant dense<0.000000e+00> : vector<16x128xf32>
    %113 = tpu.matmul %110, %112, %cst_47 {dimension_numbers = #tpu.dot_dimension_numbers<[1], [0], [0], [1], [0, 0, 1, 1], [], []>} : vector<16x128xbf16>, vector<128x128xbf16>, vector<16x128xf32> -> vector<16x128xf32>
    %c0_48 = arith.constant 0 : index
    %c0_49 = arith.constant 0 : index
    %c0_50 = arith.constant 0 : index
    %114 = vector.load %arg15[%c0_48, %c0_49, %c0_50] : memref<1x1x128xf32, #tpu.memory_space<vmem>>, vector<1x1x128xf32>
    %115 = vector.shape_cast %114 : vector<1x1x128xf32> to vector<1x128xf32>
    %116 = vector.broadcast %115 : vector<1x128xf32> to vector<16x128xf32>
    %117 = arith.addf %113, %116 : vector<16x128xf32>
    %118 = arith.addf %3, %117 : vector<16x128xf32>
    %c0_51 = arith.constant 0 : index
    %c0_52 = arith.constant 0 : index
    %c0_53 = arith.constant 0 : index
    %119 = vector.load %arg16[%c0_51, %c0_52, %c0_53] : memref<1x1x128xf32, #tpu.memory_space<vmem>>, vector<1x1x128xf32>
    %120 = vector.shape_cast %119 : vector<1x1x128xf32> to vector<1x128xf32>
    %c0_54 = arith.constant 0 : index
    %c0_55 = arith.constant 0 : index
    %c0_56 = arith.constant 0 : index
    %121 = vector.load %arg17[%c0_54, %c0_55, %c0_56] : memref<1x1x128xf32, #tpu.memory_space<vmem>>, vector<1x1x128xf32>
    %122 = vector.shape_cast %121 : vector<1x1x128xf32> to vector<1x128xf32>
    %cst_57 = arith.constant dense<0.000000e+00> : vector<16xf32>
    %123 = vector.multi_reduction <add>, %118, %cst_57 [1] : vector<16x128xf32> to vector<16xf32>
    %124 = vector.shape_cast %123 : vector<16xf32> to vector<16x1xf32>
    %cst_58 = arith.constant 1.280000e+02 : f32
    %125 = vector.broadcast %cst_58 : f32 to vector<16x1xf32>
    %126 = arith.divf %124, %125 : vector<16x1xf32>
    %127 = vector.broadcast %126 : vector<16x1xf32> to vector<16x128xf32>
    %128 = arith.subf %118, %127 : vector<16x128xf32>
    %129 = arith.mulf %128, %128 : vector<16x128xf32>
    %cst_59 = arith.constant dense<0.000000e+00> : vector<16xf32>
    %130 = vector.multi_reduction <add>, %129, %cst_59 [1] : vector<16x128xf32> to vector<16xf32>
    %131 = vector.shape_cast %130 : vector<16xf32> to vector<16x1xf32>
    %cst_60 = arith.constant 1.280000e+02 : f32
    %132 = vector.broadcast %cst_60 : f32 to vector<16x1xf32>
    %133 = arith.divf %131, %132 : vector<16x1xf32>
    %cst_61 = arith.constant 9.99999974E-6 : f32
    %134 = vector.broadcast %cst_61 : f32 to vector<16x1xf32>
    %135 = arith.addf %133, %134 : vector<16x1xf32>
    %136 = math.rsqrt %135 : vector<16x1xf32>
    %137 = vector.broadcast %136 : vector<16x1xf32> to vector<16x128xf32>
    %138 = arith.mulf %128, %137 : vector<16x128xf32>
    %139 = vector.broadcast %120 : vector<1x128xf32> to vector<16x128xf32>
    %140 = arith.mulf %138, %139 : vector<16x128xf32>
    %141 = vector.broadcast %122 : vector<1x128xf32> to vector<16x128xf32>
    %142 = arith.addf %140, %141 : vector<16x128xf32>
    %143 = arith.truncf %142 : vector<16x128xf32> to vector<16x128xbf16>
    %c0_62 = arith.constant 0 : index
    %c0_63 = arith.constant 0 : index
    %c0_64 = arith.constant 0 : index
    %144 = vector.load %arg18[%c0_62, %c0_63, %c0_64] : memref<1x128x512xbf16, #tpu.memory_space<vmem>>, vector<1x128x512xbf16>
    %145 = vector.shape_cast %144 : vector<1x128x512xbf16> to vector<128x512xbf16>
    %cst_65 = arith.constant dense<0.000000e+00> : vector<16x512xf32>
    %146 = tpu.matmul %143, %145, %cst_65 {dimension_numbers = #tpu.dot_dimension_numbers<[1], [0], [0], [1], [0, 0, 1, 1], [], []>} : vector<16x128xbf16>, vector<128x512xbf16>, vector<16x512xf32> -> vector<16x512xf32>
    %c0_66 = arith.constant 0 : index
    %c0_67 = arith.constant 0 : index
    %c0_68 = arith.constant 0 : index
    %147 = vector.load %arg19[%c0_66, %c0_67, %c0_68] : memref<1x1x512xf32, #tpu.memory_space<vmem>>, vector<1x1x512xf32>
    %148 = vector.shape_cast %147 : vector<1x1x512xf32> to vector<1x512xf32>
    %149 = vector.broadcast %148 : vector<1x512xf32> to vector<16x512xf32>
    %150 = arith.addf %146, %149 : vector<16x512xf32>
    %cst_69 = arith.constant 5.000000e-01 : f32
    %151 = vector.broadcast %cst_69 : f32 to vector<16x512xf32>
    %152 = arith.mulf %151, %150 : vector<16x512xf32>
    %cst_70 = arith.constant 4.471500e-02 : f32
    %153 = vector.broadcast %cst_70 : f32 to vector<16x512xf32>
    %154 = arith.mulf %153, %150 : vector<16x512xf32>
    %155 = arith.mulf %154, %150 : vector<16x512xf32>
    %156 = arith.mulf %155, %150 : vector<16x512xf32>
    %157 = arith.addf %150, %156 : vector<16x512xf32>
    %cst_71 = arith.constant 0.797884583 : f32
    %158 = vector.broadcast %cst_71 : f32 to vector<16x512xf32>
    %159 = arith.mulf %158, %157 : vector<16x512xf32>
    %160 = math.tanh %159 : vector<16x512xf32>
    %cst_72 = arith.constant 1.000000e+00 : f32
    %161 = vector.broadcast %cst_72 : f32 to vector<16x512xf32>
    %162 = arith.addf %161, %160 : vector<16x512xf32>
    %163 = arith.mulf %152, %162 : vector<16x512xf32>
    %164 = arith.truncf %163 : vector<16x512xf32> to vector<16x512xbf16>
    %c0_73 = arith.constant 0 : index
    %c0_74 = arith.constant 0 : index
    %c0_75 = arith.constant 0 : index
    %165 = vector.load %arg20[%c0_73, %c0_74, %c0_75] : memref<1x512x128xbf16, #tpu.memory_space<vmem>>, vector<1x512x128xbf16>
    %166 = vector.shape_cast %165 : vector<1x512x128xbf16> to vector<512x128xbf16>
    %cst_76 = arith.constant dense<0.000000e+00> : vector<16x128xf32>
    %167 = tpu.matmul %164, %166, %cst_76 {dimension_numbers = #tpu.dot_dimension_numbers<[1], [0], [0], [1], [0, 0, 1, 1], [], []>} : vector<16x512xbf16>, vector<512x128xbf16>, vector<16x128xf32> -> vector<16x128xf32>
    %c0_77 = arith.constant 0 : index
    %c0_78 = arith.constant 0 : index
    %c0_79 = arith.constant 0 : index
    %168 = vector.load %arg21[%c0_77, %c0_78, %c0_79] : memref<1x1x128xf32, #tpu.memory_space<vmem>>, vector<1x1x128xf32>
    %169 = vector.shape_cast %168 : vector<1x1x128xf32> to vector<1x128xf32>
    %170 = vector.broadcast %169 : vector<1x128xf32> to vector<16x128xf32>
    %171 = arith.addf %167, %170 : vector<16x128xf32>
    %172 = arith.addf %118, %171 : vector<16x128xf32>
    %c0_80 = arith.constant 0 : index
    %c0_81 = arith.constant 0 : index
    %173 = vector.load %arg25[%c0_80, %c0_81] : memref<16x128xf32, #tpu.memory_space<vmem>>, vector<16x128xf32>
    tpu.vector_store %arg25[%c0_80, %c0_81], %172 {strides = array<i32>} : memref<16x128xf32, #tpu.memory_space<vmem>>, vector<16x128xf32>,
    %c1_i32 = arith.constant 1 : i32
    %174 = arith.cmpi eq, %arg1, %c1_i32 : i32
    %175 = arith.extui %174 : i1 to i32
    %c0_i32_82 = arith.constant 0 : i32
    %176 = arith.cmpi ne, %175, %c0_i32_82 : i32
    scf.if %176 {
      %c0_83 = arith.constant 0 : index
      %c0_84 = arith.constant 0 : index
      %177 = vector.load %arg22[%c0_83, %c0_84] : memref<1x128xf32, #tpu.memory_space<vmem>>, vector<1x128xf32>
      %c0_85 = arith.constant 0 : index
      %c0_86 = arith.constant 0 : index
      %178 = vector.load %arg23[%c0_85, %c0_86] : memref<1x128xf32, #tpu.memory_space<vmem>>, vector<1x128xf32>
      %cst_87 = arith.constant dense<0.000000e+00> : vector<16xf32>
      %179 = vector.multi_reduction <add>, %172, %cst_87 [1] : vector<16x128xf32> to vector<16xf32>
      %180 = vector.shape_cast %179 : vector<16xf32> to vector<16x1xf32>
      %cst_88 = arith.constant 1.280000e+02 : f32
      %181 = vector.broadcast %cst_88 : f32 to vector<16x1xf32>
      %182 = arith.divf %180, %181 : vector<16x1xf32>
      %183 = vector.broadcast %182 : vector<16x1xf32> to vector<16x128xf32>
      %184 = arith.subf %172, %183 : vector<16x128xf32>
      %185 = arith.mulf %184, %184 : vector<16x128xf32>
      %cst_89 = arith.constant dense<0.000000e+00> : vector<16xf32>
      %186 = vector.multi_reduction <add>, %185, %cst_89 [1] : vector<16x128xf32> to vector<16xf32>
      %187 = vector.shape_cast %186 : vector<16xf32> to vector<16x1xf32>
      %cst_90 = arith.constant 1.280000e+02 : f32
      %188 = vector.broadcast %cst_90 : f32 to vector<16x1xf32>
      %189 = arith.divf %187, %188 : vector<16x1xf32>
      %cst_91 = arith.constant 9.99999974E-6 : f32
      %190 = vector.broadcast %cst_91 : f32 to vector<16x1xf32>
      %191 = arith.addf %189, %190 : vector<16x1xf32>
      %192 = math.rsqrt %191 : vector<16x1xf32>
      %193 = vector.broadcast %192 : vector<16x1xf32> to vector<16x128xf32>
      %194 = arith.mulf %184, %193 : vector<16x128xf32>
      %195 = vector.broadcast %177 : vector<1x128xf32> to vector<16x128xf32>
      %196 = arith.mulf %194, %195 : vector<16x128xf32>
      %197 = vector.broadcast %178 : vector<1x128xf32> to vector<16x128xf32>
      %198 = arith.addf %196, %197 : vector<16x128xf32>
      %199 = vector.shape_cast %198 : vector<16x128xf32> to vector<2x8x128xf32>
      %c0_92 = arith.constant 0 : index
      %c0_93 = arith.constant 0 : index
      %c0_94 = arith.constant 0 : index
      %200 = vector.load %arg24[%c0_92, %c0_93, %c0_94] : memref<2x8x128xf32, #tpu.memory_space<vmem>>, vector<2x8x128xf32>
      tpu.vector_store %arg24[%c0_92, %c0_93, %c0_94], %199 {strides = array<i32>} : memref<2x8x128xf32, #tpu.memory_space<vmem>>, vector<2x8x128xf32>,
    } else {
    }
    return
  }
  func.func @transform_0(%arg0: i32, %arg1: i32) -> (i32, i32, i32) {
    %c0_i32 = arith.constant 0 : i32
    %c0_i32_0 = arith.constant 0 : i32
    %c0_i32_1 = arith.constant 0 : i32
    return %arg0, %c0_i32, %c0_i32_0 : i32, i32, i32
  }
  func.func @transform_1(%arg0: i32, %arg1: i32) -> (i32, i32) {
    %c0_i32 = arith.constant 0 : i32
    %c0_i32_0 = arith.constant 0 : i32
    %c0_i32_1 = arith.constant 0 : i32
    return %c0_i32, %c0_i32_0 : i32, i32
  }
  func.func @transform_2(%arg0: i32, %arg1: i32) -> (i32, i32) {
    %c0_i32 = arith.constant 0 : i32
    %c0_i32_0 = arith.constant 0 : i32
    %c0_i32_1 = arith.constant 0 : i32
    return %c0_i32, %c0_i32_0 : i32, i32
  }
  func.func @transform_3(%arg0: i32, %arg1: i32) -> (i32, i32) {
    %c0_i32 = arith.constant 0 : i32
    %c0_i32_0 = arith.constant 0 : i32
    %c0_i32_1 = arith.constant 0 : i32
    return %c0_i32, %c0_i32_0 : i32, i32
  }
  func.func @transform_4(%arg0: i32, %arg1: i32) -> (i32, i32, i32) {
    %c0_i32 = arith.constant 0 : i32
    %c0_i32_0 = arith.constant 0 : i32
    %c0_i32_1 = arith.constant 0 : i32
    return %arg1, %c0_i32, %c0_i32_0 : i32, i32, i32
  }
  func.func @transform_5(%arg0: i32, %arg1: i32) -> (i32, i32, i32) {
    %c0_i32 = arith.constant 0 : i32
    %c0_i32_0 = arith.constant 0 : i32
    %c0_i32_1 = arith.constant 0 : i32
    return %arg1, %c0_i32, %c0_i32_0 : i32, i32, i32
  }
  func.func @transform_6(%arg0: i32, %arg1: i32) -> (i32, i32, i32) {
    %c0_i32 = arith.constant 0 : i32
    %c0_i32_0 = arith.constant 0 : i32
    %c0_i32_1 = arith.constant 0 : i32
    return %arg1, %c0_i32, %c0_i32_0 : i32, i32, i32
  }
  func.func @transform_7(%arg0: i32, %arg1: i32) -> (i32, i32, i32) {
    %c0_i32 = arith.constant 0 : i32
    %c0_i32_0 = arith.constant 0 : i32
    %c0_i32_1 = arith.constant 0 : i32
    return %arg1, %c0_i32, %c0_i32_0 : i32, i32, i32
  }
  func.func @transform_8(%arg0: i32, %arg1: i32) -> (i32, i32, i32) {
    %c0_i32 = arith.constant 0 : i32
    %c0_i32_0 = arith.constant 0 : i32
    %c0_i32_1 = arith.constant 0 : i32
    return %arg1, %c0_i32, %c0_i32_0 : i32, i32, i32
  }
  func.func @transform_9(%arg0: i32, %arg1: i32) -> (i32, i32, i32) {
    %c0_i32 = arith.constant 0 : i32
    %c0_i32_0 = arith.constant 0 : i32
    %c0_i32_1 = arith.constant 0 : i32
    return %arg1, %c0_i32, %c0_i32_0 : i32, i32, i32
  }
  func.func @transform_10(%arg0: i32, %arg1: i32) -> (i32, i32, i32) {
    %c0_i32 = arith.constant 0 : i32
    %c0_i32_0 = arith.constant 0 : i32
    %c0_i32_1 = arith.constant 0 : i32
    return %arg1, %c0_i32, %c0_i32_0 : i32, i32, i32
  }
  func.func @transform_11(%arg0: i32, %arg1: i32) -> (i32, i32, i32) {
    %c0_i32 = arith.constant 0 : i32
    %c0_i32_0 = arith.constant 0 : i32
    %c0_i32_1 = arith.constant 0 : i32
    return %arg1, %c0_i32, %c0_i32_0 : i32, i32, i32
  }
  func.func @transform_12(%arg0: i32, %arg1: i32) -> (i32, i32, i32) {
    %c0_i32 = arith.constant 0 : i32
    %c0_i32_0 = arith.constant 0 : i32
    %c0_i32_1 = arith.constant 0 : i32
    return %arg1, %c0_i32, %c0_i32_0 : i32, i32, i32
  }
  func.func @transform_13(%arg0: i32, %arg1: i32) -> (i32, i32, i32) {
    %c0_i32 = arith.constant 0 : i32
    %c0_i32_0 = arith.constant 0 : i32
    %c0_i32_1 = arith.constant 0 : i32
    return %arg1, %c0_i32, %c0_i32_0 : i32, i32, i32
  }
  func.func @transform_14(%arg0: i32, %arg1: i32) -> (i32, i32, i32) {
    %c0_i32 = arith.constant 0 : i32
    %c0_i32_0 = arith.constant 0 : i32
    %c0_i32_1 = arith.constant 0 : i32
    return %arg1, %c0_i32, %c0_i32_0 : i32, i32, i32
  }
  func.func @transform_15(%arg0: i32, %arg1: i32) -> (i32, i32, i32) {
    %c0_i32 = arith.constant 0 : i32
    %c0_i32_0 = arith.constant 0 : i32
    %c0_i32_1 = arith.constant 0 : i32
    return %arg1, %c0_i32, %c0_i32_0 : i32, i32, i32
  }
  func.func @transform_16(%arg0: i32, %arg1: i32) -> (i32, i32, i32) {
    %c0_i32 = arith.constant 0 : i32
    %c0_i32_0 = arith.constant 0 : i32
    %c0_i32_1 = arith.constant 0 : i32
    return %arg1, %c0_i32, %c0_i32_0 : i32, i32, i32
  }
  func.func @transform_17(%arg0: i32, %arg1: i32) -> (i32, i32, i32) {
    %c0_i32 = arith.constant 0 : i32
    %c0_i32_0 = arith.constant 0 : i32
    %c0_i32_1 = arith.constant 0 : i32
    return %arg1, %c0_i32, %c0_i32_0 : i32, i32, i32
  }
  func.func @transform_18(%arg0: i32, %arg1: i32) -> (i32, i32, i32) {
    %c0_i32 = arith.constant 0 : i32
    %c0_i32_0 = arith.constant 0 : i32
    %c0_i32_1 = arith.constant 0 : i32
    return %arg1, %c0_i32, %c0_i32_0 : i32, i32, i32
  }
  func.func @transform_19(%arg0: i32, %arg1: i32) -> (i32, i32, i32) {
    %c0_i32 = arith.constant 0 : i32
    %c0_i32_0 = arith.constant 0 : i32
    %c0_i32_1 = arith.constant 0 : i32
    return %arg1, %c0_i32, %c0_i32_0 : i32, i32, i32
  }
  func.func @transform_20(%arg0: i32, %arg1: i32) -> (i32, i32) {
    %c0_i32 = arith.constant 0 : i32
    %c0_i32_0 = arith.constant 0 : i32
    %c0_i32_1 = arith.constant 0 : i32
    return %c0_i32, %c0_i32_0 : i32, i32
  }
  func.func @transform_21(%arg0: i32, %arg1: i32) -> (i32, i32) {
    %c0_i32 = arith.constant 0 : i32
    %c0_i32_0 = arith.constant 0 : i32
    %c0_i32_1 = arith.constant 0 : i32
    return %c0_i32, %c0_i32_0 : i32, i32
  }
  func.func @transform_22(%arg0: i32, %arg1: i32) -> (i32, i32, i32) {
    %c0_i32 = arith.constant 0 : i32
    %c0_i32_0 = arith.constant 0 : i32
    %c0_i32_1 = arith.constant 0 : i32
    return %arg0, %c0_i32, %c0_i32_0 : i32, i32, i32
  }
}

</mosaic_0001>

<bundles_post_ra>
// kernel: transformer_forward.1
= control target key start
LH: loop header
LB: loop body
LE: loop exit
PB: predicated region body
PF: predicated region fallthrough
CT: control target
= control target key end

     0   :  { %s7902_s0 = inlined_call_operand.hbm [shape: f32[2,8,128], index: 0, kind: input, shape index: {}]   ;;  %s7903_s1 = inlined_call_operand.hbm [shape: f32[8,128], index: 1, kind: input, shape index: {}]   ;;  %s7904_s2 = inlined_call_operand.hbm [shape: f32[8,128], index: 2, kind: input, shape index: {}]   ;;  %s7905_s3 = inlined_call_operand.hbm [shape: f32[8,8], index: 3, kind: input, shape index: {}]   ;;  %s7906_s4 = inlined_call_operand.vmem [shape: f32[2,1,128], index: 4, kind: input, shape index: {}]   ;;  %s7907_s5 = inlined_call_operand.vmem [shape: f32[2,1,128], index: 5, kind: input, shape index: {}]   ;;  %s7908_s6 = inlined_call_operand.hbm [shape: bf16[2,128,128], index: 6, kind: input, shape index: {}]   ;;  %s7909_s7 = inlined_call_operand.vmem [shape: f32[2,1,128], index: 7, kind: input, shape index: {}]   ;;  %s7910_s8 = inlined_call_operand.hbm [shape: bf16[2,128,128], index: 8, kind: input, shape index: {}]   ;;  %s7911_s9 = inlined_call_operand.hbm [shape: f32[2,1,128], index: 9, kind: input, shape index: {}]   ;;  %s7912_s10 = inlined_call_operand.hbm [shape: bf16[2,128,128], index: 10, kind: input, shape index: {}]   ;;  %s7913_s11 = inlined_call_operand.vmem [shape: f32[2,1,128], index: 11, kind: input, shape index: {}]   ;;  %s7914_s12 = inlined_call_operand.hbm [shape: bf16[2,128,128], index: 12, kind: input, shape index: {}]   ;;  %s7915_s13 = inlined_call_operand.hbm [shape: f32[2,1,128], index: 13, kind: input, shape index: {}]   ;;  %s7916_s14 = inlined_call_operand.vmem [shape: f32[2,1,128], index: 14, kind: input, shape index: {}]   ;;  %s7917_s15 = inlined_call_operand.hbm [shape: f32[2,1,128], index: 15, kind: input, shape index: {}]   ;;  %s7918_s16 = inlined_call_operand.hbm [shape: bf16[2,128,512], index: 16, kind: input, shape index: {}]   ;;  %s7919_s17 = inlined_call_operand.hbm [shape: f32[2,1,512], index: 17, kind: input, shape index: {}]   ;;  %s7920_s18 = inlined_call_operand.hbm [shape: bf16[2,512,128], index: 18, kind: input, shape index: {}]   ;;  %s7921_s19 = inlined_call_operand.hbm [shape: f32[2,1,128], index: 19, kind: input, shape index: {}]   ;;  %s7922_s20 = inlined_call_operand.vmem [shape: f32[1,128], index: 20, kind: input, shape index: {}]   ;;  %s7923_s21 = inlined_call_operand.vmem [shape: f32[1,128], index: 21, kind: input, shape index: {}]   ;;  %s7924_s22 = inlined_call_operand.hbm [shape: f32[2,8,128], index: 22, kind: output, shape index: {}]  }
   0x1   :  { %7934 = sst [smem:[#allocation34_spill]] %s7902_s0 }
   0x2   :  { %7935 = sst [smem:[#allocation35_spill]] %s7903_s1 }
   0x3   :  { %7936 = sst [smem:[#allocation36_spill]] %s7904_s2 }
   0x4   :  { %7937 = sst [smem:[#allocation37_spill]] %s7905_s3 }
   0x5   :  { %7938 = sst [smem:[#allocation38_spill]] %s7906_s4 }
   0x6   :  { %7939 = sst [smem:[#allocation39_spill]] %s7907_s5 }
   0x7   :  { %7940 = sst [smem:[#allocation40_spill]] %s7908_s6 }
   0x8   :  { %7941 = sst [smem:[#allocation41_spill]] %s7909_s7 }
   0x9   :  { %7942 = sst [smem:[#allocation42_spill]] %s7910_s8 }
   0xa   :  { %7943 = sst [smem:[#allocation43_spill]] %s7911_s9 }
   0xb   :  { %7944 = sst [smem:[#allocation44_spill]] %s7912_s10 }
   0xc   :  { %7945 = sst [smem:[#allocation45_spill]] %s7913_s11 }
   0xd   :  { %7946 = sst [smem:[#allocation46_spill]] %s7914_s12 }
   0xe   :  { %7947 = sst [smem:[#allocation47_spill]] %s7915_s13 }
   0xf   :  { %7948 = sst [smem:[#allocation48_spill]] %s7916_s14 }
  0x10   :  { %7949 = sst [smem:[#allocation49_spill]] %s7917_s15 }
  0x11   :  { %7950 = sst [smem:[#allocation50_spill]] %s7918_s16 }
  0x12   :  { %7951 = sst [smem:[#allocation51_spill]] %s7919_s17 }
  0x13   :  { %7952 = sst [smem:[#allocation52_spill]] %s7920_s18 }
  0x14   :  { %7953 = sst [smem:[#allocation53_spill]] %s7922_s20 }
  0x15   :  { %7954 = sst [smem:[#allocation54_spill]] %s7923_s21 }
  0x16   :  { %7955 = sst [smem:[#allocation55_spill]] %s7924_s22 }
  0x17   :  { %27 = vsyncpa [#allocation4], 0 }
  0x18   :  { %28 = vsyncpa [#allocation7], 0 }
  0x19   :  { %29 = vsyncpa [#allocation10], 0 }
  0x1a   :  { %30 = vsyncpa [#allocation5], 0  ;;  %s6384_s3 = smov 0   ;;  %s6386_s28 = smov 0  }
  0x1b   :  { %s6388_s29 = smov 0   ;;  %s6390_s30 = smov 0  }
  0x1c   :  { %s6392_s4 = smov 0   ;;  %s6394_s0 = smov 0  }
  0x1d LB: > { %7956 = sst [smem:[#allocation28_spill]] %s6232_s29  ;;  %s6413_s23 = sadd.s32 4294967295, %s6244_s0   ;;  %s6244_s0 = sphi %s6394_s0, %s36_s0   ;;  %s6240_s4 = sphi %s6392_s4, %s8007_s4   ;;  %s6236_s30 = sphi %s6390_s30, %s8006_s30   ;;  %s6232_s29 = sphi %s6388_s29, %s8002_s29   ;;  %s6228_s28 = sphi %s6386_s28, %s8005_s28   ;;  %s6224_s3 = sphi %s6384_s3, %s8004_s3  }
  0x1e   : > { %7957 = sst [smem:[#allocation29_spill]] %s6236_s30  ;;  %s45_s1 = sadd.s32 1, %s6240_s4 }
  0x1f   : > { %7958 = sst [smem:[#allocation30_spill]] %s6244_s0  ;;  %p46_p0 = scmp.ge.s32.totalorder %s45_s1, 2 }
  0x20   : > { %s196_s5 = sadd.s32 1, %s6232_s29  ;;  %p203_p1 = scmp.ne.s32.totalorder %s6232_s29, %s6228_s28 }
  0x21   : > { %p204_p2 = scmp.eq.s32.totalorder %s6244_s0, 0  ;;  %s8009_s1 = smov (%p46_p0, %s45_s1), 0 }
  0x22   : > { %7959 = sst [smem:[#allocation31_spill]] %s8009_s1  ;;  %p209_p4 = scmp.ne.s32.totalorder %s6228_s28, %s6224_s3 }
  0x23   : > { %p6422_p3 = por %p204_p2, %p203_p1  ;;  %s193_s6 = ssub.s32 %s6240_s4, %s8009_s1 }
  0x24   : > { %p210_p5 = scmp.eq.s32.totalorder %s6413_s23, 0  ;;  %p194_p6 = scmp.eq.s32.totalorder %s193_s6, 0 }
  0x25   : > { %p4830_p7 = scmp.ge.s32.totalorder %s6244_s0, 1  ;;  %p626_p9 = scmp.lt.s32.totalorder %s6244_s0, 3 }
  0x26   : > { %p6433_p8 = por %p210_p5, %p209_p4  ;;  %s7965_s1 = sld [smem:[#allocation34_spill]] }
  0x27   : > { %s6439_s26 = scalar_select %p194_p6, %s6232_s29, %s196_s5  }
  0x28   : > { %s7961_s25 = scalar_select %p6433_p8, 1, 0 }
  0x29   : > { %7963 = sst [smem:[#allocation33_spill]] %s6439_s26  ;;  %p6441_p10 = pnand %p4830_p7, %p626_p9 }
  0x2a   : > { %7962 = sst [smem:[#allocation32_spill]] %s7961_s25  ;;  %s6246_s22 = smov [#allocation3]  }
  0x2b   : > { %p5426_p11 = pneg %p6441_p10  ;;  %s642_s21 = sshll.u32 %s6246_s22, 4  ;;  %s643_s21 = int_to_ptr.vmem [resolvable:$true] %s642_s21 }
  0x2c   : > { %s640_s6 = sshll.u32 %s7965_s1, 4  ;;  %p5477_p13 = scmp.lt.s32.totalorder %s6244_s0, 2  ;;  %s641_s6 = int_to_ptr.hbm [resolvable:$true] %s640_s6 }
  0x2d   : > { %p6452_p12 = pnand %p5426_p11, %p210_p5  ;;  %s6247_s26 = smov 128  }
  0x2e   : > { %s6248_s20 = smov 8   ;;  %s6460_s27 = sand.u32 1, %s6232_s29  }
  0x2f   : > { %5429 = dma.hbm_to_vmem [thread:$0]  (!%p6452_p12), %s641_s6, 256, %s643_s21, [#allocation4], %s6247_s26, %s6247_s26, %s6248_s20  }
  0x30   : > { %p6464_p0 = pnand %p5477_p13, %p6422_p3  ;;  %s710_s22 = sand.u32 1, %s6244_s0  }
  0x31   : > { %s6470_s3 = sshll.u32 %s6460_s27, 6  ;;  %s6473_s14 = sshll.u32 %s6240_s4, 6 }
  0x32   : > { %s7968_s20 = sld [smem:[#allocation40_spill]]  ;;  %s714_s24 = scalar_lea.vmem [#allocation11], %s6470_s3 }
  0x33   : > { %s722_s26 = sshll.u32 %s714_s24, 4  ;;  %s6480_s29 = scalar_lea.sflag [#allocation4], %s710_s22  ;;  %s723_s26 = int_to_ptr.vmem [resolvable:$true] %s722_s26 }
  0x34   : > { %s7931_s0 = smov 64   ;;  %s7933_s30 = smov 4  }
  0x35   : > { %s7969_s8 = sld [smem:[#allocation42_spill]]  ;;  %s763_s7 = scalar_lea.vmem [#allocation13], %s6460_s27 }
  0x36   : > { %s7970_s9 = sld [smem:[#allocation43_spill]]  ;;  %s770_s11 = sshll.u32 %s763_s7, 4  ;;  %s771_s11 = int_to_ptr.vmem [resolvable:$true] %s770_s11 }
  0x37   : > { %s7971_s10 = sld [smem:[#allocation44_spill]] }
  0x38   : > { %s719_s21 = scalar_lea.hbm %s7968_s20, %s6473_s14  ;;  %s7973_s12 = sld [smem:[#allocation46_spill]] }
  0x39   : > { %s720_s6 = sshll.u32 %s719_s21, 4  ;;  %s742_s21 = scalar_lea.vmem [#allocation12], %s6470_s3  ;;  %s721_s6 = int_to_ptr.hbm [resolvable:$true] %s720_s6 }
  0x3a   : > { %5442 = dma.hbm_to_vmem [thread:$0]  (!%p6464_p0), %s721_s6, 1024, %s723_s26, %s6480_s29, %s7931_s0, %s7931_s0, %s7933_s30  }
  0x3b   : > { %s747_s20 = scalar_lea.hbm %s7969_s8, %s6473_s14  ;;  %s750_s22 = sshll.u32 %s742_s21, 4  ;;  %s751_s22 = int_to_ptr.vmem [resolvable:$true] %s750_s22 }
  0x3c   : > { %s748_s24 = sshll.u32 %s747_s20, 4  ;;  %s766_s6 = scalar_lea.hbm %s7970_s9, %s6240_s4  ;;  %s749_s24 = int_to_ptr.hbm [resolvable:$true] %s748_s24 }
  0x3d   : > { %5445 = dma.hbm_to_vmem [thread:$0]  (!%p6464_p0), %s749_s24, 1024, %s751_s22, %s6480_s29, %s7931_s0, %s7931_s0, %s7933_s30  }
  0x3e   : > { %s768_s8 = sshll.u32 %s766_s6, 4  ;;  %s786_s22 = scalar_lea.hbm %s7971_s10, %s6473_s14  ;;  %s769_s8 = int_to_ptr.hbm [resolvable:$true] %s768_s8 }
  0x3f   : > { %5448 = dma.hbm_to_vmem [thread:$0]  (!%p6464_p0), %s769_s8, 16, %s771_s11, %s6480_s29  }
  0x40   : > { %s781_s24 = scalar_lea.vmem [#allocation14], %s6470_s3  ;;  %s787_s25 = sshll.u32 %s786_s22, 4  ;;  %s788_s25 = int_to_ptr.hbm [resolvable:$true] %s787_s25 }
  0x41   : > { %s789_s0 = sshll.u32 %s781_s24, 4  ;;  %s7972_s26 = smov 64   ;;  %s790_s0 = int_to_ptr.vmem [resolvable:$true] %s789_s0 }
  0x42   : > { %5451 = dma.hbm_to_vmem [thread:$0]  (!%p6464_p0), %s788_s25, 1024, %s790_s0, %s6480_s29, %s7972_s26, %s7972_s26, %s7933_s30  }
  0x43   : > { %s814_s7 = scalar_lea.hbm %s7973_s12, %s6473_s14  ;;  %s809_s11 = scalar_lea.vmem [#allocation15], %s6470_s3 }
  0x44   : > { %s817_s20 = sshll.u32 %s809_s11, 4  ;;  %s815_s21 = sshll.u32 %s814_s7, 4  ;;  %s818_s20 = int_to_ptr.vmem [resolvable:$true] %s817_s20  ;;  %s816_s21 = int_to_ptr.hbm [resolvable:$true] %s815_s21 }
  0x45   : > { %5454 = dma.hbm_to_vmem [thread:$0]  (!%p6464_p0), %s816_s21, 1024, %s818_s20, %s6480_s29, %s7972_s26, %s7972_s26, %s7933_s30  }
  0x46   : > { %s7974_s13 = sld [smem:[#allocation47_spill]]  ;;  %s830_s25 = scalar_lea.vmem [#allocation16], %s6460_s27 }
  0x47   : > { %s837_s14 = sshll.u32 %s830_s25, 4  ;;  %s7975_s15 = sld [smem:[#allocation49_spill]]  ;;  %s838_s14 = int_to_ptr.vmem [resolvable:$true] %s837_s14 }
  0x48   : > { %s853_s11 = scalar_lea.vmem [#allocation17], %s6460_s27  ;;  %s4848_s21 = sshll.u32 %s6460_s27, 8 }
  0x49   : > { %s860_s9 = sshll.u32 %s853_s11, 4  ;;  %s5286_s22 = sshll.u32 %s6240_s4, 8  ;;  %s861_s9 = int_to_ptr.vmem [resolvable:$true] %s860_s9 }
  0x4a   : > { %s7976_s16 = sld [smem:[#allocation50_spill]]  ;;  %s4851_s8 = sshll.u32 %s6460_s27, 2 }
  0x4b   : > { %s6252_s11 = smov 16   ;;  %s4852_s30 = sshll.u32 %s6240_s4, 2 }
  0x4c   : > { %s833_s24 = scalar_lea.hbm %s7974_s13, %s6240_s4  ;;  %s7977_s17 = sld [smem:[#allocation51_spill]] }
  0x4d   : > { %s835_s3 = sshll.u32 %s833_s24, 4  ;;  %s856_s7 = scalar_lea.hbm %s7975_s15, %s6240_s4  ;;  %s836_s3 = int_to_ptr.hbm [resolvable:$true] %s835_s3 }
  0x4e   : > { %5457 = dma.hbm_to_vmem [thread:$0]  (!%p6464_p0), %s836_s3, 16, %s838_s14, %s6480_s29  }
  0x4f   : > { %s858_s20 = sshll.u32 %s856_s7, 4  ;;  %s871_s14 = scalar_lea.vmem [#allocation18], %s4848_s21  ;;  %s859_s20 = int_to_ptr.hbm [resolvable:$true] %s858_s20 }
  0x50   : > { %5460 = dma.hbm_to_vmem [thread:$0]  (!%p6464_p0), %s859_s20, 16, %s861_s9, %s6480_s29  }
  0x51   : > { %s876_s25 = scalar_lea.hbm %s7976_s16, %s5286_s22  ;;  %s879_s3 = sshll.u32 %s871_s14, 4  ;;  %s880_s3 = int_to_ptr.vmem [resolvable:$true] %s879_s3 }
  0x52   : > { %s877_s6 = sshll.u32 %s876_s25, 4  ;;  %s6251_s7 = smov 256   ;;  %s878_s6 = int_to_ptr.hbm [resolvable:$true] %s877_s6 }
  0x53   : > { %5463 = dma.hbm_to_vmem [thread:$0]  (!%p6464_p0), %s878_s6, 4096, %s880_s3, %s6480_s29, %s6251_s7, %s6251_s7, %s6252_s11  }
  0x54   : > { %s897_s10 = scalar_lea.hbm %s7977_s17, %s4852_s30  ;;  %s893_s0 = scalar_lea.vmem [#allocation19], %s4851_s8 }
  0x55   : > { %s901_s24 = sshll.u32 %s893_s0, 4  ;;  %s899_s12 = sshll.u32 %s897_s10, 4  ;;  %s902_s24 = int_to_ptr.vmem [resolvable:$true] %s901_s24  ;;  %s900_s12 = int_to_ptr.hbm [resolvable:$true] %s899_s12 }
  0x56   : > { %s7978_s13 = sld [smem:[#allocation35_spill]]  ;;  %s6253_s3 = smov [#allocation6]  }
  0x57   : > { %5466 = dma.hbm_to_vmem [thread:$0]  (!%p6464_p0), %s900_s12, 64, %s902_s24, %s6480_s29  }
  0x58   : > { %s657_s6 = sshll.u32 %s6253_s3, 4  ;;  %s7979_s18 = sld [smem:[#allocation52_spill]]  ;;  %s658_s6 = int_to_ptr.vmem [resolvable:$true] %s657_s6 }
  0x59   : > { %s912_s11 = scalar_lea.vmem [#allocation20], %s4848_s21  ;;  %s7980_s12 = smov 4  }
  0x5a   : > { %s920_s9 = sshll.u32 %s912_s11, 4  ;;  %s7981_s0 = sld [smem:[#allocation36_spill]]  ;;  %s921_s9 = int_to_ptr.vmem [resolvable:$true] %s920_s9 }
  0x5b   : > { %s7982_s14 = sld [smem:[#allocation37_spill]]  ;;  %s933_s11 = scalar_lea.vmem [#allocation21], %s6460_s27 }
  0x5c   : > { %s655_s15 = sshll.u32 %s7978_s13, 4  ;;  %s656_s15 = int_to_ptr.hbm [resolvable:$true] %s655_s15 }
  0x5d   : > { %5432 = dma.hbm_to_vmem [thread:$0]  (!%p6452_p12), %s656_s15, 128, %s658_s6, [#allocation7]  }
  0x5e   : > { %s917_s8 = scalar_lea.hbm %s7979_s18, %s5286_s22  ;;  %s6254_s22 = smov [#allocation8]  }
  0x5f   : > { %s918_s10 = sshll.u32 %s917_s8, 4  ;;  %s669_s15 = sshll.u32 %s6254_s22, 4  ;;  %s919_s10 = int_to_ptr.hbm [resolvable:$true] %s918_s10  ;;  %s670_s15 = int_to_ptr.vmem [resolvable:$true] %s669_s15 }
  0x60   : > { %5469 = dma.hbm_to_vmem [thread:$0]  (!%p6464_p0), %s919_s10, 4096, %s921_s9, %s6480_s29, %s7972_s26, %s7972_s26, %s7980_s12  }
  0x61   : > { %s667_s24 = sshll.u32 %s7981_s0, 4  ;;  %s679_s3 = sshll.u32 %s7982_s14, 4  ;;  %s668_s24 = int_to_ptr.hbm [resolvable:$true] %s667_s24  ;;  %s680_s3 = int_to_ptr.hbm [resolvable:$true] %s679_s3 }
  0x62   : > { %5435 = dma.hbm_to_vmem [thread:$0]  (!%p6452_p12), %s668_s24, 128, %s670_s15, [#allocation7]  }
  0x63   : > { %s6255_s6 = smov [#allocation9]   ;;  %s936_s8 = scalar_lea.hbm %s7921_s19, %s6240_s4 }
  0x64   : > { %s681_s7 = sshll.u32 %s6255_s6, 4  ;;  %s938_s10 = sshll.u32 %s936_s8, 4  ;;  %s682_s7 = int_to_ptr.vmem [resolvable:$true] %s681_s7  ;;  %s939_s10 = int_to_ptr.hbm [resolvable:$true] %s938_s10 }
  0x65   : > { %5438 = dma.hbm_to_vmem [thread:$0]  (!%p6452_p12), %s680_s3, 128, %s682_s7, [#allocation10]  }
  0x66   : > { %s940_s9 = sshll.u32 %s933_s11, 4  ;;  %949 = sbr.rel (%p6441_p10) target bundleno = 2705 (0xa91), region = 108  ;;  %s941_s9 = int_to_ptr.vmem [resolvable:$true] %s940_s9 }
  0x67   : > { %5472 = dma.hbm_to_vmem [thread:$0]  (!%p6464_p0), %s939_s10, 16, %s941_s9, %s6480_s29  }
  0x6b   : > { %6203 = dma.done.wait (%p210_p5), [#allocation4], 256  }
  0x6c   : > { %6205 = vsyncadd (%p210_p5), [#allocation4], 4294967040 }
  0x6d   : > { %6207 = dma.done.wait (%p210_p5), [#allocation7], 256  }
  0x6e   : > { %6209 = vsyncadd (%p210_p5), [#allocation7], 4294967040 }
  0x6f   : > { %6211 = dma.done.wait (%p210_p5), [#allocation10], 128  }
  0x70   : > { %6213 = vsyncadd (%p210_p5), [#allocation10], 4294967168  ;;  %s971_s2 = sand.u32 1, %s6413_s23   ;;  %s6609_s5 = sand.u32 1, %s6228_s28  }
  0x71   : > { %s4861_s27 = sshll.u32 %s6609_s5, 6  ;;  %s972_s1 = scalar_lea.sflag [#allocation4], %s971_s2 }
  0x72   : > { %s6612_s12 = scalar_lea.vmem [#allocation11], %s4861_s27 }
  0x73   : > { %6215 = dma.done.wait (%p6433_p8), %s972_s1, 12416  }
  0x74   : > { %6217 = vsyncadd (%p6433_p8), %s972_s1, 4294954880  ;;  %s7984_s13 = sld [smem:[#allocation29_spill]]  ;;  %s4865_s20 = sshll.u32 %s6609_s5, 8 }
  0x75   : > { %s4866_s0 = sshll.u32 %s6609_s5, 2  ;;  %s7986_s6 = sld [smem:[#allocation39_spill]] }
  0x76   : > { %s7987_s8 = sld [smem:[#allocation41_spill]]  ;;  %s6644_s17 = scalar_lea.vmem [#allocation12], %s4861_s27 }
  0x77   : > { %s7988_s29 = sld [smem:[#allocation45_spill]]  ;;  %s994_s18 = scalar_lea.vmem [#allocation13], %s6609_s5 }
  0x78   : > { %s7989_s22 = sld [smem:[#allocation48_spill]]  ;;  %s6647_s21 = scalar_lea.vmem [#allocation14], %s4861_s27 }
  0x79   : > { %s6649_s25 = scalar_lea.vmem [#allocation15], %s4861_s27  ;;  %s1023_s14 = scalar_lea.vmem [#allocation16], %s6609_s5 }
  0x7a   : > { %p1190_p1 = scmp.lt.s32.totalorder %s7984_s13, 1  ;;  %s1032_s3 = scalar_lea.vmem [#allocation17], %s6609_s5 }
  0x7b   : > { %s6655_s26 = scalar_lea.vmem [#allocation19], %s4866_s0  ;;  %s6657_s30 = scalar_lea.vmem [#allocation20], %s4865_s20 }
  0x7c   : > { %s6622_s24 = scalar_select %p1190_p1, %s7984_s13, 1 }
  0x7d   : > { %p4868_p2 = scmp.ne.s32.totalorder %s7984_s13, 0 }
  0x7e   : > { %s1195_s7 = scalar_lea.vmem %s7986_s6, %s6622_s24  ;;  %s1198_s10 = scalar_lea.vmem %s7987_s8, %s6622_s24 }
  0x7f   : > { %s1201_s2 = scalar_lea.vmem %s7988_s29, %s6622_s24  ;;  %s1204_s15 = scalar_lea.vmem %s7989_s22, %s6622_s24 }
  0x80   : > { %s6653_s6 = scalar_lea.vmem [#allocation18], %s4865_s20  ;;  %s1071_s8 = scalar_lea.vmem [#allocation21], %s6609_s5 }
  0x81   : > { %1210 = sbr.rel (%p4868_p2) target bundleno = 137 (0x89), region = 172 }
  0x86   : > { %v1211_v0 = vld [vmem:[#allocation3] sm:$0xff]  ;;  %v1212_v1 = vld [vmem:[#allocation3 + $0x8] sm:$0xff] }
  0x87   : > { %1213 = vst [vmem:[#allocation2] sm:$0xff] %v1211_v0 }
  0x88   : > { %1214 = vst [vmem:[#allocation2 + $0x8] sm:$0xff] %v1212_v1 }
  0x89 PF: > { %v6256_v4 = vmov 128.0   ;;  %v5295_v19 = vld [vmem:[%s6612_s12 + $0x38] sm:$0xff]  ;;  %v5294_v22 = vld [vmem:[%s6612_s12 + $0x30] sm:$0xff]  ;;  %v5293_v25 = vld [vmem:[%s6612_s12 + $0x28] sm:$0xff]  ;;  %s7990_s27 = sld [smem:[#allocation38_spill]]  ;;  %s6257_s11 = smov 64  }
  0x8a   : > { %5634 = vrcp.f32 %v6256_v4  ;;  %v5303_v20 = vld [vmem:[%s6644_s17 + $0x38] sm:$0xff]  ;;  %1347 = vmatpush.bf16.msra.mxu0 %v5295_v19  ;;  %v5302_v23 = vld [vmem:[%s6644_s17 + $0x30] sm:$0xff]  ;;  %v5301_v26 = vld [vmem:[%s6644_s17 + $0x28] sm:$0xff]  ;;  %s6261_s22 = smov 48   ;;  %s6263_s16 = smov 16   ;;  %vm1580_vm7 = vcmask 1047556  }
  0x8b   : > { %v5311_v21 = vld [vmem:[%s6647_s21 + $0x38] sm:$0xff]  ;;  %1429 = vmatpush.bf16.msra.mxu1 %v5303_v20  ;;  %v5310_v24 = vld [vmem:[%s6647_s21 + $0x30] sm:$0xff]  ;;  %v5309_v27 = vld [vmem:[%s6647_s21 + $0x28] sm:$0xff]  ;;  %vm2810_vm8 = vcmask 130048   ;;  %vm3132_vm9 = vcmask 64512   ;;  %vm3232_vm10 = vcmask 1043456  }
  0x8c   : > { %1511 = vmatpush.bf16.msra.mxu2 %v5311_v21  ;;  %v5292_v28 = vld [vmem:[%s6612_s12 + $0x20] sm:$0xff]  ;;  %v5291_v31 = vld [vmem:[%s6612_s12 + $0x18] sm:$0xff]  ;;  %v5290_v34 = vld [vmem:[%s6612_s12 + $0x10] sm:$0xff]  ;;  %vm3626_vm11 = vcmask 261120   ;;  %vm3629_vm12 = vcmask 523264   ;;  %vm3632_vm13 = vcmask 785408  }
  0x8d   : > { %v5300_v29 = vld [vmem:[%s6644_s17 + $0x20] sm:$0xff]  ;;  %v5299_v32 = vld [vmem:[%s6644_s17 + $0x18] sm:$0xff]  ;;  %v5298_v35 = vld [vmem:[%s6644_s17 + $0x10] sm:$0xff]  ;;  %s7996_s5 = sld [smem:[#allocation29_spill]] }
  0x8e   : > { %v1215_v2 = vld [vmem:[#allocation2] sm:$0xff]  ;;  %1348 = vmatpush.bf16.msra.mxu0 %v5294_v22  ;;  %v5307_v33 = vld [vmem:[%s6647_s21 + $0x18] sm:$0xff]  ;;  %v5306_v36 = vld [vmem:[%s6647_s21 + $0x10] sm:$0xff] }
  0x8f   : > { %1221 = vadd.xlane.f32.xlu0 %v1215_v2  ;;  %v1216_v3 = vld [vmem:[#allocation2 + $0x8] sm:$0xff]  ;;  %1430 = vmatpush.bf16.msra.mxu1 %v5302_v23  ;;  %v5308_v30 = vld [vmem:[%s6647_s21 + $0x20] sm:$0xff] }
  0x90   : > { %v5635_v5 = vpop.eup %5634  ;;  %1512 = vmatpush.bf16.msra.mxu2 %v5310_v24  ;;  %v5289_v37 = vld [vmem:[%s6612_s12 + $0x8] sm:$0xff]  ;;  %v5288_v41 = vld [vmem:[%s6612_s12] sm:$0xff]  ;;  %s7991_s12 = scalar_lea.vmem %s7990_s27, %s6622_s24 }
  0x91   : > { %v1226_v6 = vmul.f32 128.0, %v5635_v5  ;;  %vm1230_vm0 = vweird.f32 %v5635_v5  ;;  %v5297_v38 = vld [vmem:[%s6644_s17 + $0x8] sm:$0xff]  ;;  %v5296_v42 = vld [vmem:[%s6644_s17] sm:$0xff] }
  0x92   : > { %1349 = vmatpush.bf16.msra.mxu0 %v5293_v25  ;;  %v5305_v39 = vld [vmem:[%s6647_s21 + $0x8] sm:$0xff]  ;;  %v5304_v44 = vld [vmem:[%s6647_s21] sm:$0xff]  ;;  %s6262_s21 = smov 32  }
  0x93   : > { %v1227_v7 = vsub.f32 1.0, %v1226_v6  ;;  %1431 = vmatpush.bf16.msra.mxu1 %v5301_v26  ;;  %v5625_v62 = vld [vmem:[%s7991_s12] ss:$0 sm:$0xff]  ;;  %p5277_p3 = scmp.ne.s32.totalorder %s7996_s5, 1 }
  0x94   : > { %1513 = vmatpush.bf16.msra.mxu2 %v5309_v27 }
  0x95   : > { %v1228_v8 = vmul.f32 %v5635_v5, %v1227_v7 }
  0x96   : > { %1350 = vmatpush.bf16.msra.mxu0 %v5292_v28 }
  0x97   : > { %1223 = vadd.xlane.f32.xlu0 %v1216_v3  ;;  %v1229_v9 = vadd.f32 %v5635_v5, %v1228_v8  ;;  %1432 = vmatpush.bf16.msra.mxu1 %v5300_v29  ;;  %v5628_v8 = vld [vmem:[%s994_s18] ss:$0 sm:$0xff]  ;;  %s6258_s18 = smov 96  }
  0x98   : > { %1514 = vmatpush.bf16.msra.mxu2 %v5308_v30 }
  0x99   : > { %v6661_v10 = vsel %vm1230_vm0, %v5635_v5, %v1229_v9 }
  0x9a   : > { %1351 = vmatpush.bf16.msra.mxu0 %v5291_v31 }
  0x9b   : > { %1433 = vmatpush.bf16.msra.mxu1 %v5299_v32 }
  0x9c   : > { %1515 = vmatpush.bf16.msra.mxu2 %v5307_v33  ;;  %v6264_v33 = vmov 1983009808  }
  0x9e   : > { %1352 = vmatpush.bf16.msra.mxu0 %v5290_v34  ;;  %v1585_v34 = vunpack.c.l.s4 %v6264_v33 }
  0x9f   : > { %1434 = vmatpush.bf16.msra.mxu1 %v5298_v35  ;;  %v6265_v35 = vmov 1934713408  }
  0xa0   : > { %1516 = vmatpush.bf16.msra.mxu2 %v5306_v36  ;;  %v1633_v36 = vunpack.c.l.s4 %v6265_v35 }
  0xa2   : > { %1353 = vmatpush.bf16.msra.mxu0 %v5289_v37 }
  0xa3   : > { %1435 = vmatpush.bf16.msra.mxu1 %v5297_v38 }
  0xa4   : > { %1517 = vmatpush.bf16.msra.mxu2 %v5305_v39 }
  0xa6   : > { %1354 = vmatpush.bf16.msra.mxu0 %v5288_v41 }
  0xa7   : > { %1436 = vmatpush.bf16.msra.mxu1 %v5296_v42 }
  0xa8   : > { %1518 = vmatpush.bf16.msra.mxu2 %v5304_v44 }
 0x102   : > { %v1222_v11 = vpop.xlane.xlu0 %1221 }
 0x103   : > { %v1232_v12 = vmul.f32 %v6661_v10, %v1222_v11 }
 0x105   : > { %v6664_v13 = vsub.f32 %v1215_v2, %v1232_v12  ;;  %v5627_v12 = vld [vmem:[%s1198_s10] ss:$0 sm:$0xff]  ;;  %s6260_s10 = smov 80  }
 0x107   : > { %v1236_v14 = vmul.f32 %v6664_v13, %v6664_v13 }
 0x109   : > { %1238 = vadd.xlane.f32.xlu1 %v1236_v14 }
 0x10a   : > { %v1224_v15 = vpop.xlane.xlu0 %1223 }
 0x10b   : > { %v1233_v16 = vmul.f32 %v6661_v10, %v1224_v15 }
 0x10d   : > { %v6669_v17 = vsub.f32 %v1216_v3, %v1233_v16  ;;  %v5626_v3 = vld [vmem:[%s1195_s7] ss:$0 sm:$0xff]  ;;  %v6720_v16 = vld [vmem:[#allocation8] sm:$0xff]  ;;  %s6259_s7 = smov 112  }
 0x10f   : > { %v1237_v18 = vmul.f32 %v6669_v17, %v6669_v17 }
 0x111   : > { %1240 = vadd.xlane.f32.xlu1 %v1237_v18 }
 0x17c   : > { %v1239_v40 = vpop.xlane.xlu1 %1238 }
 0x17d   : > { %v1242_v43 = vmul.f32 %v1239_v40, %v6661_v10 }
 0x17f   : > { %v1244_v45 = vadd.f32 1e-05, %v1242_v43 }
 0x181   : > { %5636 = vrsqrt.f32 %v1244_v45  ;;  %vm1252_vm2 = vweird.f32 %v1244_v45 }
 0x184   : > { %v1241_v46 = vpop.xlane.xlu1 %1240 }
 0x185   : > { %v1243_v47 = vmul.f32 %v1241_v46, %v6661_v10  ;;  %v6762_v46 = vunpack.c.0.s8 %v1585_v34 }
 0x187   : > { %v5637_v48 = vpop.eup %5636  ;;  %v1245_v49 = vadd.f32 1e-05, %v1243_v47 }
 0x188   : > { %v1247_v50 = vmul.f32 %v5637_v48, %v1244_v45  ;;  %vm1253_vm1 = vweird.f32 %v5637_v48 }
 0x189   : > { %5638 = vrsqrt.f32 %v1245_v49  ;;  %vm1254_vm3 = vmor %vm1252_vm2, %vm1253_vm1  ;;  %vm1262_vm5 = vweird.f32 %v1245_v49 }
 0x18a   : > { %v1248_v51 = vmul.f32 %v5637_v48, %v1247_v50 }
 0x18c   : > { %v1249_v52 = vmul.f32 0.5, %v1248_v51 }
 0x18e   : > { %v1250_v53 = vsub.f32 1.5, %v1249_v52 }
 0x18f   : > { %v5639_v54 = vpop.eup %5638 }
 0x190   : > { %v1251_v55 = vmul.f32 %v5637_v48, %v1250_v53  ;;  %v1257_v56 = vmul.f32 %v5639_v54, %v1245_v49  ;;  %vm1263_vm4 = vweird.f32 %v5639_v54  ;;  %v6764_v49 = vunpack.c.0.s8 %v1633_v36 }
 0x191   : > { %vm1264_vm6 = vmor %vm1262_vm5, %vm1263_vm4 }
 0x192   : > { %v1258_v57 = vmul.f32 %v5639_v54, %v1257_v56  ;;  %v1255_v58 = vsel %vm1254_vm3, %v5637_v48, %v1251_v55 }
 0x193   : > { %v1266_v61 = vmul.f32 %v1255_v58, %v6664_v13 }
 0x194   : > { %v1259_v59 = vmul.f32 0.5, %v1258_v57 }
 0x195   : > { %v1271_v2 = vmul.f32 %v5625_v62, %v1266_v61 }
 0x196   : > { %v1260_v60 = vsub.f32 1.5, %v1259_v59 }
 0x197   : > { %v1276_v5 = vadd.f32 %v5626_v3, %v1271_v2 }
 0x198   : > { %v1261_v63 = vmul.f32 %v5639_v54, %v1260_v60 }
 0x19a   : > { %v1265_v0 = vsel %vm1264_vm6, %v5639_v54, %v1261_v63 }
 0x19b   : > { %v1267_v1 = vmul.f32 %v1265_v0, %v6669_v17  ;;  %v1217_v17 = vld [vmem:[#allocation6] sm:$0xff] }
 0x19d   : > { %v1272_v4 = vmul.f32 %v5625_v62, %v1267_v1 }
 0x19f   : > { %v1277_v6 = vadd.f32 %v5626_v3, %v1272_v4 }
 0x1a1   : > { %v1278_v7 = vpack.c.bf16 %v1277_v6, %v1276_v5 }
 0x1a3   : > { %1355 = vmatmul.bf16.vlgmr.msra.gmra.mxu0 %v1278_v7  ;;  %1437 = vmatmul.bf16.vlgmr.msra.gmra.mxu1 %v1278_v7 }
 0x1a4   : > { %1519 = vmatmul.bf16.vlgmr.msra.gmra.mxu2 %v1278_v7 }
 0x220   : > { %v1438_v9 = vpop.f32.mrf.mxu1  ;;  %v1356_v13 = vpop.f32.mrf.mxu0 }
 0x221   : > { %v1439_v11 = vadd.f32 %v5628_v8, %v1438_v9  ;;  %v1357_v14 = vadd.f32 %v5627_v12, %v1356_v13 }
 0x223   : > { %2044 = vrot.lane.b32.xlu2 %v1439_v11, %s6257_s11  ;;  %v1529_v20 = vmul.f32 %v1357_v14, %v1217_v17  ;;  %v2048_v21 = vmul.f32 %v1439_v11, %v1217_v17 }
 0x228   : > { %v1440_v26 = vpop.f32.mrf.mxu1  ;;  %v1358_v28 = vpop.f32.mrf.mxu0 }
 0x229   : > { %v1441_v27 = vadd.f32 %v5628_v8, %v1440_v26  ;;  %v1359_v29 = vadd.f32 %v5627_v12, %v1358_v28 }
 0x22b   : > { %1525 = vrot.lane.b32.xlu2 %v1357_v14, %s6257_s11  ;;  %v6752_v37 = vmul.f32 %v1359_v29, %v1217_v17  ;;  %v6756_v40 = vmul.f32 %v1441_v27, %v1217_v17 }
 0x27d   : > { %v2045_v15 = vpop.permute.xlu2 %2044 }
 0x27e   : > { %v2050_v18 = vmul.f32 %v2045_v15, %v6720_v16 }
 0x280   : > { %v6724_v23 = vadd.f32 %v2050_v18, %v2048_v21 }
 0x282   : > { %v2100_v42 = vrot.slane %v6724_v23, 4 }
 0x285   : > { %v1526_v19 = vpop.permute.xlu2 %1525 }
 0x286   : > { %v1531_v22 = vmul.f32 %v1526_v19, %v6720_v16 }
 0x288   : > { %v6726_v24 = vadd.f32 %v1531_v22, %v1529_v20 }
 0x28a   : > { %v5565_v25 = vpack.i.bf16 %v6726_v24, %v6724_v23  ;;  %v1582_v43 = vrot.slane %v6726_v24, 4 }
 0x28c   : > { %5566 = vrot.lane.b32.xlu2 %v5565_v25, %s6257_s11  ;;  %5561 = vrot.lane.b32.xlu1 %v5565_v25, %s6258_s18 }
 0x28d   : > { %5556 = vrot.lane.b32.xlu0 %v5565_v25, %s6259_s7 }
 0x294   : > { %5571 = vrot.lane.b32.xlu2 %v5565_v25, %s6260_s10  ;;  %1561 = vrot.lane.b32.xlu1 %v6726_v24, %s6261_s22 }
 0x295   : > { %2086 = vrot.lane.b32.xlu0 %v6724_v23, %s6262_s21 }
 0x29c   : > { %2080 = vrot.lane.b32.xlu2 %v6724_v23, %s6261_s22  ;;  %2046 = vrot.lane.b32.xlu1 %v1441_v27, %s6257_s11 }
 0x29d   : > { %1567 = vrot.lane.b32.xlu0 %v6726_v24, %s6262_s21 }
 0x2a4   : > { %2092 = vrot.lane.b32.xlu2 %v6724_v23, %s6263_s16 }
 0x2a5   : > { %1527 = vrot.lane.b32.xlu0 %v1359_v29, %s6257_s11 }
 0x2ac   : > { %1573 = vrot.lane.b32.xlu2 %v6726_v24, %s6263_s16 }
 0x2e6   : > { %v6748_v30 = vpop.permute.xlu2 %5566 }
 0x2e7   : > { %v5569_v38 = vunpack.i.h.bf16 %v6748_v30  ;;  %v5568_v44 = vunpack.i.l.bf16 %v6748_v30 }
 0x2e9   : > { %v6769_v55 = vrot.slane %v5569_v38, 4 }
 0x2ee   : > { %v6750_v31 = vpop.permute.xlu2 %5571 }
 0x2ef   : > { %v5574_v39 = vunpack.i.h.bf16 %v6750_v31  ;;  %v5573_v45 = vunpack.i.l.bf16 %v6750_v31 }
 0x2f1   : > { %v1592_v56 = vrot.slane %v5574_v39, 4  ;;  %v2110_v63 = vrot.slane %v5573_v45, 4 }
 0x2f6   : > { %v2081_v32 = vpop.permute.xlu2 %2080 }
 0x2f7   : > { %v2136_v41 = vrot.slane %v2081_v32, 4 }
 0x2fe   : > { %v2093_v47 = vpop.permute.xlu2 %2092  ;;  %v5562_v48 = vpop.permute.xlu1 %5561 }
 0x2ff   : > { %v2134_v50 = vrot.slane %v2093_v47, 4  ;;  %v2137_v51 = vsel %vm1580_vm7, %v2093_v47, %v2136_v41  ;;  %v5564_v52 = vunpack.i.h.bf16 %v5562_v48  ;;  %v5563_v53 = vunpack.i.l.bf16 %v5562_v48  ;;  %v5557_v54 = vpop.permute.xlu0 %5556 }
 0x300   : > { %v5559_v57 = vunpack.i.h.bf16 %v5557_v54  ;;  %v5558_v58 = vunpack.i.l.bf16 %v5557_v54  ;;  %v6774_v0 = vperm.slane %v2137_v51, %v6762_v46 }
 0x301   : > { %v2135_v59 = vsel %vm1580_vm7, %v2134_v50, %v2081_v32  ;;  %v1579_v60 = vrot.slane %v5564_v52, 4  ;;  %v1583_v61 = vsel %vm1580_vm7, %v5564_v52, %v1582_v43  ;;  %v2098_v62 = vrot.slane %v5563_v53, 4 }
 0x302   : > { %v1591_v1 = vperm.slane %v1583_v61, %v6762_v46  ;;  %v2101_v2 = vsel %vm1580_vm7, %v5563_v53, %v2100_v42  ;;  %v1593_v6 = vsel %vm1580_vm7, %v1592_v56, %v5559_v57  ;;  %v6785_v7 = vperm.slane %v2135_v59, %v6762_v46 }
 0x303   : > { %v1581_v3 = vsel %vm1580_vm7, %v1579_v60, %v6726_v24  ;;  %v2099_v4 = vsel %vm1580_vm7, %v2098_v62, %v6724_v23  ;;  %v2109_v5 = vperm.slane %v2101_v2, %v6762_v46  ;;  %v1594_v13 = vrot.slane %v5559_v57, 4 }
 0x304   : > { %v1587_v8 = vperm.slane %v1581_v3, %v6762_v46  ;;  %v1642_v9 = vrot.slane %v1591_v1, 4  ;;  %v2105_v11 = vperm.slane %v2099_v4, %v6762_v46  ;;  %v1599_v14 = vperm.slane %v1593_v6, %v6762_v46 }
 0x305   : > { %v2160_v12 = vrot.slane %v2109_v5, 4  ;;  %v2111_v15 = vsel %vm1580_vm7, %v2110_v63, %v5558_v58  ;;  %v2112_v19 = vrot.slane %v5558_v58, 4  ;;  %v1595_v23 = vsel %vm1580_vm7, %v5574_v39, %v1594_v13 }
 0x306   : > { %v1630_v17 = vrot.slane %v1587_v8, 4  ;;  %v2148_v18 = vrot.slane %v2105_v11, 4  ;;  %v2117_v20 = vperm.slane %v2111_v15, %v6762_v46  ;;  %v1574_v21 = vpop.permute.xlu2 %1573  ;;  %v1562_v22 = vpop.permute.xlu1 %1561  ;;  %v1628_v24 = vrot.slane %v1599_v14, 4 }
 0x307   : > { %v1616_v25 = vrot.slane %v1574_v21, 4  ;;  %v1618_v26 = vrot.slane %v1562_v22, 4  ;;  %v2087_v27 = vpop.permute.xlu0 %2086  ;;  %v1603_v28 = vperm.slane %v1595_v23, %v6762_v46  ;;  %v2113_v31 = vsel %vm1580_vm7, %v5573_v45, %v2112_v19 }
 0x308   : > { %v1631_v29 = vsel %vm1580_vm7, %v1599_v14, %v1630_v17  ;;  %v2146_v32 = vrot.slane %v2117_v20, 4  ;;  %v1629_v33 = vsel %vm1580_vm7, %v1628_v24, %v1587_v8  ;;  %v2121_v35 = vperm.slane %v2113_v31, %v6762_v46 }
 0x309   : > { %v6798_v34 = vperm.slane %v1631_v29, %v6764_v49  ;;  %v2149_v36 = vsel %vm1580_vm7, %v2117_v20, %v2148_v18  ;;  %v6803_v39 = vperm.slane %v1629_v33, %v6764_v49  ;;  %v1640_v41 = vrot.slane %v1603_v28, 4 }
 0x30a   : > { %v1643_v42 = vsel %vm1580_vm7, %v1603_v28, %v1642_v9  ;;  %v2147_v43 = vsel %vm1580_vm7, %v2146_v32, %v2105_v11  ;;  %v2124_v45 = vrot.slane %v5568_v44, 4  ;;  %v2170_v47 = vrot.slane %v6785_v7, 4 }
 0x30b   : > { %v2182_v48 = vrot.slane %v6774_v0, 4  ;;  %v6812_v50 = vperm.slane %v1643_v42, %v6764_v49  ;;  %v1682_v51 = vrot.slane %v6798_v34, 4  ;;  %v1641_v52 = vsel %vm1580_vm7, %v1640_v41, %v1591_v1 }
 0x30c   : > { %v2158_v53 = vrot.slane %v2121_v35, 4  ;;  %v2161_v54 = vsel %vm1580_vm7, %v2121_v35, %v2160_v12  ;;  %v1678_v56 = vrot.slane %v6803_v39, 4  ;;  %v6819_v57 = vperm.slane %v2147_v43, %v6764_v49 }
 0x30d   : > { %v6822_v58 = vperm.slane %v2149_v36, %v6764_v49  ;;  %v2169_v59 = vperm.slane %v2161_v54, %v6764_v49  ;;  %v6826_v60 = vperm.slane %v1641_v52, %v6764_v49  ;;  %v1617_v62 = vsel %vm1580_vm7, %v1616_v25, %v1562_v22 }
 0x30e   : > { %v2159_v61 = vsel %vm1580_vm7, %v2158_v53, %v2109_v5  ;;  %v1619_v63 = vsel %vm1580_vm7, %v1574_v21, %v1618_v26  ;;  %v2047_v1 = vpop.permute.xlu1 %2046  ;;  %v1690_v2 = vrot.slane %v6812_v50, 4  ;;  %v1623_v4 = vperm.slane %v1617_v62, %v6762_v46 }
 0x30f   : > { %v2165_v3 = vperm.slane %v2159_v61, %v6764_v49  ;;  %v1627_v6 = vperm.slane %v1619_v63, %v6762_v46  ;;  %v1568_v8 = vpop.permute.xlu0 %1567  ;;  %v2122_v9 = vrot.slane %v2087_v27, 4  ;;  %v2125_v11 = vsel %vm1580_vm7, %v2087_v27, %v2124_v45 }
 0x310   : > { %v2051_v12 = vmul.f32 %v2047_v1, %v6720_v16  ;;  %v1604_v5 = vrot.slane %v1568_v8, 4  ;;  %v2196_v13 = vrot.slane %v6819_v57, 4  ;;  %v2200_v14 = vrot.slane %v6822_v58, 4 }
 0x311   : > { %v2208_v15 = vrot.slane %v2169_v59, 4  ;;  %v2133_v17 = vperm.slane %v2125_v11, %v6762_v46  ;;  %v1652_v18 = vrot.slane %v1623_v4, 4  ;;  %v2123_v19 = vsel %vm1580_vm7, %v2122_v9, %v5568_v44 }
 0x312   : > { %v2204_v20 = vrot.slane %v2165_v3, 4  ;;  %v1605_v21 = vsel %vm1580_vm7, %v1604_v5, %v5569_v38  ;;  %v2129_v22 = vperm.slane %v2123_v19, %v6762_v46  ;;  %v1664_v26 = vrot.slane %v1627_v6, 4 }
 0x313   : > { %v2183_v23 = vsel %vm1580_vm7, %v2182_v48, %v2133_v17  ;;  %v2184_v24 = vrot.slane %v2133_v17, 4  ;;  %v1611_v25 = vperm.slane %v1605_v21, %v6762_v46  ;;  %v6851_v28 = vadd.f32 %v2051_v12, %v6756_v40 }
 0x314   : > { %v2189_v27 = vperm.slane %v2183_v23, %v6764_v49  ;;  %v1607_v44 = vsel %vm1580_vm7, %v1568_v8, %v6769_v55  ;;  %v2171_v30 = vsel %vm1580_vm7, %v2170_v47, %v2129_v22  ;;  %v2172_v29 = vrot.slane %v2129_v22, 4 }
 0x315   : > { %v2185_v38 = vsel %vm1580_vm7, %v6774_v0, %v2184_v24  ;;  %v1653_v31 = vsel %vm1580_vm7, %v1652_v18, %v1611_v25  ;;  %v2177_v32 = vperm.slane %v2171_v30, %v6764_v49  ;;  %v1615_v55 = vperm.slane %v1607_v44, %v6762_v46 }
 0x316   : > { %v2193_v33 = vperm.slane %v2185_v38, %v6764_v49  ;;  %v2202_v35 = vrot.slane %v2189_v27, 4  ;;  %v2205_v36 = vsel %vm1580_vm7, %v2189_v27, %v2204_v20  ;;  %v2173_v40 = vsel %vm1580_vm7, %v6785_v7, %v2172_v29 }
 0x317   : > { %v2360_v41 = vrot.slane %v2205_v36, 4  ;;  %v1654_v42 = vrot.slane %v1611_v25, 4  ;;  %v2181_v43 = vperm.slane %v2173_v40, %v6764_v49  ;;  %v6867_v0 = vsel %vm1580_vm7, %v2177_v32, %v2196_v13  ;;  %v1528_v18 = vpop.permute.xlu0 %1527 }
 0x318   : > { %v6870_v45 = vsel %vm1580_vm7, %v2202_v35, %v2165_v3  ;;  %v1659_v47 = vperm.slane %v1653_v31, %v6764_v49  ;;  %v2194_v48 = vrot.slane %v2177_v32, 4  ;;  %v2206_v52 = vrot.slane %v2193_v33, 4 }
 0x319   : > { %v2209_v53 = vsel %vm1580_vm7, %v2193_v33, %v2208_v15  ;;  %v1686_v7 = vrot.slane %v6826_v60, 4  ;;  %v2336_v54 = vrot.slane %v6867_v0, 4  ;;  %v2348_v61 = vrot.slane %v6870_v45, 4 }
 0x31a   : > { %v2358_v62 = vrot.slane %v2209_v53, 4  ;;  %v1655_v63 = vsel %vm1580_vm7, %v1623_v4, %v1654_v42  ;;  %v6879_v1 = vsel %vm1580_vm7, %v2206_v52, %v2169_v59  ;;  %v1665_v8 = vsel %vm1580_vm7, %v1664_v26, %v1615_v55 }
 0x31b   : > { %v6882_v3 = vperm.slane %v1655_v63, %v6764_v49  ;;  %v1666_v9 = vrot.slane %v1615_v55, 4  ;;  %v2198_v11 = vrot.slane %v2181_v43, 4  ;;  %v2361_v12 = vsel %vm1580_vm7, %v2209_v53, %v2360_v41 }
 0x31c   : > { %v1671_v5 = vperm.slane %v1665_v8, %v6764_v49  ;;  %v1676_v13 = vrot.slane %v1659_v47, 4  ;;  %v2346_v15 = vrot.slane %v6879_v1, 4  ;;  %v2359_v17 = vsel %vm1580_vm7, %v2358_v62, %v2205_v36 }
 0x31d   : > { %v1667_v4 = vsel %vm1580_vm7, %v1627_v6, %v1666_v9  ;;  %v6894_v59 = vsel %vm1580_vm7, %v6882_v3, %v1682_v51  ;;  %v6905_v6 = vsel %vm1580_vm7, %v1659_v47, %v1678_v56  ;;  %v1680_v23 = vrot.slane %v6882_v3, 4 }
 0x31e   : > { %v1675_v19 = vperm.slane %v1667_v4, %v6764_v49  ;;  %v6899_v20 = vsel %vm1580_vm7, %v1676_v13, %v6803_v39  ;;  %v1684_v21 = vrot.slane %v1671_v5, 4  ;;  %v1687_v22 = vsel %vm1580_vm7, %v1671_v5, %v1686_v7 }
 0x31f   : > { %v1806_v51 = vrot.slane %v6899_v20, 4  ;;  %v1842_v24 = vrot.slane %v1687_v22, 4  ;;  %v1532_v44 = vmul.f32 %v1528_v18, %v6720_v16  ;;  %v1816_v39 = vrot.slane %v6894_v59, 4 }
 0x320   : > { %v6911_v25 = vsel %vm1580_vm7, %v1684_v21, %v6826_v60  ;;  %v1688_v26 = vrot.slane %v1675_v19, 4  ;;  %v1691_v27 = vsel %vm1580_vm7, %v1675_v19, %v1690_v2  ;;  %v2195_v31 = vsel %vm1580_vm7, %v2194_v48, %v6819_v57 }
 0x321   : > { %v1830_v56 = vrot.slane %v6911_v25, 4  ;;  %v1840_v30 = vrot.slane %v1691_v27, 4  ;;  %v1843_v29 = vsel %vm1580_vm7, %v1691_v27, %v1842_v24  ;;  %v6925_v60 = vadd.f32 %v1532_v44, %v6752_v37 }
 0x322   : > { %v6922_v38 = vsel %vm1580_vm7, %v1688_v26, %v6812_v50  ;;  %v2199_v16 = vsel %vm1580_vm7, %v2198_v11, %v6822_v58  ;;  %v1818_v2 = vrot.slane %v6905_v6, 4  ;;  %v6934_v33 = vperm.slane %v1843_v29, %v6762_v46 }
 0x323   : > { %v1841_v32 = vsel %vm1580_vm7, %v1840_v30, %v1687_v22  ;;  %v2201_v50 = vsel %vm1580_vm7, %v2181_v43, %v2200_v14  ;;  %v6941_v37 = vsel %vm1580_vm7, %v6922_v38, %v1830_v56  ;;  %v5585_v57 = vpack.i.bf16 %v6925_v60, %v6851_v28 }
 0x324   : > { %v6946_v35 = vperm.slane %v1841_v32, %v6762_v46  ;;  %v2322_v36 = vrot.slane %v2199_v16, 4  ;;  %v2324_v40 = vrot.slane %v2195_v31, 4  ;;  %v2334_v41 = vrot.slane %v2201_v50, 4 }
 0x325   : > { %v1828_v55 = vrot.slane %v6922_v38, 4  ;;  %5586 = vrot.lane.b32.xlu0 %v5585_v57, %s6262_s21  ;;  %5581 = vrot.lane.b32.xlu1 %v5585_v57, %s6261_s22  ;;  %v2337_v58 = vsel %vm1580_vm7, %v2201_v50, %v2336_v54  ;;  %v2349_v14 = vsel %vm1580_vm7, %v6879_v1, %v2348_v61  ;;  %v6955_v42 = vperm.slane %v2361_v12, %v6762_v46 }
 0x326   : > { %5576 = vrot.lane.b32.xlu2 %v5585_v57, %s6257_s11  ;;  %v2325_v43 = vsel %vm1580_vm7, %v2199_v16, %v2324_v40  ;;  %v2345_v47 = vperm.slane %v2337_v58, %v6762_v46  ;;  %v6961_v48 = vperm.slane %v2349_v14, %v6762_v46  ;;  %v2323_v52 = vsel %vm1580_vm7, %v2322_v36, %v2195_v31 }
 0x327   : > { %v2333_v53 = vperm.slane %v2325_v43, %v6762_v46  ;;  %v2406_v7 = vrot.slane %v6955_v42, 4  ;;  %v2329_v54 = vperm.slane %v2323_v52, %v6762_v46  ;;  %v2335_v61 = vsel %vm1580_vm7, %v2334_v41, %v6867_v0 }
 0x328   : > { %v2382_v62 = vrot.slane %v2345_v47, 4  ;;  %v2341_v63 = vperm.slane %v2335_v61, %v6762_v46  ;;  %v2347_v1 = vsel %vm1580_vm7, %v2346_v15, %v6870_v45  ;;  %v2365_v8 = vperm.slane %v2359_v17, %v6762_v46 }
 0x329   : > { %v2384_v9 = vrot.slane %v2333_v53, 4  ;;  %v2407_v11 = vsel %vm1580_vm7, %v2406_v7, %v6961_v48  ;;  %v2353_v12 = vperm.slane %v2347_v1, %v6762_v46  ;;  %v2372_v5 = vrot.slane %v2329_v54, 4 }
 0x32a   : > { %v2383_v13 = vsel %vm1580_vm7, %v2382_v62, %v2333_v53  ;;  %v2413_v4 = vperm.slane %v2407_v11, %v6764_v49  ;;  %v2370_v0 = vrot.slane %v2341_v63, 4  ;;  %v2394_v18 = vrot.slane %v2365_v8, 4 }
 0x32b   : > { %v2389_v19 = vperm.slane %v2383_v13, %v6764_v49  ;;  %v2373_v21 = vsel %vm1580_vm7, %v2341_v63, %v2372_v5  ;;  %v2396_v45 = vrot.slane %v2353_v12, 4  ;;  %v1681_v31 = vsel %vm1580_vm7, %v1680_v23, %v6798_v34 }
 0x32c   : > { %v2426_v15 = vrot.slane %v2413_v4, 4  ;;  %v2371_v17 = vsel %vm1580_vm7, %v2370_v0, %v2329_v54  ;;  %v2395_v22 = vsel %vm1580_vm7, %v2394_v18, %v2353_v12  ;;  %v6983_v24 = vperm.slane %v2373_v21, %v6764_v49 }
 0x32d   : > { %v2428_v26 = vrot.slane %v2389_v19, 4  ;;  %v2377_v27 = vperm.slane %v2371_v17, %v6764_v49  ;;  %v2401_v44 = vperm.slane %v2395_v22, %v6764_v49  ;;  %v2397_v56 = vsel %vm1580_vm7, %v2365_v8, %v2396_v45  ;;  %2094 = vrot.lane.b32.xlu0 %v6851_v28, %s6263_s16  ;;  %2064 = vrot.lane.b32.xlu1 %v6851_v28, %s6258_s18 }
 0x32e   : > { %v2427_v30 = vsel %vm1580_vm7, %v2426_v15, %v2389_v19  ;;  %v6994_v29 = vperm.slane %v2397_v56, %v6764_v49  ;;  %v2424_v38 = vrot.slane %v6983_v24, 4  ;;  %5591 = vrot.lane.b32.xlu2 %v5585_v57, %s6259_s7  ;;  %v1807_v58 = vsel %vm1580_vm7, %v1681_v31, %v1806_v51 }
 0x32f   : > { %v2550_v16 = vpack.c.bf16 %v2427_v30, %v2427_v30  ;;  %v2418_v32 = vrot.slane %v2401_v44, 4  ;;  %v2429_v50 = vsel %vm1580_vm7, %v2413_v4, %v2428_v26  ;;  %v2420_v36 = vrot.slane %v2377_v27, 4 }
 0x330   : > { %v2551_v40 = vpack.c.bf16 %v2429_v50, %v2429_v50  ;;  %v2425_v41 = vsel %vm1580_vm7, %v6994_v29, %v2424_v38  ;;  %v1888_v57 = vrot.slane %v6934_v33, 4  ;;  %v1829_v43 = vsel %vm1580_vm7, %v1828_v55, %v6911_v25 }
 0x331   : > { %v2891_v14 = vsel %vm2810_vm8, %v2550_v16, 0  ;;  %v2419_v3 = vsel %vm1580_vm7, %v2418_v32, %v2377_v27  ;;  %v2421_v34 = vsel %vm1580_vm7, %v2401_v44, %v2420_v36  ;;  %v2549_v23 = vpack.c.bf16 %v2425_v41, %v2425_v41 }
 0x332   : > { %2900 = vmatpush.bf16.xpose.msrb.mxu2 %v2891_v14  ;;  %v2546_v52 = vpack.c.bf16 %v2419_v3, %v2419_v3  ;;  %v2910_v53 = vsel %vm2810_vm8, %v2551_v40, 0  ;;  %v2547_v7 = vpack.c.bf16 %v2421_v34, %v2421_v34  ;;  %v1819_v54 = vsel %vm1580_vm7, %v6894_v59, %v1818_v2 }
 0x333   : > { %v2872_v51 = vsel %vm2810_vm8, %v2549_v23, 0  ;;  %v7022_v61 = vperm.slane %v6941_v37, %v6762_v46  ;;  %v2385_v62 = vsel %vm1580_vm7, %v2345_v47, %v2384_v9  ;;  %v1815_v63 = vperm.slane %v1807_v58, %v6762_v46 }
 0x334   : > { %v2815_v25 = vsel %vm2810_vm8, %v2546_v52, 0  ;;  %v2834_v55 = vsel %vm2810_vm8, %v2547_v7, 0  ;;  %2881 = vmatpush.bf16.xpose.msrb.mxu0 %v2872_v51  ;;  %v1827_v1 = vperm.slane %v1819_v54, %v6762_v46  ;;  %v2422_v8 = vrot.slane %v6994_v29, 4 }
 0x335   : > { %2824 = vmatpush.bf16.xpose.msra.mxu3 %v2815_v25  ;;  %v1889_v2 = vsel %vm1580_vm7, %v1888_v57, %v7022_v61  ;;  %v7033_v37 = vperm.slane %v2385_v62, %v6764_v49  ;;  %v2408_v47 = vrot.slane %v6961_v48, 4  ;;  %1575 = vrot.lane.b32.xlu0 %v6925_v60, %s6263_s16  ;;  %v1804_v12 = vrot.slane %v1681_v31, 4 }
 0x336   : > { %v1864_v9 = vrot.slane %v1827_v1, 4  ;;  %v1895_v11 = vperm.slane %v1889_v2, %v6764_v49  ;;  %v1817_v5 = vsel %vm1580_vm7, %v1816_v39, %v6905_v6  ;;  %1545 = vrot.lane.b32.xlu1 %v6925_v60, %s6258_s18  ;;  %v1835_v0 = vperm.slane %v1829_v43, %v6762_v46  ;;  %2070 = vrot.lane.b32.xlu2 %v6851_v28, %s6260_s10 }
 0x337   : > { %v2409_v13 = vsel %vm1580_vm7, %v6955_v42, %v2408_v47  ;;  %v2432_v48 = vrot.slane %v7033_v37, 4  ;;  %v1823_v4 = vperm.slane %v1817_v5, %v6762_v46  ;;  %v1805_v39 = vsel %vm1580_vm7, %v1804_v12, %v6899_v20 }
 0x338   : > { %v1865_v18 = vsel %vm1580_vm7, %v1864_v9, %v1815_v63  ;;  %v1908_v59 = vrot.slane %v1895_v11, 4  ;;  %v2417_v6 = vperm.slane %v2409_v13, %v6764_v49  ;;  %v1811_v42 = vperm.slane %v1805_v39, %v6762_v46 }
 0x339   : > { %v1871_v19 = vperm.slane %v1865_v18, %v6764_v49  ;;  %v1852_v21 = vrot.slane %v1823_v4, 4  ;;  %v1876_v45 = vrot.slane %v6946_v35, 4  ;;  %v1878_v17 = vrot.slane %v1835_v0, 4 }
 0x33a   : > { %2919 = vmatpush.bf16.xpose.msra.mxu2 %v2910_v53  ;;  %v2433_v15 = vsel %vm1580_vm7, %v2417_v6, %v2432_v48  ;;  %v1854_v56 = vrot.slane %v1811_v42, 4  ;;  %v2423_v31 = vsel %vm1580_vm7, %v2422_v8, %v6983_v24  ;;  %v1866_v57 = vrot.slane %v1815_v63, 4 }
 0x33b   : > { %v1909_v22 = vsel %vm1580_vm7, %v1908_v59, %v1871_v19  ;;  %v2553_v26 = vpack.c.bf16 %v2433_v15, %v2433_v15  ;;  %v1853_v27 = vsel %vm1580_vm7, %v1852_v21, %v1811_v42  ;;  %v1877_v30 = vsel %vm1580_vm7, %v1876_v45, %v1835_v0 }
 0x33c   : > { %v2032_v44 = vpack.c.bf16 %v1909_v22, %v1909_v22  ;;  %v1859_v29 = vperm.slane %v1853_v27, %v6764_v49  ;;  %v1883_v38 = vperm.slane %v1877_v30, %v6764_v49  ;;  %v1855_v16 = vsel %vm1580_vm7, %v1823_v4, %v1854_v56 }
 0x33d   : > { %2843 = vmatpush.bf16.xpose.msrb.mxu3 %v2834_v55  ;;  %v2948_v20 = vsel %vm2810_vm8, %v2553_v26, 0  ;;  %v1879_v32 = vsel %vm1580_vm7, %v6946_v35, %v1878_v17  ;;  %v1863_v36 = vperm.slane %v1855_v16, %v6764_v49  ;;  %v2548_v40 = vpack.c.bf16 %v2423_v31, %v2423_v31 }
 0x33e   : > { %4969 = vmatmul.msk.bf16.vlgmr.msrb.gmra.mxu2 %vm2810_vm8, %v2032_v44  ;;  %2957 = vmatpush.bf16.xpose.msra.mxu0 %v2948_v20  ;;  %v1900_v50 = vrot.slane %v1883_v38, 4  ;;  %v1887_v58 = vperm.slane %v1879_v32, %v6764_v49  ;;  %v1910_v23 = vrot.slane %v1871_v19, 4  ;;  %v1867_v43 = vsel %vm1580_vm7, %v1827_v1, %v1866_v57 }
 0x33f   : > { %1551 = vrot.lane.b32.xlu2 %v6925_v60, %s6260_s10  ;;  %v1906_v24 = vrot.slane %v1863_v36, 4  ;;  %v2853_v35 = vsel %vm2810_vm8, %v2548_v40, 0  ;;  %v1890_v52 = vrot.slane %v7022_v61, 4  ;;  %v2430_v7 = vrot.slane %v2417_v6, 4 }
 0x340   : > { %v1901_v41 = vsel %vm1580_vm7, %v1900_v50, %v1859_v29  ;;  %v1911_v53 = vsel %vm1580_vm7, %v1895_v11, %v1910_v23  ;;  %v1875_v51 = vperm.slane %v1867_v43, %v6764_v49  ;;  %v1902_v54 = vrot.slane %v1859_v29, 4 }
 0x341   : > { %v2028_v14 = vpack.c.bf16 %v1901_v41, %v1901_v41  ;;  %v1907_v3 = vsel %vm1580_vm7, %v1887_v58, %v1906_v24  ;;  %v2033_v62 = vpack.c.bf16 %v1911_v53, %v1911_v53  ;;  %v1891_v25 = vsel %vm1580_vm7, %v6934_v33, %v1890_v52 }
 0x342   : > { %v2031_v34 = vpack.c.bf16 %v1907_v3, %v1907_v3  ;;  %v2431_v55 = vsel %vm1580_vm7, %v2430_v7, %v7033_v37  ;;  %v1914_v63 = vrot.slane %v1875_v51, 4  ;;  %v1903_v1 = vsel %vm1580_vm7, %v1883_v38, %v1902_v54 }
 0x343   : > { %4965 = vmatmul.msk.bf16.vlgmr.msra.gmra.mxu3 %vm2810_vm8, %v2028_v14  ;;  %v1899_v61 = vperm.slane %v1891_v25, %v6764_v49  ;;  %v2552_v8 = vpack.c.bf16 %v2431_v55, %v2431_v55  ;;  %v2029_v47 = vpack.c.bf16 %v1903_v1, %v1903_v1  ;;  %v1904_v33 = vrot.slane %v1887_v58, 4 }
 0x344   : > { %4968 = vmatmul.msk.bf16.vlgmr.msrb.gmra.mxu0 %vm2810_vm8, %v2031_v34  ;;  %v1694_v34 = vrot.slane %v6925_v60, 4 }
 0x345   : > { %2862 = vmatpush.bf16.xpose.msra.mxu3 %v2853_v35  ;;  %v1915_v2 = vsel %vm1580_vm7, %v1899_v61, %v1914_v63  ;;  %v2929_v9 = vsel %vm2810_vm8, %v2552_v8, 0  ;;  %v1905_v37 = vsel %vm1580_vm7, %v1904_v33, %v1863_v36  ;;  %v1912_v5 = vrot.slane %v1899_v61, 4 }
 0x346   : > { %v2035_v11 = vpack.c.bf16 %v1915_v2, %v1915_v2  ;;  %v2030_v12 = vpack.c.bf16 %v1905_v37, %v1905_v37  ;;  %v2212_v35 = vrot.slane %v6851_v28, 4 }
 0x347   : > { %v1913_v13 = vsel %vm1580_vm7, %v1912_v5, %v1875_v51 }
 0x348   : > { %v2034_v48 = vpack.c.bf16 %v1913_v13, %v1913_v13 }
 0x34e   : > { %4970 = vmatmul.msk.bf16.vlgmr.msra.gmra.mxu2 %vm2810_vm8, %v2033_v62 }
 0x353   : > { %4966 = vmatmul.msk.bf16.vlgmr.msrb.gmra.mxu3 %vm2810_vm8, %v2029_v47 }
 0x354   : > { %2938 = vmatpush.bf16.xpose.msrb.mxu3 %v2929_v9  ;;  %4972 = vmatmul.msk.bf16.vlgmr.msra.gmra.mxu0 %vm2810_vm8, %v2035_v11 }
 0x363   : > { %4967 = vmatmul.msk.bf16.vlgmr.msra.gmra.mxu3 %vm2810_vm8, %v2030_v12 }
 0x373   : > { %4971 = vmatmul.msk.bf16.vlgmr.msrb.gmra.mxu3 %vm2810_vm8, %v2034_v48 }
 0x380   : > { %v5577_v4 = vpop.permute.xlu2 %5576 }
 0x381   : > { %v5579_v6 = vunpack.i.h.bf16 %v5577_v4  ;;  %v5578_v39 = vunpack.i.l.bf16 %v5577_v4 }
 0x383   : > { %v1718_v45 = vrot.slane %v5579_v6, 4  ;;  %v2236_v15 = vrot.slane %v5578_v39, 4 }
 0x388   : > { %v5592_v0 = vpop.permute.xlu2 %5591 }
 0x389   : > { %v5593_v18 = vunpack.i.l.bf16 %v5592_v0  ;;  %v5594_v26 = vunpack.i.h.bf16 %v5592_v0 }
 0x38b   : > { %v2224_v19 = vrot.slane %v5593_v18, 4  ;;  %v1706_v58 = vrot.slane %v5594_v26, 4 }
 0x390   : > { %v2071_v59 = vpop.permute.xlu2 %2070 }
 0x391   : > { %v2222_v42 = vrot.slane %v2071_v59, 4  ;;  %v2225_v21 = vsel %vm1580_vm7, %v2071_v59, %v2224_v19 }
 0x392   : > { %v2233_v30 = vperm.slane %v2225_v21, %v6762_v46 }
 0x393   : > { %v2223_v27 = vsel %vm1580_vm7, %v2222_v42, %v5593_v18 }
 0x394   : > { %v2229_v50 = vperm.slane %v2223_v27, %v6762_v46  ;;  %v2270_v23 = vrot.slane %v2233_v30, 4 }
 0x396   : > { %v2258_v7 = vrot.slane %v2229_v50, 4 }
 0x397   : > { %v5587_v17 = vpop.permute.xlu0 %5586  ;;  %v7101_v22 = vpop.permute.xlu1 %5581 }
 0x398   : > { %v5589_v44 = vunpack.i.h.bf16 %v5587_v17  ;;  %v5588_v56 = vunpack.i.l.bf16 %v5587_v17  ;;  %v5583_v20 = vunpack.i.l.bf16 %v7101_v22  ;;  %v5584_v41 = vunpack.i.h.bf16 %v7101_v22 }
 0x399   : > { %v1552_v29 = vpop.permute.xlu2 %1551 }
 0x39a   : > { %v1716_v38 = vrot.slane %v5589_v44, 4  ;;  %v1719_v31 = vsel %vm1580_vm7, %v5589_v44, %v1718_v45  ;;  %v2234_v16 = vrot.slane %v5588_v56, 4  ;;  %v2237_v32 = vsel %vm1580_vm7, %v5588_v56, %v2236_v15 }
 0x39b   : > { %v7110_v36 = vperm.slane %v1719_v31, %v6762_v46  ;;  %v2245_v40 = vperm.slane %v2237_v32, %v6762_v46  ;;  %v1704_v14 = vrot.slane %v1552_v29, 4  ;;  %v2248_v52 = vrot.slane %v5583_v20, 4 }
 0x39c   : > { %v1717_v24 = vsel %vm1580_vm7, %v1716_v38, %v5579_v6  ;;  %v2235_v57 = vsel %vm1580_vm7, %v2234_v16, %v5578_v39  ;;  %v1707_v53 = vsel %vm1580_vm7, %v1552_v29, %v1706_v58  ;;  %v1730_v62 = vrot.slane %v5584_v41, 4 }
 0x39d   : > { %v7117_v3 = vperm.slane %v1717_v24, %v6762_v46  ;;  %v2241_v43 = vperm.slane %v2235_v57, %v6762_v46  ;;  %v1778_v51 = vrot.slane %v7110_v36, 4  ;;  %v2296_v54 = vrot.slane %v2245_v40, 4 }
 0x39e   : > { %v1705_v63 = vsel %vm1580_vm7, %v1704_v14, %v5594_v26  ;;  %v7130_v47 = vperm.slane %v1707_v53, %v6762_v46 }
 0x39f   : > { %v2095_v25 = vpop.permute.xlu0 %2094  ;;  %v2065_v55 = vpop.permute.xlu1 %2064  ;;  %v1766_v2 = vrot.slane %v7117_v3, 4  ;;  %v2284_v33 = vrot.slane %v2241_v43, 4  ;;  %v7142_v18 = vperm.slane %v1705_v63, %v6762_v46 }
 0x3a0   : > { %v2246_v1 = vrot.slane %v2095_v25, 4  ;;  %v2249_v61 = vsel %vm1580_vm7, %v2095_v25, %v2248_v52  ;;  %v2210_v8 = vrot.slane %v2065_v55, 4  ;;  %v2213_v11 = vsel %vm1580_vm7, %v2065_v55, %v2212_v35 }
 0x3a1   : > { %v2257_v9 = vperm.slane %v2249_v61, %v6762_v46  ;;  %v2221_v5 = vperm.slane %v2213_v11, %v6762_v46  ;;  %v1752_v19 = vrot.slane %v7130_v47, 4  ;;  %v1740_v14 = vrot.slane %v7142_v18, 4 }
 0x3a2   : > { %v2247_v37 = vsel %vm1580_vm7, %v2246_v1, %v5583_v20  ;;  %v2211_v12 = vsel %vm1580_vm7, %v2210_v8, %v6851_v28 }
 0x3a3   : > { %v2253_v13 = vperm.slane %v2247_v37, %v6762_v46  ;;  %v2294_v48 = vrot.slane %v2257_v9, 4  ;;  %v2297_v4 = vsel %vm1580_vm7, %v2257_v9, %v2296_v54  ;;  %v2217_v0 = vperm.slane %v2211_v12, %v6762_v46  ;;  %v7188_v12 = vpop.f32.mrf.mxu2 }
 0x3a4   : > { %v2305_v59 = vperm.slane %v2297_v4, %v6764_v49  ;;  %v2271_v6 = vsel %vm1580_vm7, %v2270_v23, %v2221_v5  ;;  %v2272_v39 = vrot.slane %v2221_v5, 4 }
 0x3a5   : > { %v2282_v28 = vrot.slane %v2253_v13, 4  ;;  %v2285_v42 = vsel %vm1580_vm7, %v2253_v13, %v2284_v33  ;;  %v2295_v21 = vsel %vm1580_vm7, %v2294_v48, %v2245_v40  ;;  %v2259_v17 = vsel %vm1580_vm7, %v2258_v7, %v2217_v0 }
 0x3a6   : > { %v2293_v45 = vperm.slane %v2285_v42, %v6764_v49  ;;  %v2301_v15 = vperm.slane %v2295_v21, %v6764_v49  ;;  %v2260_v26 = vrot.slane %v2217_v0, 4  ;;  %v2318_v44 = vrot.slane %v2305_v59, 4 }
 0x3a7   : > { %v2283_v27 = vsel %vm1580_vm7, %v2282_v28, %v2241_v43  ;;  %v2273_v56 = vsel %vm1580_vm7, %v2233_v30, %v2272_v39  ;;  %v2277_v20 = vperm.slane %v2271_v6, %v6764_v49  ;;  %v1576_v29 = vpop.permute.xlu0 %1575  ;;  %v2265_v40 = vperm.slane %v2259_v17, %v6764_v49 }
 0x3a8   : > { %v7156_v38 = vperm.slane %v2283_v27, %v6764_v49  ;;  %v2310_v31 = vrot.slane %v2293_v45, 4  ;;  %v2314_v16 = vrot.slane %v2301_v15, 4  ;;  %v2261_v32 = vsel %vm1580_vm7, %v2229_v50, %v2260_v26  ;;  %v1546_v9 = vpop.permute.xlu1 %1545 }
 0x3a9   : > { %v2269_v58 = vperm.slane %v2261_v32, %v6764_v49  ;;  %v2281_v24 = vperm.slane %v2273_v56, %v6764_v49  ;;  %v2316_v57 = vrot.slane %v2277_v20, 4  ;;  %v1728_v23 = vrot.slane %v1576_v29, 4 }
 0x3aa   : > { %v2306_v30 = vrot.slane %v7156_v38, 4  ;;  %v2315_v35 = vsel %vm1580_vm7, %v2314_v16, %v2277_v20  ;;  %v1731_v53 = vsel %vm1580_vm7, %v1576_v29, %v1730_v62  ;;  %v2308_v63 = vrot.slane %v2265_v40, 4 }
 0x3ab   : > { %v7166_v43 = vsel %vm1580_vm7, %v2310_v31, %v2269_v58  ;;  %v2312_v52 = vrot.slane %v2269_v58, 4  ;;  %v2319_v50 = vsel %vm1580_vm7, %v2318_v44, %v2281_v24  ;;  %v7174_v54 = vsel %vm1580_vm7, %v2301_v15, %v2316_v57 }
 0x3ac   : > { %v7171_v7 = vsel %vm1580_vm7, %v2306_v30, %v2265_v40  ;;  %v2320_v25 = vrot.slane %v2281_v24, 4  ;;  %v2458_v55 = vrot.slane %v2319_v50, 4  ;;  %v2434_v61 = vrot.slane %v7166_v43, 4 }
 0x3ad   : > { %v7177_v1 = vsel %vm1580_vm7, %v2293_v45, %v2312_v52  ;;  %v2460_v8 = vrot.slane %v2315_v35, 4  ;;  %v1729_v33 = vsel %vm1580_vm7, %v1728_v23, %v5584_v41  ;;  %v1739_v37 = vperm.slane %v1731_v53, %v6762_v46  ;;  %v7240_v52 = vpop.f32.mrf.mxu2 }
 0x3ae   : > { %v7181_v11 = vsel %vm1580_vm7, %v2305_v59, %v2320_v25  ;;  %v2459_v62 = vsel %vm1580_vm7, %v2458_v55, %v2315_v35  ;;  %v2436_v5 = vrot.slane %v7171_v7, 4  ;;  %v2472_v48 = vrot.slane %v7174_v54, 4 }
 0x3af   : > { %v2461_v13 = vsel %vm1580_vm7, %v2319_v50, %v2460_v8  ;;  %v1735_v4 = vperm.slane %v1729_v33, %v6762_v46  ;;  %v2470_v0 = vrot.slane %v7181_v11, 4  ;;  %v1776_v59 = vrot.slane %v1739_v37, 4 }
 0x3b0   : > { %v1779_v22 = vsel %vm1580_vm7, %v1739_v37, %v1778_v51  ;;  %v1692_v41 = vrot.slane %v1546_v9, 4  ;;  %v7199_v6 = vperm.slane %v2459_v62, %v6762_v46  ;;  %v1695_v51 = vsel %vm1580_vm7, %v1546_v9, %v1694_v34 }
 0x3b1   : > { %v1764_v39 = vrot.slane %v1735_v4, 4  ;;  %v1767_v28 = vsel %vm1580_vm7, %v1735_v4, %v1766_v2  ;;  %v1787_v42 = vperm.slane %v1779_v22, %v6764_v49  ;;  %v1777_v45 = vsel %vm1580_vm7, %v1776_v59, %v7110_v36 }
 0x3b2   : > { %v1775_v21 = vperm.slane %v1767_v28, %v6764_v49  ;;  %v1693_v15 = vsel %vm1580_vm7, %v1692_v41, %v6925_v60  ;;  %v7214_v17 = vperm.slane %v2461_v13, %v6762_v46  ;;  %v1783_v26 = vperm.slane %v1777_v45, %v6764_v49 }
 0x3b3   : > { %v1765_v2 = vsel %vm1580_vm7, %v1764_v39, %v7117_v3  ;;  %v1699_v27 = vperm.slane %v1693_v15, %v6762_v46  ;;  %v2471_v36 = vsel %vm1580_vm7, %v2470_v0, %v7174_v54  ;;  %v1800_v56 = vrot.slane %v1787_v42, 4 }
 0x3b4   : > { %v1771_v44 = vperm.slane %v1765_v2, %v6764_v49  ;;  %v1703_v60 = vperm.slane %v1695_v51, %v6762_v46  ;;  %v1792_v20 = vrot.slane %v1775_v21, 4  ;;  %v1796_v34 = vrot.slane %v1783_v26, 4 }
 0x3b5   : > { %v1741_v29 = vsel %vm1580_vm7, %v1740_v14, %v1699_v27  ;;  %v1742_v31 = vrot.slane %v1699_v27, 4  ;;  %v2309_v57 = vsel %vm1580_vm7, %v7156_v38, %v2308_v63  ;;  %v2435_v14 = vsel %vm1580_vm7, %v2434_v61, %v7171_v7 }
 0x3b6   : > { %v1788_v16 = vrot.slane %v1771_v44, 4  ;;  %v1747_v3 = vperm.slane %v1741_v29, %v6764_v49  ;;  %v1753_v32 = vsel %vm1580_vm7, %v1752_v19, %v1703_v60  ;;  %v1754_v40 = vrot.slane %v1703_v60, 4 }
 0x3b7   : > { %v1743_v58 = vsel %vm1580_vm7, %v7142_v18, %v1742_v31  ;;  %v1759_v24 = vperm.slane %v1753_v32, %v6764_v49  ;;  %v2446_v62 = vrot.slane %v7177_v1, 4  ;;  %v2441_v27 = vperm.slane %v2435_v14, %v6762_v46 }
 0x3b8   : > { %v1751_v30 = vperm.slane %v1743_v58, %v6764_v49  ;;  %v1755_v35 = vsel %vm1580_vm7, %v7130_v47, %v1754_v40  ;;  %v1789_v23 = vsel %vm1580_vm7, %v1788_v16, %v1747_v3  ;;  %v1790_v19 = vrot.slane %v1747_v3, 4 }
 0x3b9   : > { %v1763_v18 = vperm.slane %v1755_v35, %v6764_v49  ;;  %v1797_v50 = vsel %vm1580_vm7, %v1796_v34, %v1759_v24  ;;  %v1798_v53 = vrot.slane %v1759_v24, 4  ;;  %v1918_v25 = vrot.slane %v1789_v23, 4 }
 0x3ba   : > { %v7245_v38 = vsel %vm1580_vm7, %v1771_v44, %v1790_v19  ;;  %v1793_v55 = vsel %vm1580_vm7, %v1792_v20, %v1751_v30  ;;  %v1794_v63 = vrot.slane %v1751_v30, 4  ;;  %v1942_v61 = vrot.slane %v1797_v50, 4 }
 0x3bb   : > { %v1801_v47 = vsel %vm1580_vm7, %v1800_v56, %v1763_v18  ;;  %v1802_v8 = vrot.slane %v1763_v18, 4  ;;  %v1916_v9 = vrot.slane %v1793_v55, 4  ;;  %v1799_v37 = vsel %vm1580_vm7, %v1783_v26, %v1798_v53  ;;  %v7314_v53 = vld [vmem:[#allocation9] sm:$0xff] }
 0x3bc   : > { %v7251_v33 = vsel %vm1580_vm7, %v1775_v21, %v1794_v63  ;;  %v1919_v13 = vsel %vm1580_vm7, %v1793_v55, %v1918_v25  ;;  %v1940_v4 = vrot.slane %v1801_v47, 4  ;;  %v1930_v41 = vrot.slane %v7245_v38, 4 }
 0x3bd   : > { %v1803_v0 = vsel %vm1580_vm7, %v1787_v42, %v1802_v8  ;;  %v1917_v59 = vsel %vm1580_vm7, %v1916_v9, %v1789_v23  ;;  %v1928_v22 = vrot.slane %v7251_v33, 4  ;;  %v7260_v39 = vperm.slane %v1919_v13, %v6762_v46 }
 0x3be   : > { %v1941_v28 = vsel %vm1580_vm7, %v1940_v4, %v1797_v50  ;;  %v1943_v21 = vsel %vm1580_vm7, %v1801_v47, %v1942_v61  ;;  %v1952_v45 = vrot.slane %v1803_v0, 4  ;;  %v7265_v15 = vperm.slane %v1917_v59, %v6762_v46 }
 0x3bf   : > { %v7268_v51 = vperm.slane %v1941_v28, %v6762_v46  ;;  %v7271_v42 = vperm.slane %v1943_v21, %v6762_v46  ;;  %v1954_v2 = vrot.slane %v1799_v37, 4  ;;  %v2447_v44 = vsel %vm1580_vm7, %v2446_v62, %v2309_v57 }
 0x3c0   : > { %v1953_v26 = vsel %vm1580_vm7, %v1952_v45, %v1799_v37  ;;  %v2448_v56 = vrot.slane %v2309_v57, 4  ;;  %v7278_v60 = vsel %vm1580_vm7, %v1928_v22, %v7245_v38  ;;  %v2453_v3 = vperm.slane %v2447_v44, %v6762_v46 }
 0x3c1   : > { %v1955_v20 = vsel %vm1580_vm7, %v1803_v0, %v1954_v2  ;;  %v7282_v34 = vperm.slane %v1953_v26, %v6762_v46  ;;  %v1990_v29 = vrot.slane %v7268_v51, 4  ;;  %v2902_v31 = vpop.f32.mrf.mxu2  ;;  %v2002_v16 = vrot.slane %v7271_v42, 4  ;;  %v7288_v58 = vpop.f32.mrf.mxu0 }
 0x3c2   : > { %v2477_v32 = vperm.slane %v2471_v36, %v6762_v46  ;;  %v2484_v40 = vrot.slane %v2441_v27, 4  ;;  %v2508_v24 = vrot.slane %v7199_v6, 4  ;;  %v2437_v57 = vsel %vm1580_vm7, %v7166_v43, %v2436_v5 }
 0x3c3   : > { %v2449_v14 = vsel %vm1580_vm7, %v7177_v1, %v2448_v56  ;;  %v2473_v30 = vsel %vm1580_vm7, %v7181_v11, %v2472_v48  ;;  %v7302_v36 = vperm.slane %v1955_v20, %v6762_v46  ;;  %v2482_v23 = vrot.slane %v2453_v3, 4 }
 0x3c4   : > { %v2485_v35 = vsel %vm1580_vm7, %v2453_v3, %v2484_v40  ;;  %v2506_v19 = vrot.slane %v2477_v32, 4  ;;  %v2509_v18 = vsel %vm1580_vm7, %v2477_v32, %v2508_v24  ;;  %v2445_v43 = vperm.slane %v2437_v57, %v6762_v46 }
 0x3c5   : > { %v2493_v7 = vperm.slane %v2485_v35, %v6764_v49  ;;  %v2457_v1 = vperm.slane %v2449_v14, %v6762_v46  ;;  %v2517_v54 = vperm.slane %v2509_v18, %v6764_v49  ;;  %v2483_v5 = vsel %vm1580_vm7, %v2482_v23, %v2441_v27 }
 0x3c6   : > { %v2507_v11 = vsel %vm1580_vm7, %v2506_v19, %v7199_v6  ;;  %v2481_v48 = vperm.slane %v2473_v30, %v6762_v46  ;;  %v2826_v50 = vpop.f32.mrf.mxu3  ;;  %v2489_v25 = vperm.slane %v2483_v5, %v6764_v49  ;;  %v2496_v61 = vrot.slane %v2445_v43, 4 }
 0x3c7   : > { %v2513_v55 = vperm.slane %v2507_v11, %v6764_v49  ;;  %v2536_v63 = vrot.slane %v2493_v7, 4  ;;  %v3115_v47 = vadd.f32 %v2902_v31, %v2826_v50  ;;  %v2534_v8 = vrot.slane %v2517_v54, 4 }
 0x3c8   : > { %v2520_v9 = vrot.slane %v7214_v17, 4  ;;  %v2494_v62 = vrot.slane %v2457_v1, 4  ;;  %v2532_v4 = vrot.slane %v2489_v25, 4  ;;  %v2497_v0 = vsel %vm1580_vm7, %v2457_v1, %v2496_v61 }
 0x3c9   : > { %v2904_v37 = vpop.f32.mrf.mxu2  ;;  %v2530_v13 = vrot.slane %v2513_v55, 4  ;;  %v2537_v6 = vsel %vm1580_vm7, %v2517_v54, %v2536_v63  ;;  %v7322_v59 = vadd.f32 %v7314_v53, %v3115_v47  ;;  %v2535_v22 = vsel %vm1580_vm7, %v2534_v8, %v2493_v7  ;;  %v2885_v45 = vpop.f32.mrf.mxu0 }
 0x3ca   : > { %v2557_v28 = vpack.c.bf16 %v2537_v6, %v2537_v6  ;;  %v2505_v21 = vperm.slane %v2497_v0, %v6764_v49  ;;  %v2556_v2 = vpack.c.bf16 %v2535_v22, %v2535_v22  ;;  %v2521_v27 = vsel %vm1580_vm7, %v2481_v48, %v2520_v9 }
 0x3cb   : > { %v2531_v26 = vsel %vm1580_vm7, %v2530_v13, %v2489_v25  ;;  %v2495_v44 = vsel %vm1580_vm7, %v2494_v62, %v2445_v43  ;;  %v3133_v56 = vsel %vm3132_vm9, %v7322_v59, -inf  ;;  %v2529_v3 = vperm.slane %v2521_v27, %v6764_v49 }
 0x3cc   : > { %v2554_v20 = vpack.c.bf16 %v2531_v26, %v2531_v26  ;;  %v3024_v31 = vsel %vm2810_vm8, %v2557_v28, 0  ;;  %3134 = vmax.xlane.f32.xlu2 %v3133_v56  ;;  %v3005_v32 = vsel %vm2810_vm8, %v2556_v2, 0  ;;  %v2501_v40 = vperm.slane %v2495_v44, %v6764_v49 }
 0x3cd   : > { %3033 = vmatpush.bf16.xpose.msrb.mxu0 %v3024_v31  ;;  %v2518_v24 = vrot.slane %v2481_v48, 4  ;;  %v2533_v57 = vsel %vm1580_vm7, %v2513_v55, %v2532_v4  ;;  %3014 = vmatpush.bf16.xpose.msra.mxu3 %v3005_v32  ;;  %v2542_v30 = vrot.slane %v2529_v3, 4  ;;  %v2544_v23 = vrot.slane %v2505_v21, 4 }
 0x3ce   : > { %v2967_v14 = vsel %vm2810_vm8, %v2554_v20, 0  ;;  %v2555_v35 = vpack.c.bf16 %v2533_v57, %v2533_v57  ;;  %v2828_v19 = vpop.f32.mrf.mxu3  ;;  %v2540_v18 = vrot.slane %v2501_v40, 4  ;;  %v1935_v43 = vperm.slane %v7278_v60, %v6762_v46 }
 0x3cf   : > { %2976 = vmatpush.bf16.xpose.msrb.mxu1 %v2967_v14  ;;  %v2519_v7 = vsel %vm1580_vm7, %v2518_v24, %v7214_v17  ;;  %v1966_v1 = vrot.slane %v7265_v15, 4  ;;  %v2543_v54 = vsel %vm1580_vm7, %v2542_v30, %v2505_v21  ;;  %v2545_v48 = vsel %vm1580_vm7, %v2529_v3, %v2544_v23 }
 0x3d0   : > { %v2525_v5 = vperm.slane %v2519_v7, %v6764_v49  ;;  %v2986_v11 = vsel %vm2810_vm8, %v2555_v35, 0  ;;  %v2560_v50 = vpack.c.bf16 %v2543_v54, %v2543_v54  ;;  %v2561_v25 = vpack.c.bf16 %v2545_v48, %v2545_v48 }
 0x3d1   : > { %2995 = vmatpush.bf16.xpose.msrb.mxu2 %v2986_v11  ;;  %v2921_v55 = vpop.f32.mrf.mxu2  ;;  %v1967_v17 = vsel %vm1580_vm7, %v1935_v43, %v1966_v1  ;;  %v1991_v60 = vsel %vm1580_vm7, %v7282_v34, %v1990_v29  ;;  %v2959_v13 = vpop.f32.mrf.mxu0  ;;  %v1964_v4 = vrot.slane %v1935_v43, 4  ;;  %v1988_v22 = vrot.slane %v7282_v34, 4 }
 0x3d2   : > { %v2538_v63 = vrot.slane %v2525_v5, 4  ;;  %v2541_v61 = vsel %vm1580_vm7, %v2525_v5, %v2540_v18  ;;  %v1975_v47 = vperm.slane %v1967_v17, %v6764_v49  ;;  %v1999_v8 = vperm.slane %v1991_v60, %v6764_v49 }
 0x3d3   : > { %v3081_v9 = vsel %vm2810_vm8, %v2560_v50, 0  ;;  %v3100_v62 = vsel %vm2810_vm8, %v2561_v25, 0  ;;  %v2559_v37 = vpack.c.bf16 %v2541_v61, %v2541_v61  ;;  %v3118_v29 = vadd.f32 %v2959_v13, %v7288_v58 }
 0x3d4   : > { %v2539_v6 = vsel %vm1580_vm7, %v2538_v63, %v2501_v40  ;;  %v2016_v0 = vrot.slane %v1999_v8, 4  ;;  %v1965_v45 = vsel %vm1580_vm7, %v1964_v4, %v7265_v15  ;;  %v2018_v2 = vrot.slane %v1975_v47, 4 }
 0x3d5   : > { %3090 = vmatpush.bf16.xpose.msrb.mxu3 %v3081_v9  ;;  %3109 = vmatpush.bf16.xpose.msra.mxu0 %v3100_v62  ;;  %v2558_v28 = vpack.c.bf16 %v2539_v6, %v2539_v6  ;;  %v3062_v21 = vsel %vm2810_vm8, %v2559_v37, 0  ;;  %v1971_v27 = vperm.slane %v1965_v45, %v6764_v49  ;;  %v1989_v44 = vsel %vm1580_vm7, %v1988_v22, %v7268_v51 }
 0x3d6   : > { %v2017_v26 = vsel %vm1580_vm7, %v2016_v0, %v1975_v47  ;;  %v7367_v58 = vadd.f32 %v7314_v53, %v3118_v29  ;;  %v2845_v20 = vpop.f32.mrf.mxu3  ;;  %v1995_v31 = vperm.slane %v1989_v44, %v6764_v49  ;;  %v2019_v15 = vsel %vm1580_vm7, %v1999_v8, %v2018_v2 }
 0x3d7   : > { %v3043_v34 = vsel %vm2810_vm8, %v2558_v28, 0  ;;  %v2038_v56 = vpack.c.bf16 %v2017_v26, %v2017_v26  ;;  %v3116_v3 = vadd.f32 %v2921_v55, %v2845_v20  ;;  %v2014_v32 = vrot.slane %v1971_v27, 4 }
 0x3d8   : > { %3052 = vmatpush.bf16.xpose.msra.mxu1 %v3043_v34  ;;  %v2039_v40 = vpack.c.bf16 %v2019_v15, %v2019_v15  ;;  %v3142_v24 = vsel %vm3132_vm9, %v7367_v58, -inf  ;;  %v2012_v51 = vrot.slane %v1995_v31, 4  ;;  %v1931_v14 = vsel %vm1580_vm7, %v7251_v33, %v1930_v41 }
 0x3d9   : > { %3071 = vmatpush.bf16.xpose.msra.mxu2 %v3062_v21  ;;  %4975 = vmatmul.msk.bf16.vlgmr.msra.gmra.mxu3 %vm2810_vm8, %v2038_v56  ;;  %v2923_v57 = vpop.f32.mrf.mxu2  ;;  %v1978_v30 = vrot.slane %v7260_v39, 4  ;;  %v2003_v35 = vsel %vm1580_vm7, %v7302_v36, %v2002_v16  ;;  %v2000_v23 = vrot.slane %v7302_v36, 4  ;;  %v2015_v19 = vsel %vm1580_vm7, %v1995_v31, %v2014_v32  ;;  %v2961_v18 = vpop.f32.mrf.mxu0 }
 0x3da   : > { %3143 = vmax.xlane.f32.xlu1 %v3142_v24  ;;  %4976 = vmatmul.msk.bf16.vlgmr.msrb.gmra.mxu0 %vm2810_vm8, %v2039_v40  ;;  %v7388_v7 = vadd.f32 %v7314_v53, %v3116_v3  ;;  %v1939_v38 = vperm.slane %v1931_v14, %v6762_v46  ;;  %v2013_v33 = vsel %vm1580_vm7, %v2012_v51, %v1971_v27 }
 0x3db   : > { %v2037_v41 = vpack.c.bf16 %v2015_v19, %v2015_v19  ;;  %v2036_v43 = vpack.c.bf16 %v2013_v33, %v2013_v33  ;;  %v2011_v36 = vperm.slane %v2003_v35, %v6764_v49  ;;  %v2001_v11 = vsel %vm1580_vm7, %v2000_v23, %v7271_v42 }
 0x3dc   : > { %v3136_v1 = vsel %vm3132_vm9, %v7388_v7, -inf  ;;  %v1979_v16 = vsel %vm1580_vm7, %v1939_v38, %v1978_v30  ;;  %v1976_v5 = vrot.slane %v1939_v38, 4  ;;  %v2007_v17 = vperm.slane %v2001_v11, %v6764_v49 }
 0x3dd   : > { %4974 = vmatmul.msk.bf16.vlgmr.msrb.gmra.mxu2 %vm2810_vm8, %v2037_v41  ;;  %3137 = vmax.xlane.f32.xlu0 %v3136_v1  ;;  %v1987_v54 = vperm.slane %v1979_v16, %v6764_v49  ;;  %v2024_v25 = vrot.slane %v2011_v36, 4 }
 0x3de   : > { %4973 = vmatmul.msk.bf16.vlgmr.msrb.gmra.mxu1 %vm2810_vm8, %v2036_v43  ;;  %v2847_v48 = vpop.f32.mrf.mxu3  ;;  %v1977_v50 = vsel %vm1580_vm7, %v1976_v5, %v7260_v39  ;;  %v2020_v47 = vrot.slane %v2007_v17, 4 }
 0x3df   : > { %v1983_v55 = vperm.slane %v1977_v50, %v6764_v49  ;;  %v2026_v60 = vrot.slane %v1987_v54, 4  ;;  %v2025_v63 = vsel %vm1580_vm7, %v2024_v25, %v1987_v54 }
 0x3e0   : > { %v2042_v9 = vpack.c.bf16 %v2025_v63, %v2025_v63 }
 0x3e1   : > { %v2022_v61 = vrot.slane %v1983_v55, 4  ;;  %v2027_v8 = vsel %vm1580_vm7, %v2011_v36, %v2026_v60  ;;  %v2021_v39 = vsel %vm1580_vm7, %v2020_v47, %v1983_v55  ;;  %v5629_v36 = vld [vmem:[%s1201_s2] ss:$0 sm:$0xff] }
 0x3e2   : > { %v2043_v37 = vpack.c.bf16 %v2027_v8, %v2027_v8  ;;  %v2040_v4 = vpack.c.bf16 %v2021_v39, %v2021_v39  ;;  %v7432_v54 = vadd.f32 %v5629_v36, %v7240_v52 }
 0x3e3   : > { %v2023_v42 = vsel %vm1580_vm7, %v2007_v17, %v2022_v61 }
 0x3e4   : > { %v2041_v13 = vpack.c.bf16 %v2023_v42, %v2023_v42 }
 0x3e6   : > { %v2864_v62 = vpop.f32.mrf.mxu3 }
 0x3e9   : > { %4979 = vmatmul.msk.bf16.vlgmr.msrb.gmra.mxu3 %vm2810_vm8, %v2042_v9 }
 0x3ea   : > { %4980 = vmatmul.msk.bf16.vlgmr.msra.gmra.mxu0 %vm2810_vm8, %v2043_v37 }
 0x3ed   : > { %4978 = vmatmul.msk.bf16.vlgmr.msra.gmra.mxu2 %vm2810_vm8, %v2041_v13 }
 0x3ee   : > { %4977 = vmatmul.msk.bf16.vlgmr.msra.gmra.mxu1 %vm2810_vm8, %v2040_v4  ;;  %v2866_v6 = vpop.f32.mrf.mxu3 }
 0x3f6   : > { %v2940_v29 = vpop.f32.mrf.mxu3 }
 0x3f7   : > { %v3117_v0 = vadd.f32 %v2940_v29, %v2864_v62 }
 0x3f9   : > { %v3126_v41 = vadd.f32 %v7314_v53, %v3117_v0 }
 0x3fb   : > { %v3139_v1 = vsel %vm3132_vm9, %v3126_v41, -inf }
 0x3fe   : > { %v2942_v22 = vpop.f32.mrf.mxu3 }
 0x43f   : > { %v3135_v25 = vpop.xlane.xlu2 %3134 }
 0x440   : > { %v3157_v52 = vsub.f32 %v7322_v59, %v3135_v25 }
 0x442   : > { %v3165_v55 = vmul.f32 1.442695, %v3157_v52 }
 0x450   : > { %v3138_v11 = vpop.xlane.xlu0 %3137 }
 0x451   : > { %v3158_v48 = vsub.f32 %v7388_v7, %v3138_v11  ;;  %v3144_v7 = vpop.xlane.xlu1 %3143 }
 0x452   : > { %v3160_v6 = vsub.f32 %v7367_v58, %v3144_v7 }
 0x453   : > { %v3167_v50 = vmul.f32 1.442695, %v3158_v48 }
 0x455   : > { %5640 = vpow2.f32 %v3167_v50 }
 0x456   : > { %5642 = vpow2.f32 %v3165_v55 }
 0x457   : > { %v3035_v28 = vpop.f32.mrf.mxu0 }
 0x45b   : > { %v2978_v21 = vpop.f32.mrf.mxu1 }
 0x45c   : > { %v3016_v45 = vpop.f32.mrf.mxu3 }
 0x45f   : > { %v3037_v2 = vpop.f32.mrf.mxu0 }
 0x460   : > { %v2997_v26 = vpop.f32.mrf.mxu2 }
 0x463   : > { %v2980_v27 = vpop.f32.mrf.mxu1 }
 0x464   : > { %v3018_v44 = vpop.f32.mrf.mxu3 }
 0x467   : > { %v3111_v34 = vpop.f32.mrf.mxu0 }
 0x468   : > { %v2999_v56 = vpop.f32.mrf.mxu2  ;;  %v3122_v20 = vadd.f32 %v3111_v34, %v3035_v28  ;;  %v3171_v28 = vmul.f32 1.442695, %v3160_v6 }
 0x46a   : > { %v3131_v31 = vadd.f32 %v7314_v53, %v3122_v20 }
 0x46b   : > { %v3054_v15 = vpop.f32.mrf.mxu1 }
 0x46c   : > { %v3119_v3 = vadd.f32 %v3054_v15, %v2978_v21  ;;  %v3092_v32 = vpop.f32.mrf.mxu3  ;;  %v3154_v40 = vsel %vm3132_vm9, %v3131_v31, -inf }
 0x46d   : > { %v3121_v24 = vadd.f32 %v3092_v32, %v3016_v45  ;;  %3155 = vmax.xlane.f32.xlu0 %v3154_v40 }
 0x46e   : > { %v7416_v51 = vadd.f32 %v7314_v53, %v3119_v3 }
 0x46f   : > { %v3113_v57 = vpop.f32.mrf.mxu0  ;;  %v3130_v35 = vadd.f32 %v7314_v53, %v3121_v24 }
 0x470   : > { %v3145_v14 = vsel %vm3132_vm9, %v7416_v51, -inf  ;;  %v3073_v30 = vpop.f32.mrf.mxu2 }
 0x471   : > { %3146 = vmax.xlane.f32.xlu1 %v3145_v14  ;;  %v3120_v23 = vadd.f32 %v3073_v30, %v2997_v26  ;;  %v3151_v18 = vsel %vm3132_vm9, %v3130_v35, -inf }
 0x473   : > { %v3056_v19 = vpop.f32.mrf.mxu1  ;;  %v3129_v38 = vadd.f32 %v7314_v53, %v3120_v23  ;;  %v7435_v53 = vadd.f32 %v5629_v36, %v7188_v12  ;;  %v7444_v12 = vpop.eup %5640 }
 0x474   : > { %v3094_v33 = vpop.f32.mrf.mxu3  ;;  %v3184_v17 = vsel %vm3132_vm9, %v7444_v12, 0.0  ;;  %v7448_v60 = vpop.eup %5642 }
 0x475   : > { %v3148_v43 = vsel %vm3132_vm9, %v3129_v38, -inf  ;;  %3152 = vmax.xlane.f32.xlu0 %v3151_v18  ;;  %v5605_v5 = vpack.i.bf16 %v7432_v54, %v7435_v53  ;;  %v3181_v63 = vsel %vm3132_vm9, %v7448_v60, 0.0 }
 0x476   : > { %3149 = vmax.xlane.f32.xlu2 %v3148_v43 }
 0x478   : > { %v3075_v16 = vpop.f32.mrf.mxu2 }
 0x479   : > { %3140 = vmax.xlane.f32.xlu1 %v3139_v1  ;;  %v2584_v1 = vrot.slane %v7435_v53, 4  ;;  %v2640_v16 = vrot.slane %v7432_v54, 4 }
 0x489   : > { %5606 = vrot.lane.b32.xlu0 %v5605_v5, %s6262_s21 }
 0x48e   : > { %5596 = vrot.lane.b32.xlu2 %v5605_v5, %s6258_s18 }
 0x492   : > { %5601 = vrot.lane.b32.xlu1 %v5605_v5, %s6257_s11 }
 0x4b3   : > { %3185 = vadd.xlane.f32.xlu0 %v3184_v17 }
 0x4bc   : > { %3182 = vadd.xlane.f32.xlu1 %v3181_v63 }
 0x4e0   : > { %v3156_v61 = vpop.xlane.xlu0 %3155 }
 0x4e1   : > { %v3164_v37 = vsub.f32 %v3131_v31, %v3156_v61 }
 0x4e3   : > { %v3179_v29 = vmul.f32 1.442695, %v3164_v37 }
 0x4e4   : > { %v3147_v47 = vpop.xlane.xlu1 %3146 }
 0x4e5   : > { %v3161_v2 = vsub.f32 %v7416_v51, %v3147_v47 }
 0x4e7   : > { %v3173_v56 = vmul.f32 1.442695, %v3161_v2 }
 0x4e8   : > { %v3153_v8 = vpop.xlane.xlu0 %3152 }
 0x4e9   : > { %v3150_v9 = vpop.xlane.xlu2 %3149  ;;  %v3163_v59 = vsub.f32 %v3130_v35, %v3153_v8 }
 0x4ea   : > { %v3162_v62 = vsub.f32 %v3129_v38, %v3150_v9 }
 0x4eb   : > { %v3177_v42 = vmul.f32 1.442695, %v3163_v59 }
 0x4ec   : > { %v3175_v39 = vmul.f32 1.442695, %v3162_v62  ;;  %v3141_v13 = vpop.xlane.xlu1 %3140 }
 0x4ed   : > { %v3159_v4 = vsub.f32 %v3126_v41, %v3141_v13  ;;  %5644 = vpow2.f32 %v3177_v42 }
 0x4ee   : > { %5646 = vpow2.f32 %v3175_v39 }
 0x4ef   : > { %v3169_v0 = vmul.f32 1.442695, %v3159_v4 }
 0x4f1   : > { %5648 = vpow2.f32 %v3169_v0  ;;  %v5597_v27 = vpop.permute.xlu2 %5596 }
 0x4f2   : > { %5650 = vpow2.f32 %v3179_v29  ;;  %v5599_v20 = vunpack.i.h.bf16 %v5597_v27  ;;  %v5598_v31 = vunpack.i.l.bf16 %v5597_v27 }
 0x4f3   : > { %v7453_v22 = vpop.eup %5644  ;;  %5652 = vpow2.f32 %v3171_v28 }
 0x4f4   : > { %v7455_v21 = vpop.eup %5646  ;;  %v3199_v45 = vsel %vm3132_vm9, %v7453_v22, 0.0  ;;  %5654 = vpow2.f32 %v3173_v56  ;;  %v2652_v14 = vrot.slane %v5599_v20, 4  ;;  %v2596_v30 = vrot.slane %v5598_v31, 4 }
 0x4f5   : > { %v3196_v26 = vsel %vm3132_vm9, %v7455_v21, 0.0  ;;  %3200 = vadd.xlane.f32.xlu0 %v3199_v45 }
 0x4f6   : > { %3197 = vadd.xlane.f32.xlu1 %v3196_v26 }
 0x4f7   : > { %v7462_v58 = vpop.eup %5648 }
 0x4f8   : > { %v3187_v44 = vsel %vm3132_vm9, %v7462_v58, 0.0  ;;  %v7466_v34 = vpop.eup %5650 }
 0x4f9   : > { %3188 = vadd.xlane.f32.xlu2 %v3187_v44  ;;  %v3202_v40 = vsel %vm3132_vm9, %v7466_v34, 0.0  ;;  %v7470_v24 = vpop.eup %5652 }
 0x4fa   : > { %v3190_v35 = vsel %vm3132_vm9, %v7470_v24, 0.0  ;;  %v7478_v41 = vpop.eup %5654 }
 0x4fb   : > { %v5607_v15 = vpop.permute.xlu0 %5606  ;;  %v3193_v25 = vsel %vm3132_vm9, %v7478_v41, 0.0 }
 0x4fc   : > { %v5609_v3 = vunpack.i.h.bf16 %v5607_v15  ;;  %v5608_v32 = vunpack.i.l.bf16 %v5607_v15 }
 0x4fd   : > { %3203 = vadd.xlane.f32.xlu0 %v3202_v40 }
 0x4fe   : > { %v2650_v51 = vrot.slane %v5609_v3, 4  ;;  %v2594_v57 = vrot.slane %v5608_v32, 4  ;;  %v2653_v23 = vsel %vm1580_vm7, %v5609_v3, %v2652_v14  ;;  %v2597_v19 = vsel %vm1580_vm7, %v5608_v32, %v2596_v30 }
 0x4ff   : > { %v2661_v18 = vperm.slane %v2653_v23, %v6762_v46  ;;  %v2605_v43 = vperm.slane %v2597_v19, %v6762_v46 }
 0x500   : > { %v2651_v38 = vsel %vm1580_vm7, %v2650_v51, %v5599_v20  ;;  %v2595_v33 = vsel %vm1580_vm7, %v2594_v57, %v5598_v31 }
 0x501   : > { %3191 = vadd.xlane.f32.xlu2 %v3190_v35  ;;  %v2657_v5 = vperm.slane %v2651_v38, %v6762_v46  ;;  %v2601_v11 = vperm.slane %v2595_v33, %v6762_v46  ;;  %v2674_v7 = vrot.slane %v2661_v18, 4  ;;  %v2618_v61 = vrot.slane %v2605_v43, 4 }
 0x503   : > { %v2662_v9 = vrot.slane %v2657_v5, 4  ;;  %v2606_v59 = vrot.slane %v2601_v11, 4 }
 0x504   : > { %v5602_v36 = vpop.permute.xlu1 %5601 }
 0x505   : > { %v5604_v48 = vunpack.i.h.bf16 %v5602_v36  ;;  %v5603_v50 = vunpack.i.l.bf16 %v5602_v36 }
 0x507   : > { %v2638_v52 = vrot.slane %v5604_v48, 4  ;;  %v2641_v55 = vsel %vm1580_vm7, %v5604_v48, %v2640_v16  ;;  %v2582_v17 = vrot.slane %v5603_v50, 4  ;;  %v2585_v63 = vsel %vm1580_vm7, %v5603_v50, %v2584_v1 }
 0x508   : > { %v2649_v47 = vperm.slane %v2641_v55, %v6762_v46  ;;  %v2593_v8 = vperm.slane %v2585_v63, %v6762_v46 }
 0x509   : > { %v2639_v62 = vsel %vm1580_vm7, %v2638_v52, %v7432_v54  ;;  %v2583_v37 = vsel %vm1580_vm7, %v2582_v17, %v7435_v53  ;;  %3194 = vadd.xlane.f32.xlu2 %v3193_v25 }
 0x50a   : > { %v2645_v42 = vperm.slane %v2639_v62, %v6762_v46  ;;  %v2676_v39 = vrot.slane %v2649_v47, 4  ;;  %v2589_v13 = vperm.slane %v2583_v37, %v6762_v46  ;;  %v2619_v4 = vsel %vm1580_vm7, %v2618_v61, %v2593_v8 }
 0x50b   : > { %v2620_v6 = vrot.slane %v2593_v8, 4  ;;  %v2625_v29 = vperm.slane %v2619_v4, %v6764_v49  ;;  %v2675_v0 = vsel %vm1580_vm7, %v2674_v7, %v2649_v47 }
 0x50c   : > { %v2664_v28 = vrot.slane %v2645_v42, 4  ;;  %v2607_v45 = vsel %vm1580_vm7, %v2606_v59, %v2589_v13  ;;  %v2608_v54 = vrot.slane %v2589_v13, 4  ;;  %v2663_v2 = vsel %vm1580_vm7, %v2662_v9, %v2645_v42 }
 0x50d   : > { %v2613_v53 = vperm.slane %v2607_v45, %v6764_v49  ;;  %v2621_v26 = vsel %vm1580_vm7, %v2605_v43, %v2620_v6  ;;  %v2634_v27 = vrot.slane %v2625_v29, 4  ;;  %v2669_v44 = vperm.slane %v2663_v2, %v6764_v49 }
 0x50e   : > { %v2609_v56 = vsel %vm1580_vm7, %v2601_v11, %v2608_v54  ;;  %v2629_v20 = vperm.slane %v2621_v26, %v6764_v49  ;;  %v2665_v31 = vsel %vm1580_vm7, %v2657_v5, %v2664_v28  ;;  %v2677_v15 = vsel %vm1580_vm7, %v2661_v18, %v2676_v39 }
 0x50f   : > { %v2617_v3 = vperm.slane %v2609_v56, %v6764_v49  ;;  %v2630_v32 = vrot.slane %v2613_v53, 4  ;;  %v2673_v40 = vperm.slane %v2665_v31, %v6764_v49  ;;  %v2681_v57 = vperm.slane %v2675_v0, %v6764_v49 }
 0x510   : > { %v2636_v51 = vrot.slane %v2629_v20, 4  ;;  %v2685_v14 = vperm.slane %v2677_v15, %v6764_v49  ;;  %v2686_v30 = vrot.slane %v2669_v44, 4  ;;  %v2635_v19 = vsel %vm1580_vm7, 0.0, %v2634_v27 }
 0x511   : > { %v2631_v35 = vsel %vm1580_vm7, 0.0, %v2630_v32  ;;  %v2632_v23 = vrot.slane %v2617_v3, 4  ;;  %v2688_v38 = vrot.slane %v2673_v40, 4  ;;  %v2690_v43 = vrot.slane %v2681_v57, 4 }
 0x512   : > { %v2637_v33 = vsel %vm1580_vm7, 0.0, %v2636_v51  ;;  %v2687_v18 = vsel %vm1580_vm7, 0.0, %v2686_v30  ;;  %v2692_v1 = vrot.slane %v2685_v14, 4  ;;  %v2705_v5 = vsel %vm1580_vm7, %v2636_v51, %v2625_v29 }
 0x513   : > { %v2633_v16 = vsel %vm1580_vm7, 0.0, %v2632_v23  ;;  %v2689_v36 = vsel %vm1580_vm7, 0.0, %v2688_v38  ;;  %v2710_v11 = vrot.slane %v2637_v33, 4  ;;  %v2691_v48 = vsel %vm1580_vm7, 0.0, %v2690_v43 }
 0x514   : > { %v2693_v50 = vsel %vm1580_vm7, 0.0, %v2692_v1  ;;  %v2699_v25 = vrot.slane %v2633_v16, 4  ;;  %v2709_v52 = vperm.slane %v2705_v5, %v6762_v46  ;;  %v2753_v55 = vrot.slane %v2689_v36, 4 }
 0x515   : > { %v2759_v17 = vsel %vm1580_vm7, %v2692_v1, %v2681_v57  ;;  %v2764_v63 = vrot.slane %v2693_v50, 4  ;;  %v2694_v7 = vsel %vm1580_vm7, %v2632_v23, %v2613_v53  ;;  %v2711_v9 = vsel %vm1580_vm7, %v2710_v11, %v2635_v19 }
 0x516   : > { %v2763_v61 = vperm.slane %v2759_v17, %v6762_v46  ;;  %v2698_v47 = vperm.slane %v2694_v7, %v6762_v46  ;;  %v2700_v8 = vsel %vm1580_vm7, %v2699_v25, %v2631_v35  ;;  %v2715_v62 = vperm.slane %v2711_v9, %v6762_v46 }
 0x517   : > { %v2704_v59 = vperm.slane %v2700_v8, %v6762_v46  ;;  %v2730_v37 = vrot.slane %v2709_v52, 4  ;;  %v2748_v42 = vsel %vm1580_vm7, %v2688_v38, %v2669_v44  ;;  %v2754_v4 = vsel %vm1580_vm7, %v2753_v55, %v2687_v18 }
 0x518   : > { %v2718_v39 = vrot.slane %v2698_v47, 4  ;;  %v2752_v13 = vperm.slane %v2748_v42, %v6762_v46  ;;  %v2765_v6 = vsel %vm1580_vm7, %v2764_v63, %v2691_v48  ;;  %v2758_v0 = vperm.slane %v2754_v4, %v6762_v46 }
 0x519   : > { %v2731_v29 = vsel %vm1580_vm7, %v2715_v62, %v2730_v37  ;;  %v2769_v28 = vperm.slane %v2765_v6, %v6762_v46  ;;  %v2784_v45 = vrot.slane %v2763_v61, 4  ;;  %v2716_v26 = vrot.slane %v2704_v59, 4 }
 0x51a   : > { %v2719_v54 = vsel %vm1580_vm7, %v2704_v59, %v2718_v39  ;;  %v2739_v2 = vperm.slane %v2731_v29, %v6764_v49  ;;  %v2772_v53 = vrot.slane %v2752_v13, 4  ;;  %v2728_v56 = vrot.slane %v2715_v62, 4 }
 0x51b   : > { %v2727_v27 = vperm.slane %v2719_v54, %v6764_v49  ;;  %v2785_v44 = vsel %vm1580_vm7, %v2769_v28, %v2784_v45  ;;  %v2770_v20 = vrot.slane %v2758_v0, 4  ;;  %v2717_v32 = vsel %vm1580_vm7, %v2716_v26, %v2698_v47 }
 0x51c   : > { %v2744_v31 = vrot.slane %v2739_v2, 4  ;;  %v2773_v15 = vsel %vm1580_vm7, %v2758_v0, %v2772_v53  ;;  %v2793_v3 = vperm.slane %v2785_v44, %v6764_v49  ;;  %v2723_v51 = vperm.slane %v2717_v32, %v6764_v49 }
 0x51d   : > { %v2781_v40 = vperm.slane %v2773_v15, %v6764_v49  ;;  %v2729_v57 = vsel %vm1580_vm7, %v2728_v56, %v2709_v52  ;;  %v2746_v14 = vrot.slane %v2727_v27, 4  ;;  %v2771_v19 = vsel %vm1580_vm7, %v2770_v20, %v2752_v13 }
 0x51e   : > { %v2745_v30 = vsel %vm1580_vm7, %v2744_v31, %v2727_v27  ;;  %v2798_v35 = vrot.slane %v2793_v3, 4  ;;  %v2735_v23 = vperm.slane %v2729_v57, %v6764_v49  ;;  %v2777_v18 = vperm.slane %v2771_v19, %v6764_v49 }
 0x51f   : > { %v2804_v38 = vpack.c.bf16 %v2745_v30, %v2745_v30  ;;  %v2747_v33 = vsel %vm1580_vm7, %v2739_v2, %v2746_v14  ;;  %v2782_v43 = vrot.slane %v2769_v28, 4  ;;  %v2800_v5 = vrot.slane %v2781_v40, 4 }
 0x520   : > { %v2799_v1 = vsel %vm1580_vm7, %v2798_v35, %v2781_v40  ;;  %v2740_v16 = vrot.slane %v2735_v23, 4  ;;  %v2805_v36 = vpack.c.bf16 %v2747_v33, %v2747_v33  ;;  %v2742_v25 = vrot.slane %v2723_v51, 4 }
 0x521   : > { %v3272_v11 = vsel %vm3232_vm10, %v2804_v38, 0  ;;  %v2808_v48 = vpack.c.bf16 %v2799_v1, %v2799_v1  ;;  %v2783_v50 = vsel %vm1580_vm7, %v2782_v43, %v2763_v61  ;;  %v2801_v63 = vsel %vm1580_vm7, %v2793_v3, %v2800_v5 }
 0x522   : > { %3281 = vmatpush.bf16.msra.mxu3 %v3272_v11  ;;  %v2741_v52 = vsel %vm1580_vm7, %v2740_v16, %v2723_v51  ;;  %v3291_v55 = vsel %vm3232_vm10, %v2805_v36, 0  ;;  %v2789_v17 = vperm.slane %v2783_v50, %v6764_v49  ;;  %v2809_v8 = vpack.c.bf16 %v2801_v63, %v2801_v63 }
 0x523   : > { %v3348_v7 = vsel %vm3232_vm10, %v2808_v48, 0  ;;  %v2802_v47 = vpack.c.bf16 %v2741_v52, %v2741_v52  ;;  %3300 = vmatpush.bf16.msrb.mxu0 %v3291_v55  ;;  %v2743_v9 = vsel %vm1580_vm7, %v2735_v23, %v2742_v25  ;;  %v2796_v62 = vrot.slane %v2777_v18, 4 }
 0x524   : > { %v2794_v59 = vrot.slane %v2789_v17, 4  ;;  %v2803_v61 = vpack.c.bf16 %v2743_v9, %v2743_v9  ;;  %v3367_v42 = vsel %vm3232_vm10, %v2809_v8, 0 }
 0x525   : > { %v3234_v37 = vsel %vm3232_vm10, %v2802_v47, 0  ;;  %v2797_v4 = vsel %vm1580_vm7, %v2789_v17, %v2796_v62 }
 0x526   : > { %3357 = vmatpush.bf16.msrb.mxu3 %v3348_v7  ;;  %3243 = vmatpush.bf16.msrb.mxu1 %v3234_v37  ;;  %v2795_v39 = vsel %vm1580_vm7, %v2794_v59, %v2777_v18  ;;  %v3253_v13 = vsel %vm3232_vm10, %v2803_v61, 0  ;;  %v3186_v6 = vpop.xlane.xlu0 %3185  ;;  %v2807_v0 = vpack.c.bf16 %v2797_v4, %v2797_v4 }
 0x527   : > { %3376 = vmatpush.bf16.msra.mxu0 %v3367_v42  ;;  %v2806_v29 = vpack.c.bf16 %v2795_v39, %v2795_v39  ;;  %3262 = vmatpush.bf16.msrb.mxu2 %v3253_v13  ;;  %5656 = vrcp.f32 %v3186_v6 }
 0x528   : > { %v3329_v45 = vsel %vm3232_vm10, %v2807_v0, 0 }
 0x529   : > { %v3310_v28 = vsel %vm3232_vm10, %v2806_v29, 0 }
 0x52a   : > { %3319 = vmatpush.bf16.msra.mxu1 %v3310_v28 }
 0x52b   : > { %3338 = vmatpush.bf16.msra.mxu2 %v3329_v45 }
 0x52d   : > { %v5657_v54 = vpop.eup %5656 }
 0x52e   : > { %v3214_v2 = vmul.f32 %v5657_v54, %v7444_v12 }
 0x52f   : > { %v3183_v53 = vpop.xlane.xlu1 %3182 }
 0x530   : > { %v3222_v26 = vpack.c.bf16 %v3214_v2, %v3214_v2  ;;  %5658 = vrcp.f32 %v3183_v53 }
 0x532   : > { %4982 = vmatmul.msk.bf16.vlgmr.msrb.gmra.mxu2 %vm3132_vm9, %v3222_v26 }
 0x536   : > { %v5659_v27 = vpop.eup %5658 }
 0x537   : > { %v3213_v44 = vmul.f32 %v5659_v27, %v7448_v60 }
 0x539   : > { %v3221_v56 = vpack.c.bf16 %v3213_v44, %v3213_v44 }
 0x53b   : > { %4981 = vmatmul.msk.bf16.vlgmr.msrb.gmra.mxu1 %vm3132_vm9, %v3221_v56 }
 0x568   : > { %v3201_v51 = vpop.xlane.xlu0 %3200 }
 0x569   : > { %v3198_v20 = vpop.xlane.xlu1 %3197 }
 0x56a   : > { %5660 = vrcp.f32 %v3198_v20 }
 0x56c   : > { %v3189_v31 = vpop.xlane.xlu2 %3188 }
 0x56d   : > { %5662 = vrcp.f32 %v3189_v31 }
 0x570   : > { %v5661_v15 = vpop.eup %5660 }
 0x571   : > { %v3218_v3 = vmul.f32 %v5661_v15, %v7455_v21  ;;  %v3204_v21 = vpop.xlane.xlu0 %3203 }
 0x573   : > { %v5663_v32 = vpop.eup %5662  ;;  %v3226_v12 = vpack.c.bf16 %v3218_v3, %v3218_v3 }
 0x574   : > { %v3215_v40 = vmul.f32 %v5663_v32, %v7462_v58  ;;  %v3192_v57 = vpop.xlane.xlu2 %3191 }
 0x575   : > { %5664 = vrcp.f32 %v3192_v57  ;;  %4986 = vmatmul.msk.bf16.vlgmr.msra.gmra.mxu2 %vm3132_vm9, %v3226_v12 }
 0x576   : > { %v3223_v60 = vpack.c.bf16 %v3215_v40, %v3215_v40  ;;  %5666 = vrcp.f32 %v3201_v51 }
 0x578   : > { %4983 = vmatmul.msk.bf16.vlgmr.msra.gmra.mxu3 %vm3132_vm9, %v3223_v60 }
 0x57b   : > { %v5665_v14 = vpop.eup %5664 }
 0x57c   : > { %v3216_v30 = vmul.f32 %v5665_v14, %v7470_v24  ;;  %v3195_v35 = vpop.xlane.xlu2 %3194  ;;  %v5667_v19 = vpop.eup %5666 }
 0x57d   : > { %5668 = vrcp.f32 %v3195_v35  ;;  %v3219_v58 = vmul.f32 %v5667_v19, %v7453_v22 }
 0x57e   : > { %v3224_v23 = vpack.c.bf16 %v3216_v30, %v3216_v30  ;;  %5670 = vrcp.f32 %v3204_v21 }
 0x57f   : > { %v3227_v18 = vpack.c.bf16 %v3219_v58, %v3219_v58 }
 0x580   : > { %4984 = vmatmul.msk.bf16.vlgmr.msrb.gmra.mxu0 %vm3132_vm9, %v3224_v23 }
 0x583   : > { %v5669_v38 = vpop.eup %5668 }
 0x584   : > { %v3217_v33 = vmul.f32 %v5669_v38, %v7478_v41  ;;  %v5671_v1 = vpop.eup %5670 }
 0x585   : > { %v3220_v24 = vmul.f32 %v5671_v1, %v7466_v34 }
 0x586   : > { %v3225_v43 = vpack.c.bf16 %v3217_v33, %v3217_v33 }
 0x587   : > { %v3228_v16 = vpack.c.bf16 %v3220_v24, %v3220_v24 }
 0x588   : > { %4985 = vmatmul.msk.bf16.vlgmr.msra.gmra.mxu1 %vm3132_vm9, %v3225_v43  ;;  %4987 = vmatmul.msk.bf16.vlgmr.msrb.gmra.mxu3 %vm3132_vm9, %v3227_v18 }
 0x590   : > { %4988 = vmatmul.msk.bf16.vlgmr.msra.gmra.mxu0 %vm3132_vm9, %v3228_v16 }
 0x5b5   : > { %v3264_v36 = vpop.f32.mrf.mxu2 }
 0x5b6   : > { %v3396_v25 = vrot.slane %v3264_v36, 4 }
 0x5b8   : > { %v3245_v5 = vpop.f32.mrf.mxu1 }
 0x5b9   : > { %v3384_v50 = vrot.slane %v3245_v5, 4 }
 0x5bd   : > { %v3266_v11 = vpop.f32.mrf.mxu2 }
 0x5c0   : > { %v3247_v48 = vpop.f32.mrf.mxu1 }
 0x5f8   : > { %v7586_v22 = vpop.f32.mrf.mxu2 }
 0x5f9   : > { %v3452_v21 = vrot.slane %v7586_v22, 4 }
 0x5fb   : > { %v3283_v41 = vpop.f32.mrf.mxu3 }
 0x5fc   : > { %v3382_v52 = vrot.slane %v3283_v41, 4  ;;  %v3385_v55 = vsel %vm1580_vm7, %v3283_v41, %v3384_v50 }
 0x5fd   : > { %v3393_v17 = vperm.slane %v3385_v55, %v6762_v46  ;;  %v3302_v63 = vpop.f32.mrf.mxu0 }
 0x5fe   : > { %v3383_v34 = vsel %vm1580_vm7, %v3382_v52, %v3245_v5  ;;  %v3394_v7 = vrot.slane %v3302_v63, 4  ;;  %v3397_v47 = vsel %vm1580_vm7, %v3302_v63, %v3396_v25 }
 0x5ff   : > { %v3389_v8 = vperm.slane %v3383_v34, %v6762_v46  ;;  %v3420_v9 = vrot.slane %v3393_v17, 4  ;;  %v3405_v59 = vperm.slane %v3397_v47, %v6762_v46 }
 0x600   : > { %v3395_v61 = vsel %vm1580_vm7, %v3394_v7, %v3264_v36  ;;  %v3342_v62 = vpop.f32.mrf.mxu2 }
 0x601   : > { %v3408_v37 = vrot.slane %v3389_v8, 4  ;;  %v3401_v42 = vperm.slane %v3395_v61, %v6762_v46  ;;  %v3418_v39 = vrot.slane %v3405_v59, 4  ;;  %v3421_v13 = vsel %vm1580_vm7, %v3405_v59, %v3420_v9 }
 0x602   : > { %v3429_v4 = vperm.slane %v3421_v13, %v6764_v49 }
 0x603   : > { %v3406_v6 = vrot.slane %v3401_v42, 4  ;;  %v3409_v29 = vsel %vm1580_vm7, %v3401_v42, %v3408_v37  ;;  %v3419_v0 = vsel %vm1580_vm7, %v3418_v39, %v3393_v17  ;;  %v3285_v28 = vpop.f32.mrf.mxu3 }
 0x604   : > { %v3417_v45 = vperm.slane %v3409_v29, %v6764_v49  ;;  %v3425_v54 = vperm.slane %v3419_v0, %v6764_v49  ;;  %v3436_v2 = vrot.slane %v3429_v4, 4 }
 0x605   : > { %v3407_v53 = vsel %vm1580_vm7, %v3406_v6, %v3389_v8  ;;  %v3304_v26 = vpop.f32.mrf.mxu0  ;;  %v3321_v27 = vpop.f32.mrf.mxu1 }
 0x606   : > { %v3413_v44 = vperm.slane %v3407_v53, %v6764_v49  ;;  %v3432_v56 = vrot.slane %v3417_v45, 4  ;;  %v3434_v20 = vrot.slane %v3425_v54, 4  ;;  %v3437_v31 = vsel %vm1580_vm7, 0.0, %v3436_v2 }
 0x607   : > { %v3510_v15 = vrot.slane %v3437_v31, 4  ;;  %v3505_v57 = vsel %vm1580_vm7, %v3436_v2, %v3425_v54  ;;  %v3440_v35 = vrot.slane %v3321_v27, 4 }
 0x608   : > { %v3430_v3 = vrot.slane %v3413_v44, 4  ;;  %v3433_v32 = vsel %vm1580_vm7, 0.0, %v3432_v56  ;;  %v3435_v12 = vsel %vm1580_vm7, 0.0, %v3434_v20  ;;  %v3494_v40 = vsel %vm1580_vm7, %v3432_v56, %v3413_v44 }
 0x609   : > { %v3499_v51 = vrot.slane %v3433_v32, 4  ;;  %v3511_v60 = vsel %vm1580_vm7, %v3510_v15, %v3435_v12  ;;  %v3498_v14 = vperm.slane %v3494_v40, %v6762_v46  ;;  %v3509_v38 = vperm.slane %v3505_v57, %v6762_v46 }
 0x60a   : > { %v3515_v30 = vperm.slane %v3511_v60, %v6762_v46  ;;  %v3431_v23 = vsel %vm1580_vm7, 0.0, %v3430_v3 }
 0x60b   : > { %v3359_v19 = vpop.f32.mrf.mxu3  ;;  %v3500_v58 = vsel %vm1580_vm7, %v3499_v51, %v3431_v23  ;;  %v3518_v36 = vrot.slane %v3498_v14, 4  ;;  %v3530_v55 = vrot.slane %v3509_v38, 4 }
 0x60c   : > { %v3438_v33 = vrot.slane %v3359_v19, 4  ;;  %v3441_v18 = vsel %vm1580_vm7, %v3359_v19, %v3440_v35  ;;  %v3504_v43 = vperm.slane %v3500_v58, %v6762_v46  ;;  %v3528_v50 = vrot.slane %v3515_v30, 4 }
 0x60d   : > { %v3449_v1 = vperm.slane %v3441_v18, %v6762_v46  ;;  %v3323_v24 = vpop.f32.mrf.mxu1  ;;  %v3378_v16 = vpop.f32.mrf.mxu0  ;;  %v3531_v29 = vsel %vm1580_vm7, %v3515_v30, %v3530_v55 }
 0x60e   : > { %v3439_v5 = vsel %vm1580_vm7, %v3438_v33, %v3321_v27  ;;  %v3450_v11 = vrot.slane %v3378_v16, 4  ;;  %v3453_v48 = vsel %vm1580_vm7, %v3378_v16, %v3452_v21  ;;  %v3516_v63 = vrot.slane %v3504_v43, 4 }
 0x60f   : > { %v3445_v41 = vperm.slane %v3439_v5, %v6762_v46  ;;  %v3476_v25 = vrot.slane %v3449_v1, 4  ;;  %v3461_v52 = vperm.slane %v3453_v48, %v6762_v46  ;;  %v3519_v59 = vsel %vm1580_vm7, %v3504_v43, %v3518_v36 }
 0x610   : > { %v3451_v17 = vsel %vm1580_vm7, %v3450_v11, %v7586_v22  ;;  %v3517_v61 = vsel %vm1580_vm7, %v3516_v63, %v3498_v14  ;;  %v3529_v62 = vsel %vm1580_vm7, %v3528_v50, %v3509_v38  ;;  %v3527_v45 = vperm.slane %v3519_v59, %v6764_v49 }
 0x611   : > { %v3464_v34 = vrot.slane %v3445_v41, 4  ;;  %v3457_v7 = vperm.slane %v3451_v17, %v6762_v46  ;;  %v3474_v47 = vrot.slane %v3461_v52, 4  ;;  %v3477_v8 = vsel %vm1580_vm7, %v3461_v52, %v3476_v25 }
 0x612   : > { %v3485_v9 = vperm.slane %v3477_v8, %v6764_v49  ;;  %v3523_v54 = vperm.slane %v3517_v61, %v6764_v49  ;;  %v3535_v2 = vperm.slane %v3529_v62, %v6764_v49  ;;  %v3539_v31 = vperm.slane %v3531_v29, %v6764_v49  ;;  %v5312_v29 = vld [vmem:[%s6649_s25] sm:$0xff] }
 0x613   : > { %v3462_v37 = vrot.slane %v3457_v7, 4  ;;  %v3465_v42 = vsel %vm1580_vm7, %v3457_v7, %v3464_v34  ;;  %v3475_v22 = vsel %vm1580_vm7, %v3474_v47, %v3449_v1  ;;  %v3361_v39 = vpop.f32.mrf.mxu3  ;;  %v3546_v1 = vrot.slane %v3527_v45, 4 }
 0x614   : > { %v3473_v13 = vperm.slane %v3465_v42, %v6764_v49  ;;  %v3481_v4 = vperm.slane %v3475_v22, %v6764_v49  ;;  %v3492_v6 = vrot.slane %v3485_v9, 4  ;;  %v3540_v15 = vrot.slane %v3535_v2, 4  ;;  %v5318_v42 = vld [vmem:[%s6649_s25 + $0x30] sm:$0xff]  ;;  %v5317_v22 = vld [vmem:[%s6649_s25 + $0x28] sm:$0xff]  ;;  %v5316_v39 = vld [vmem:[%s6649_s25 + $0x20] sm:$0xff] }
 0x615   : > { %v3463_v0 = vsel %vm1580_vm7, %v3462_v37, %v3445_v41  ;;  %v3380_v28 = vpop.f32.mrf.mxu0  ;;  %v3544_v18 = vrot.slane %v3539_v31, 4  ;;  %v3542_v25 = vrot.slane %v3523_v54, 4  ;;  %v3547_v34 = vsel %vm1580_vm7, %v3539_v31, %v3546_v1  ;;  %v5319_v37 = vld [vmem:[%s6649_s25 + $0x38] sm:$0xff] }
 0x616   : > { %v3469_v53 = vperm.slane %v3463_v0, %v6764_v49  ;;  %v3488_v26 = vrot.slane %v3473_v13, 4  ;;  %v3490_v27 = vrot.slane %v3481_v4, 4  ;;  %v3493_v44 = vsel %vm1580_vm7, 0.0, %v3492_v6  ;;  %3704 = vmatpush.bf16.msrb.mxu1 %v5319_v37  ;;  %v5315_v13 = vld [vmem:[%s6649_s25 + $0x18] sm:$0xff]  ;;  %v5129_v37 = vld [vmem:[%s6653_s6 + $0xd8] sm:$0xf0] }
 0x617   : > { %v3559_v56 = vsel %vm1580_vm7, %v3492_v6, %v3481_v4  ;;  %v3564_v20 = vrot.slane %v3493_v44, 4  ;;  %v7653_v23 = vsel %vm1580_vm7, %v3540_v15, %v3523_v54  ;;  %v3545_v17 = vsel %vm1580_vm7, %v3544_v18, %v3527_v45  ;;  %v5314_v4 = vld [vmem:[%s6649_s25 + $0x10] sm:$0xff]  ;;  %v5313_v6 = vld [vmem:[%s6649_s25 + $0x8] sm:$0xff] }
 0x618   : > { %v3486_v3 = vrot.slane %v3469_v53, 4  ;;  %v3489_v32 = vsel %vm1580_vm7, 0.0, %v3488_v26  ;;  %v3491_v12 = vsel %vm1580_vm7, 0.0, %v3490_v27  ;;  %v3548_v40 = vsel %vm1580_vm7, %v3488_v26, %v3469_v53 }
 0x619   : > { %v3553_v51 = vrot.slane %v3489_v32, 4  ;;  %v3563_v57 = vperm.slane %v3559_v56, %v6762_v46  ;;  %v3565_v60 = vsel %vm1580_vm7, %v3564_v20, %v3491_v12  ;;  %v3552_v14 = vperm.slane %v3548_v40, %v6762_v46  ;;  %v5630_v40 = vld [vmem:[%s1023_s14] ss:$0 sm:$0xff] }
 0x61a   : > { %v3569_v30 = vperm.slane %v3565_v60, %v6762_v46  ;;  %v3487_v35 = vsel %vm1580_vm7, 0.0, %v3486_v3  ;;  %3705 = vmatpush.bf16.msrb.mxu1 %v5318_v42  ;;  %v5692_v60 = vld [vmem:[#allocation2] sm:$0xff] }
 0x61b   : > { %v3584_v21 = vrot.slane %v3563_v57, 4  ;;  %v3554_v19 = vsel %vm1580_vm7, %v3553_v51, %v3487_v35  ;;  %v3572_v58 = vrot.slane %v3552_v14, 4 }
 0x61c   : > { %v3558_v38 = vperm.slane %v3554_v19, %v6762_v46  ;;  %v3582_v33 = vrot.slane %v3569_v30, 4 }
 0x61d   : > { %v3585_v43 = vsel %vm1580_vm7, %v3569_v30, %v3584_v21 }
 0x61e   : > { %v3573_v24 = vsel %vm1580_vm7, %v3558_v38, %v3572_v58  ;;  %v3593_v16 = vperm.slane %v3585_v43, %v6764_v49  ;;  %v3570_v36 = vrot.slane %v3558_v38, 4  ;;  %v3583_v5 = vsel %vm1580_vm7, %v3582_v33, %v3563_v57  ;;  %3706 = vmatpush.bf16.msrb.mxu1 %v5317_v22  ;;  %v5103_v22 = vld [vmem:[%s6653_s6 + $0xa0] sm:$0xf] }
 0x61f   : > { %v3581_v11 = vperm.slane %v3573_v24, %v6764_v49  ;;  %v3589_v48 = vperm.slane %v3583_v5, %v6764_v49  ;;  %v5348_v5 = vld [vmem:[%s6653_s6 + $0xe4] sm:$0xf] }
 0x620   : > { %v3598_v50 = vrot.slane %v3593_v16, 4  ;;  %v3571_v41 = vsel %vm1580_vm7, %v3570_v36, %v3552_v14  ;;  %v5350_v36 = vld [vmem:[%s6653_s6 + $0xec] sm:$0xf0] }
 0x621   : > { %v3600_v46 = vrot.slane %v3581_v11, 4  ;;  %v3577_v52 = vperm.slane %v3571_v41, %v6764_v49  ;;  %v3594_v55 = vrot.slane %v3589_v48, 4  ;;  %v3543_v49 = vsel %vm1580_vm7, %v3535_v2, %v3542_v25  ;;  %v5351_v41 = vld [vmem:[%s6653_s6 + $0xf4] sm:$0xf0] }
 0x622   : > { %v3599_v63 = vsel %vm1580_vm7, %v3598_v50, %v3581_v11  ;;  %3707 = vmatpush.bf16.msrb.mxu1 %v5316_v39  ;;  %v5143_v50 = vld [vmem:[%s6653_s6 + $0xe8] sm:$0xf]  ;;  %v5342_v39 = vld [vmem:[%s6653_s6 + $0xac] sm:$0xf0] }
 0x623   : > { %v5615_v7 = vpack.i.bf16 %v3599_v63, %v3545_v17  ;;  %v3601_v47 = vsel %vm1580_vm7, %v3593_v16, %v3600_v46  ;;  %v3596_v8 = vrot.slane %v3577_v52, 4  ;;  %v3595_v9 = vsel %vm1580_vm7, %v3594_v55, %v3577_v52  ;;  %v5135_v16 = vld [vmem:[%s6653_s6 + $0xe0] sm:$0xf]  ;;  %v5349_v52 = vld [vmem:[%s6653_s6 + $0xec] sm:$0xf] }
 0x624   : > { %v5620_v59 = vpack.i.bf16 %v3601_v47, %v3547_v34  ;;  %v5136_v11 = vor.u32 %v5350_v36, %v5135_v16  ;;  %v5144_v25 = vor.u32 %v5351_v41, %v5143_v50  ;;  %v5145_v55 = vld [vmem:[%s6653_s6 + $0xf8] sm:$0xf0]  ;;  %v5119_v63 = vld [vmem:[%s6653_s6 + $0xc0] sm:$0xf]  ;;  %v5346_v34 = vld [vmem:[%s6653_s6 + $0xcc] sm:$0xf0] }
 0x625   : > { %5616 = vrot.lane.b32.xlu2 %v5615_v7, %s6257_s11  ;;  %v3597_v61 = vsel %vm1580_vm7, %v3589_v48, %v3596_v8  ;;  %v5137_v48 = vld [vmem:[%s6653_s6 + $0xf0] sm:$0xf0]  ;;  %v5148_v17 = vor.u32 %v5349_v52, %v5145_v55  ;;  %v5344_v7 = vld [vmem:[%s6653_s6 + $0xc4] sm:$0xf]  ;;  %v5120_v47 = vor.u32 %v5346_v34, %v5119_v63  ;;  %v5330_v50 = vld [vmem:[%s6653_s6 + $0x4c] sm:$0xf0] }
 0x626   : > { %5621 = vrot.lane.b32.xlu0 %v5620_v59, %s6258_s18  ;;  %v5610_v62 = vpack.i.bf16 %v3597_v61, %v3543_v49  ;;  %3708 = vmatpush.bf16.msrb.mxu1 %v5315_v13  ;;  %v5140_v46 = vor.u32 %v5348_v5, %v5137_v48  ;;  %v5121_v8 = vld [vmem:[%s6653_s6 + $0xd0] sm:$0xf0]  ;;  %v5347_v59 = vld [vmem:[%s6653_s6 + $0xd4] sm:$0xf0]  ;;  %v5340_v13 = vld [vmem:[%s6653_s6 + $0xa4] sm:$0xf] }
 0x627   : > { %3975 = vmatpush.bf16.msrb.mxu2 %v5136_v11  ;;  %4003 = vmatpush.bf16.msrb.mxu0 %v5144_v25  ;;  %v5124_v49 = vor.u32 %v5344_v7, %v5121_v8  ;;  %v5081_v5 = vld [vmem:[%s6653_s6 + $0x78] sm:$0xf0]  ;;  %v5055_v11 = vld [vmem:[%s6653_s6 + $0x40] sm:$0xf]  ;;  %v5328_v41 = vld [vmem:[%s6653_s6 + $0x44] sm:$0xf] }
 0x628   : > { %5611 = vrot.lane.b32.xlu1 %v5610_v62, %s6262_s21  ;;  %3989 = vmatpush.bf16.msra.mxu3 %v5140_v46  ;;  %v5345_v62 = vld [vmem:[%s6653_s6 + $0xcc] sm:$0xf]  ;;  %v5057_v46 = vld [vmem:[%s6653_s6 + $0x50] sm:$0xf0]  ;;  %v5056_v25 = vor.u32 %v5330_v50, %v5055_v11  ;;  %v5063_v52 = vld [vmem:[%s6653_s6 + $0x48] sm:$0xf] }
 0x629   : > { %v5132_v42 = vor.u32 %v5345_v62, %v5129_v37  ;;  %v5331_v55 = vld [vmem:[%s6653_s6 + $0x54] sm:$0xf0]  ;;  %v5060_v63 = vor.u32 %v5328_v41, %v5057_v46  ;;  %v5065_v7 = vld [vmem:[%s6653_s6 + $0x58] sm:$0xf0]  ;;  %v5326_v8 = vld [vmem:[%s6653_s6 + $0x2c] sm:$0xf0] }
 0x62a   : > { %3709 = vmatpush.bf16.msrb.mxu1 %v5314_v4  ;;  %v5104_v4 = vor.u32 %v5342_v39, %v5103_v22  ;;  %v5064_v34 = vor.u32 %v5331_v55, %v5063_v52  ;;  %v5327_v37 = vld [vmem:[%s6653_s6 + $0x34] sm:$0xf0]  ;;  %v5049_v22 = vld [vmem:[%s6653_s6 + $0x38] sm:$0xf0]  ;;  %v5375_v41 = vld [vmem:[%s6657_s30 + $0xb8] sm:$0xff] }
 0x62b   : > { %3976 = vmatpush.bf16.msrb.mxu2 %v5120_v47  ;;  %v5039_v47 = vld [vmem:[%s6653_s6 + $0x20] sm:$0xf]  ;;  %v5374_v46 = vld [vmem:[%s6657_s30 + $0xb0] sm:$0xff] }
 0x62c   : > { %3990 = vmatpush.bf16.msra.mxu3 %v5124_v49  ;;  %v5041_v49 = vld [vmem:[%s6653_s6 + $0x30] sm:$0xf0]  ;;  %v5359_v52 = vld [vmem:[%s6657_s30 + $0x38] sm:$0xff] }
 0x62d   : > { %v5367_v55 = vld [vmem:[%s6657_s30 + $0x78] sm:$0xff] }
 0x62e   : > { %3710 = vmatpush.bf16.msrb.mxu1 %v5313_v6  ;;  %v5105_v6 = vld [vmem:[%s6653_s6 + $0xb0] sm:$0xf0] }
 0x62f   : > { %3977 = vmatpush.bf16.msrb.mxu2 %v5104_v4  ;;  %v5023_v4 = vld [vmem:[%s6653_s6] sm:$0xf] }
 0x632   : > { %3711 = vmatpush.bf16.msrb.mxu1 %v5312_v29  ;;  %v5111_v29 = vld [vmem:[%s6653_s6 + $0xa8] sm:$0xf] }
 0x636   : > { %4017 = vmatpush.bf16.msra.mxu1 %v5148_v17  ;;  %v5329_v17 = vld [vmem:[%s6653_s6 + $0x4c] sm:$0xf] }
 0x63a   : > { %4018 = vmatpush.bf16.msra.mxu1 %v5132_v42  ;;  %v5325_v42 = vld [vmem:[%s6653_s6 + $0x2c] sm:$0xf] }
 0x67f   : > { %v5617_v0 = vpop.permute.xlu2 %5616 }
 0x680   : > { %v5619_v53 = vunpack.i.h.bf16 %v5617_v0  ;;  %v5618_v26 = vunpack.i.l.bf16 %v5617_v0  ;;  %v5343_v0 = vld [vmem:[%s6653_s6 + $0xb4] sm:$0xf0] }
 0x698   : > { %v5622_v28 = vpop.permute.xlu0 %5621 }
 0x699   : > { %v5624_v27 = vunpack.i.h.bf16 %v5622_v28  ;;  %v5623_v44 = vunpack.i.l.bf16 %v5622_v28  ;;  %v5108_v28 = vor.u32 %v5340_v13, %v5105_v6  ;;  %v5040_v13 = vor.u32 %v5326_v8, %v5039_v47  ;;  %v5372_v47 = vld [vmem:[%s6657_s30 + $0xa0] sm:$0xff] }
 0x69a   : > { %v5612_v45 = vpop.permute.xlu1 %5611  ;;  %v5380_v8 = vld [vmem:[%s6657_s30 + $0xe0] sm:$0xff] }
 0x69b   : > { %v5614_v54 = vunpack.i.h.bf16 %v5612_v45  ;;  %v5613_v2 = vunpack.i.l.bf16 %v5612_v45  ;;  %v5112_v45 = vor.u32 %v5343_v0, %v5111_v29  ;;  %3991 = vmatpush.bf16.msra.mxu3 %v5108_v28  ;;  %v5322_v0 = vld [vmem:[%s6653_s6 + $0xc] sm:$0xf0]  ;;  %v5320_v28 = vld [vmem:[%s6653_s6 + $0x4] sm:$0xf] }
 0x69d   : > { %v3627_v56 = vsel %vm3626_vm11, %v7653_v23, %v5613_v2  ;;  %v3628_v20 = vsel %vm3626_vm11, %v3595_v9, %v5614_v54  ;;  %v5693_v23 = vld [vmem:[#allocation2 + $0x8] sm:$0xff]  ;;  %v5113_v2 = vld [vmem:[%s6653_s6 + $0xb8] sm:$0xf0] }
 0x69e   : > { %v3630_v31 = vsel %vm3629_vm12, %v3627_v56, %v5618_v26  ;;  %v3631_v15 = vsel %vm3629_vm12, %v3628_v20, %v5619_v53  ;;  %v5127_v9 = vld [vmem:[%s6653_s6 + $0xc8] sm:$0xf]  ;;  %v5341_v54 = vld [vmem:[%s6653_s6 + $0xac] sm:$0xf]  ;;  %v5087_v26 = vld [vmem:[%s6653_s6 + $0x80] sm:$0xf] }
 0x69f   : > { %v3633_v3 = vsel %vm3632_vm13, %v3630_v31, %v5623_v44  ;;  %v3634_v32 = vsel %vm3632_vm13, %v3631_v15, %v5624_v27  ;;  %v5128_v61 = vor.u32 %v5347_v59, %v5127_v9  ;;  %v5116_v53 = vor.u32 %v5341_v54, %v5113_v2  ;;  %v5338_v27 = vld [vmem:[%s6653_s6 + $0x8c] sm:$0xf0]  ;;  %v5336_v44 = vld [vmem:[%s6653_s6 + $0x84] sm:$0xf]  ;;  %v5089_v20 = vld [vmem:[%s6653_s6 + $0x90] sm:$0xf0] }
 0x6a0   : > { %v3635_v12 = vpack.c.bf16 %v3634_v32, %v3633_v3  ;;  %v5088_v56 = vor.u32 %v5338_v27, %v5087_v26  ;;  %v5095_v31 = vld [vmem:[%s6653_s6 + $0x88] sm:$0xf]  ;;  %v5339_v15 = vld [vmem:[%s6653_s6 + $0x94] sm:$0xf0]  ;;  %v5092_v32 = vor.u32 %v5336_v44, %v5089_v20  ;;  %v5068_v9 = vor.u32 %v5329_v17, %v5065_v7  ;;  %v5324_v59 = vld [vmem:[%s6653_s6 + $0x24] sm:$0xf] }
 0x6a1   : > { %4004 = vmatpush.bf16.msrb.mxu0 %v5128_v61  ;;  %4019 = vmatpush.bf16.msra.mxu1 %v5116_v53  ;;  %v5047_v61 = vld [vmem:[%s6653_s6 + $0x28] sm:$0xf]  ;;  %v5044_v6 = vor.u32 %v5324_v59, %v5041_v49  ;;  %v5052_v53 = vor.u32 %v5325_v42, %v5049_v22  ;;  %v5323_v27 = vld [vmem:[%s6653_s6 + $0x14] sm:$0xf0]  ;;  %v5033_v20 = vld [vmem:[%s6653_s6 + $0x18] sm:$0xf0] }
 0x6a2   : > { %3712 = vmatmul.bf16.vlgmr.msrb.gmra.mxu1 %v3635_v12  ;;  %v5096_v12 = vor.u32 %v5339_v15, %v5095_v31  ;;  %3978 = vmatpush.bf16.msrb.mxu2 %v5088_v56  ;;  %v5048_v29 = vor.u32 %v5327_v37, %v5047_v61  ;;  %v5031_v26 = vld [vmem:[%s6653_s6 + $0x8] sm:$0xf]  ;;  %v5321_v56 = vld [vmem:[%s6653_s6 + $0xc] sm:$0xf]  ;;  %v5024_v31 = vor.u32 %v5322_v0, %v5023_v4  ;;  %v5373_v17 = vld [vmem:[%s6657_s30 + $0xa8] sm:$0xff] }
 0x6a3   : > { %3992 = vmatpush.bf16.msra.mxu3 %v5092_v32  ;;  %v5032_v32 = vor.u32 %v5323_v27, %v5031_v26  ;;  %v5366_v7 = vld [vmem:[%s6657_s30 + $0x70] sm:$0xff]  ;;  %v7798_v59 = vld [vmem:[%s6655_s26] sm:$0xf]  ;;  %v5365_v49 = vld [vmem:[%s6657_s30 + $0x68] sm:$0xff] }
 0x6a4   : > { %v5371_v61 = vld [vmem:[%s6657_s30 + $0x98] sm:$0xff]  ;;  %v3809_v37 = vperm.slane %v7798_v59, 2  ;;  %v3810_v42 = vperm.slane %v7798_v59, 3  ;;  %v5356_v22 = vld [vmem:[%s6657_s30 + $0x20] sm:$0xff]  ;;  %v5378_v4 = vld [vmem:[%s6657_s30 + $0xd0] sm:$0xff] }
 0x6a5   : > { %4005 = vmatpush.bf16.msrb.mxu0 %v5112_v45  ;;  %v5025_v45 = vld [vmem:[%s6653_s6 + $0x10] sm:$0xf0] }
 0x6a9   : > { %4006 = vmatpush.bf16.msrb.mxu0 %v5096_v12  ;;  %v5036_v12 = vor.u32 %v5321_v56, %v5033_v20  ;;  %v5377_v56 = vld [vmem:[%s6657_s30 + $0xc8] sm:$0xff] }
 0x71f   : > { %v3713_v51 = vpop.f32.mrf.mxu1 }
 0x720   : > { %v3714_v57 = vadd.f32 %v5630_v40, %v3713_v51  ;;  %v5097_v51 = vld [vmem:[%s6653_s6 + $0x98] sm:$0xf0] }
 0x722   : > { %v7686_v14 = vadd.f32 %v5692_v60, %v3714_v57  ;;  %v5071_v57 = vld [vmem:[%s6653_s6 + $0x60] sm:$0xf] }
 0x724   : > { %3722 = vadd.xlane.f32.xlu1 %v7686_v14 }
 0x727   : > { %v3715_v30 = vpop.f32.mrf.mxu1 }
 0x728   : > { %v3716_v35 = vadd.f32 %v5630_v40, %v3715_v30  ;;  %v5337_v40 = vld [vmem:[%s6653_s6 + $0x8c] sm:$0xf] }
 0x729   : > { %v5100_v30 = vor.u32 %v5337_v40, %v5097_v51 }
 0x72a   : > { %v7689_v21 = vadd.f32 %v5693_v23, %v3716_v35  ;;  %v5334_v35 = vld [vmem:[%s6653_s6 + $0x6c] sm:$0xf0]  ;;  %v5332_v23 = vld [vmem:[%s6653_s6 + $0x64] sm:$0xf] }
 0x72b   : > { %4020 = vmatpush.bf16.msra.mxu1 %v5100_v30 }
 0x72c   : > { %3724 = vadd.xlane.f32.xlu0 %v7689_v21 }
 0x797   : > { %v3723_v19 = vpop.xlane.xlu1 %3722 }
 0x798   : > { %v3726_v58 = vmul.f32 %v3723_v19, %v6661_v10  ;;  %v5073_v19 = vld [vmem:[%s6653_s6 + $0x70] sm:$0xf0] }
 0x79a   : > { %v7694_v38 = vsub.f32 %v7686_v14, %v3726_v58  ;;  %v5072_v58 = vor.u32 %v5334_v35, %v5071_v57 }
 0x79c   : > { %v3730_v33 = vmul.f32 %v7694_v38, %v7694_v38  ;;  %3979 = vmatpush.bf16.msrb.mxu2 %v5072_v58 }
 0x79e   : > { %3732 = vadd.xlane.f32.xlu2 %v3730_v33  ;;  %v5076_v33 = vor.u32 %v5332_v23, %v5073_v19 }
 0x79f   : > { %v3725_v18 = vpop.xlane.xlu0 %3724 }
 0x7a0   : > { %v3727_v43 = vmul.f32 %v3725_v18, %v6661_v10  ;;  %v5079_v18 = vld [vmem:[%s6653_s6 + $0x68] sm:$0xf]  ;;  %3993 = vmatpush.bf16.msra.mxu3 %v5076_v33  ;;  %3980 = vmatpush.bf16.msrb.mxu2 %v5056_v25  ;;  %v5382_v25 = vld [vmem:[%s6657_s30 + $0xf0] sm:$0xff] }
 0x7a2   : > { %v7700_v1 = vsub.f32 %v7689_v21, %v3727_v43  ;;  %v5335_v43 = vld [vmem:[%s6653_s6 + $0x74] sm:$0xf0] }
 0x7a3   : > { %v5080_v36 = vor.u32 %v5335_v43, %v5079_v18  ;;  %v5631_v18 = vld [vmem:[%s1204_s15] ss:$0 sm:$0xff] }
 0x7a4   : > { %v3731_v24 = vmul.f32 %v7700_v1, %v7700_v1  ;;  %3994 = vmatpush.bf16.msra.mxu3 %v5060_v63  ;;  %3981 = vmatpush.bf16.msrb.mxu2 %v5040_v13  ;;  %v5381_v63 = vld [vmem:[%s6657_s30 + $0xe8] sm:$0xff]  ;;  %v5370_v13 = vld [vmem:[%s6657_s30 + $0x90] sm:$0xff] }
 0x7a5   : > { %4007 = vmatpush.bf16.msrb.mxu0 %v5080_v36 }
 0x7a6   : > { %3734 = vadd.xlane.f32.xlu1 %v3731_v24  ;;  %v5333_v24 = vld [vmem:[%s6653_s6 + $0x6c] sm:$0xf] }
 0x7a7   : > { %v5084_v48 = vor.u32 %v5333_v24, %v5081_v5  ;;  %v5632_v5 = vld [vmem:[%s1032_s3] ss:$0 sm:$0xff]  ;;  %s7997_s3 = sld [smem:[#allocation53_spill]] (!%p5277_p3) }
 0x7a8   : > { %3995 = vmatpush.bf16.msra.mxu3 %v5044_v6  ;;  %3982 = vmatpush.bf16.msrb.mxu2 %v5024_v31 }
 0x7a9   : > { %4021 = vmatpush.bf16.msra.mxu1 %v5084_v48  ;;  %4008 = vmatpush.bf16.msrb.mxu0 %v5064_v34  ;;  %v5358_v34 = vld [vmem:[%s6657_s30 + $0x30] sm:$0xff] }
 0x7ac   : > { %4367 = vmatpush.bf16.msra.mxu2 %v5359_v52 }
 0x7ad   : > { %4022 = vmatpush.bf16.msra.mxu1 %v5068_v9  ;;  %4009 = vmatpush.bf16.msrb.mxu0 %v5048_v29  ;;  %v5357_v9 = vld [vmem:[%s6657_s30 + $0x28] sm:$0xff] }
 0x7b0   : > { %4368 = vmatpush.bf16.msra.mxu2 %v5358_v34 }
 0x7b1   : > { %4023 = vmatpush.bf16.msra.mxu1 %v5052_v53  ;;  %4010 = vmatpush.bf16.msrb.mxu0 %v5032_v32  ;;  %v3808_v53 = vperm.slane %v7798_v59, 1  ;;  %v5354_v32 = vld [vmem:[%s6657_s30 + $0x10] sm:$0xff] }
 0x7b4   : > { %4369 = vmatpush.bf16.msra.mxu2 %v5357_v9 }
 0x7b5   : > { %4024 = vmatpush.bf16.msra.mxu1 %v5036_v12  ;;  %4395 = vmatpush.bf16.msra.mxu0 %v5375_v41 }
 0x7b8   : > { %4370 = vmatpush.bf16.msra.mxu2 %v5356_v22 }
 0x7b9   : > { %4396 = vmatpush.bf16.msra.mxu0 %v5374_v46 }
 0x7bd   : > { %4397 = vmatpush.bf16.msra.mxu0 %v5373_v17  ;;  %v5352_v17 = vld [vmem:[%s6657_s30] sm:$0xff] }
 0x7c1   : > { %4398 = vmatpush.bf16.msra.mxu0 %v5372_v47 }
 0x7c5   : > { %4399 = vmatpush.bf16.msra.mxu0 %v5371_v61 }
 0x7c9   : > { %4400 = vmatpush.bf16.msra.mxu0 %v5370_v13 }
 0x811   : > { %v3733_v3 = vpop.xlane.xlu2 %3732 }
 0x812   : > { %v3736_v60 = vmul.f32 %v3733_v3, %v6661_v10  ;;  %v5028_v3 = vor.u32 %v5320_v28, %v5025_v45  ;;  %v5355_v45 = vld [vmem:[%s6657_s30 + $0x18] sm:$0xff] }
 0x813   : > { %4371 = vmatpush.bf16.msra.mxu2 %v5355_v45 }
 0x814   : > { %v7744_v16 = vadd.f32 1e-05, %v3736_v60  ;;  %3996 = vmatpush.bf16.msra.mxu3 %v5028_v3 }
 0x816   : > { %5672 = vrsqrt.f32 %v7744_v16  ;;  %vm3746_vm15 = vweird.f32 %v7744_v16 }
 0x817   : > { %4372 = vmatpush.bf16.msra.mxu2 %v5354_v32 }
 0x818   : > { %4381 = vmatpush.bf16.msrb.mxu3 %v5367_v55 }
 0x819   : > { %v3735_v62 = vpop.xlane.xlu1 %3734 }
 0x81a   : > { %v3737_v39 = vmul.f32 %v3735_v62, %v6661_v10  ;;  %v5379_v62 = vld [vmem:[%s6657_s30 + $0xd8] sm:$0xff] }
 0x81c   : > { %v5673_v54 = vpop.eup %5672  ;;  %v3739_v2 = vadd.f32 1e-05, %v3737_v39  ;;  %4382 = vmatpush.bf16.msrb.mxu3 %v5366_v7  ;;  %v5364_v39 = vld [vmem:[%s6657_s30 + $0x60] sm:$0xff] }
 0x81d   : > { %v3741_v44 = vmul.f32 %v5673_v54, %v7744_v16  ;;  %vm3747_vm14 = vweird.f32 %v5673_v54 }
 0x81e   : > { %5674 = vrsqrt.f32 %v3739_v2  ;;  %vm3748_vm0 = vmor %vm3746_vm15, %vm3747_vm14  ;;  %vm3756_vm2 = vweird.f32 %v3739_v2 }
 0x81f   : > { %v3742_v15 = vmul.f32 %v5673_v54, %v3741_v44  ;;  %v5369_v44 = vld [vmem:[%s6657_s30 + $0x88] sm:$0xff] }
 0x820   : > { %4383 = vmatpush.bf16.msrb.mxu3 %v5365_v49  ;;  %4401 = vmatpush.bf16.msra.mxu0 %v5369_v44 }
 0x821   : > { %v3743_v40 = vmul.f32 0.5, %v3742_v15 }
 0x823   : > { %v3744_v51 = vsub.f32 1.5, %v3743_v40 }
 0x824   : > { %v5675_v57 = vpop.eup %5674  ;;  %4384 = vmatpush.bf16.msrb.mxu3 %v5364_v39 }
 0x825   : > { %v3745_v60 = vmul.f32 %v5673_v54, %v3744_v51  ;;  %v3751_v30 = vmul.f32 %v5675_v57, %v3739_v2  ;;  %vm3757_vm1 = vweird.f32 %v5675_v57  ;;  %v3807_v2 = vperm.slane %v7798_v59, 0  ;;  %v5362_v51 = vld [vmem:[%s6657_s30 + $0x50] sm:$0xff] }
 0x826   : > { %vm3758_vm3 = vmor %vm3756_vm2, %vm3757_vm1 }
 0x827   : > { %v3752_v35 = vmul.f32 %v5675_v57, %v3751_v30  ;;  %v3749_v23 = vsel %vm3748_vm0, %v5673_v54, %v3745_v60  ;;  %v5363_v54 = vld [vmem:[%s6657_s30 + $0x58] sm:$0xff]  ;;  %v5368_v30 = vld [vmem:[%s6657_s30 + $0x80] sm:$0xff] }
 0x828   : > { %v3760_v33 = vmul.f32 %v3749_v23, %v7694_v38  ;;  %4385 = vmatpush.bf16.msrb.mxu3 %v5363_v54  ;;  %4402 = vmatpush.bf16.msra.mxu0 %v5368_v30 }
 0x829   : > { %v3753_v19 = vmul.f32 0.5, %v3752_v35  ;;  %v5376_v35 = vld [vmem:[%s6657_s30 + $0xc0] sm:$0xff] }
 0x82a   : > { %v3765_v36 = vmul.f32 %v5631_v18, %v3760_v33 }
 0x82b   : > { %v3754_v58 = vsub.f32 1.5, %v3753_v19 }
 0x82c   : > { %v3770_v38 = vadd.f32 %v5632_v5, %v3765_v36  ;;  %4386 = vmatpush.bf16.msrb.mxu3 %v5362_v51 }
 0x82d   : > { %v3755_v43 = vmul.f32 %v5675_v57, %v3754_v58 }
 0x82f   : > { %v3759_v24 = vsel %vm3758_vm3, %v5675_v57, %v3755_v43 }
 0x830   : > { %v3761_v16 = vmul.f32 %v3759_v24, %v7700_v1  ;;  %v5383_v1 = vld [vmem:[%s6657_s30 + $0xf8] sm:$0xff] }
 0x831   : > { %4409 = vmatpush.bf16.msrb.mxu1 %v5383_v1 }
 0x832   : > { %v3766_v11 = vmul.f32 %v5631_v18, %v3761_v16  ;;  %v5353_v16 = vld [vmem:[%s6657_s30 + $0x8] sm:$0xff] }
 0x833   : > { %4373 = vmatpush.bf16.msra.mxu2 %v5353_v16 }
 0x834   : > { %v3771_v48 = vadd.f32 %v5632_v5, %v3766_v11 }
 0x835   : > { %4410 = vmatpush.bf16.msrb.mxu1 %v5382_v25 }
 0x836   : > { %v3772_v50 = vpack.c.bf16 %v3771_v48, %v3770_v38  ;;  %v5361_v38 = vld [vmem:[%s6657_s30 + $0x48] sm:$0xff] }
 0x837   : > { %4387 = vmatpush.bf16.msrb.mxu3 %v5361_v38  ;;  %4374 = vmatpush.bf16.msra.mxu2 %v5352_v17 }
 0x838   : > { %3983 = vmatmul.bf16.vlgmr.msrb.gmra.mxu2 %v3772_v50  ;;  %3997 = vmatmul.bf16.vlgmr.msra.gmra.mxu3 %v3772_v50 }
 0x839   : > { %4011 = vmatmul.bf16.vlgmr.msrb.gmra.mxu0 %v3772_v50  ;;  %4025 = vmatmul.bf16.vlgmr.msra.gmra.mxu1 %v3772_v50 }
 0x83a   : > { %4411 = vmatpush.bf16.msrb.mxu1 %v5381_v63 }
 0x83e   : > { %4412 = vmatpush.bf16.msrb.mxu1 %v5380_v8  ;;  %v5360_v8 = vld [vmem:[%s6657_s30 + $0x40] sm:$0xff]  ;;  %s7998_s30 = sld [smem:[#allocation54_spill]] (!%p5277_p3) }
 0x83f   : > { %4388 = vmatpush.bf16.msrb.mxu3 %v5360_v8 }
 0x842   : > { %4413 = vmatpush.bf16.msrb.mxu1 %v5379_v62 }
 0x846   : > { %4414 = vmatpush.bf16.msrb.mxu1 %v5378_v4 }
 0x84a   : > { %4415 = vmatpush.bf16.msrb.mxu1 %v5377_v56 }
 0x84e   : > { %4416 = vmatpush.bf16.msrb.mxu1 %v5376_v35 }
 0x8b6   : > { %v4012_v6 = vpop.f32.mrf.mxu0  ;;  %v4026_v29 = vpop.f32.mrf.mxu1 }
 0x8b7   : > { %v7809_v0 = vadd.f32 %v4012_v6, %v3809_v37  ;;  %v7811_v28 = vadd.f32 %v4026_v29, %v3810_v42 }
 0x8b9   : > { %v4041_v26 = vmul.f32 0.044715, %v7809_v0  ;;  %v4042_v27 = vmul.f32 0.044715, %v7811_v28 }
 0x8bb   : > { %v4049_v20 = vmul.f32 %v4041_v26, %v7809_v0  ;;  %v4050_v31 = vmul.f32 %v4042_v27, %v7811_v28  ;;  %v3984_v15 = vpop.f32.mrf.mxu2  ;;  %v3998_v3 = vpop.f32.mrf.mxu3 }
 0x8bc   : > { %v7824_v12 = vadd.f32 %v3984_v15, %v3807_v2  ;;  %v7826_v40 = vadd.f32 %v3998_v3, %v3808_v53 }
 0x8bd   : > { %v4057_v57 = vmul.f32 %v4049_v20, %v7809_v0  ;;  %v4058_v60 = vmul.f32 %v4050_v31, %v7811_v28 }
 0x8be   : > { %v4039_v23 = vmul.f32 0.044715, %v7824_v12  ;;  %v4040_v19 = vmul.f32 0.044715, %v7826_v40  ;;  %v4014_v58 = vpop.f32.mrf.mxu0  ;;  %v4028_v33 = vpop.f32.mrf.mxu1 }
 0x8bf   : > { %v4065_v18 = vadd.f32 %v4057_v57, %v7809_v0  ;;  %v7836_v43 = vadd.f32 %v4014_v58, %v3809_v37  ;;  %v7838_v24 = vadd.f32 %v4028_v33, %v3810_v42  ;;  %v4066_v36 = vadd.f32 %v4058_v60, %v7811_v28 }
 0x8c0   : > { %v4047_v5 = vmul.f32 %v4039_v23, %v7824_v12  ;;  %v4048_v11 = vmul.f32 %v4040_v19, %v7826_v40  ;;  %v4033_v57 = vmul.f32 0.5, %v7809_v0  ;;  %v4034_v23 = vmul.f32 0.5, %v7811_v28 }
 0x8c1   : > { %v4045_v48 = vmul.f32 0.044715, %v7836_v43  ;;  %v4046_v1 = vmul.f32 0.044715, %v7838_v24  ;;  %v4073_v46 = vmul.f32 0.7978846, %v4065_v18 }
 0x8c2   : > { %v4055_v50 = vmul.f32 %v4047_v5, %v7824_v12  ;;  %v4056_v41 = vmul.f32 %v4048_v11, %v7826_v40  ;;  %v4074_v63 = vmul.f32 0.7978846, %v4066_v36  ;;  %v4037_v60 = vmul.f32 0.5, %v7836_v43 }
 0x8c3   : > { %v4053_v25 = vmul.f32 %v4045_v48, %v7836_v43  ;;  %v3986_v52 = vpop.f32.mrf.mxu2  ;;  %v4000_v55 = vpop.f32.mrf.mxu3  ;;  %v4054_v7 = vmul.f32 %v4046_v1, %v7838_v24  ;;  %5676 = vtanh.f32 %v4073_v46  ;;  %v4038_v19 = vmul.f32 0.5, %v7838_v24 }
 0x8c4   : > { %v4063_v34 = vadd.f32 %v4055_v50, %v7824_v12  ;;  %v3987_v47 = vadd.f32 %v3986_v52, %v3807_v2  ;;  %v4064_v9 = vadd.f32 %v4056_v41, %v7826_v40  ;;  %v4001_v49 = vadd.f32 %v4000_v55, %v3808_v53 }
 0x8c5   : > { %v4061_v59 = vmul.f32 %v4053_v25, %v7836_v43  ;;  %v4062_v62 = vmul.f32 %v4054_v7, %v7838_v24  ;;  %5678 = vtanh.f32 %v4074_v63  ;;  %v4031_v0 = vmul.f32 0.5, %v7824_v12  ;;  %v5633_v7 = vld [vmem:[%s1071_s8] ss:$0 sm:$0xff] }
 0x8c6   : > { %v4071_v61 = vmul.f32 0.7978846, %v4063_v34  ;;  %v4043_v37 = vmul.f32 0.044715, %v3987_v47  ;;  %v4044_v22 = vmul.f32 0.044715, %v4001_v49 }
 0x8c7   : > { %v4069_v42 = vadd.f32 %v4061_v59, %v7836_v43  ;;  %v4070_v39 = vadd.f32 %v4062_v62, %v7838_v24  ;;  %v4072_v4 = vmul.f32 0.7978846, %v4064_v9  ;;  %v4035_v43 = vmul.f32 0.5, %v3987_v47 }
 0x8c8   : > { %v4051_v13 = vmul.f32 %v4043_v37, %v3987_v47  ;;  %v4052_v29 = vmul.f32 %v4044_v22, %v4001_v49  ;;  %5680 = vtanh.f32 %v4071_v61  ;;  %v4032_v28 = vmul.f32 0.5, %v7826_v40 }
 0x8c9   : > { %v4077_v6 = vmul.f32 0.7978846, %v4069_v42  ;;  %v4078_v45 = vmul.f32 0.7978846, %v4070_v39  ;;  %v5677_v26 = vpop.eup %5676  ;;  %v4036_v24 = vmul.f32 0.5, %v4001_v49 }
 0x8ca   : > { %v4059_v54 = vmul.f32 %v4051_v13, %v3987_v47  ;;  %v4060_v2 = vmul.f32 %v4052_v29, %v4001_v49  ;;  %v4089_v15 = vadd.f32 1.0, %v5677_v26 }
 0x8cb   : > { %5682 = vtanh.f32 %v4077_v6  ;;  %v5679_v44 = vpop.eup %5678 }
 0x8cc   : > { %v4067_v53 = vadd.f32 %v4059_v54, %v3987_v47  ;;  %5684 = vtanh.f32 %v4078_v45  ;;  %v4068_v27 = vadd.f32 %v4060_v2, %v4001_v49  ;;  %v4090_v32 = vadd.f32 1.0, %v5679_v44 }
 0x8cd   : > { %5686 = vtanh.f32 %v4072_v4  ;;  %v4097_v33 = vmul.f32 %v4089_v15, %v4033_v57 }
 0x8ce   : > { %v4075_v56 = vmul.f32 0.7978846, %v4067_v53  ;;  %v4076_v20 = vmul.f32 0.7978846, %v4068_v27  ;;  %v5681_v31 = vpop.eup %5680  ;;  %v4098_v16 = vmul.f32 %v4090_v32, %v4034_v23 }
 0x8cf   : > { %v4087_v5 = vadd.f32 1.0, %v5681_v31 }
 0x8d0   : > { %5688 = vtanh.f32 %v4075_v56 }
 0x8d1   : > { %v5683_v3 = vpop.eup %5682  ;;  %5690 = vtanh.f32 %v4076_v20  ;;  %v4095_v25 = vmul.f32 %v4087_v5, %v4031_v0 }
 0x8d2   : > { %v5685_v51 = vpop.eup %5684  ;;  %v4093_v30 = vadd.f32 1.0, %v5683_v3 }
 0x8d3   : > { %v5687_v35 = vpop.eup %5686  ;;  %v4094_v58 = vadd.f32 1.0, %v5685_v51 }
 0x8d4   : > { %v4101_v18 = vmul.f32 %v4093_v30, %v4037_v60  ;;  %v4088_v48 = vadd.f32 1.0, %v5687_v35 }
 0x8d5   : > { %v4102_v36 = vmul.f32 %v4094_v58, %v4038_v19 }
 0x8d6   : > { %v5689_v11 = vpop.eup %5688  ;;  %v4105_v38 = vpack.c.bf16 %v4101_v18, %v4097_v33  ;;  %v4096_v55 = vmul.f32 %v4088_v48, %v4032_v28 }
 0x8d7   : > { %v5691_v50 = vpop.eup %5690  ;;  %v4106_v41 = vpack.c.bf16 %v4102_v36, %v4098_v16  ;;  %v4091_v1 = vadd.f32 1.0, %v5689_v11 }
 0x8d8   : > { %4403 = vmatmul.bf16.vlgmr.msra.gmra.mxu0 %v4105_v38  ;;  %v4092_v46 = vadd.f32 1.0, %v5691_v50 }
 0x8d9   : > { %4417 = vmatmul.bf16.vlgmr.msrb.gmra.mxu1 %v4106_v41  ;;  %v4099_v52 = vmul.f32 %v4091_v1, %v4035_v43 }
 0x8da   : > { %v4100_v17 = vmul.f32 %v4092_v46, %v4036_v24 }
 0x8db   : > { %v4103_v63 = vpack.c.bf16 %v4099_v52, %v4095_v25 }
 0x8dc   : > { %v4104_v34 = vpack.c.bf16 %v4100_v17, %v4096_v55 }
 0x8dd   : > { %4375 = vmatmul.bf16.vlgmr.msra.gmra.mxu2 %v4103_v63 }
 0x8de   : > { %4389 = vmatmul.bf16.vlgmr.msrb.gmra.mxu3 %v4104_v34 }
 0x955   : > { %v4404_v9 = vpop.f32.mrf.mxu0 }
 0x956   : > { %v4418_v61 = vpop.f32.mrf.mxu1 }
 0x95d   : > { %v4406_v13 = vpop.f32.mrf.mxu0 }
 0x95e   : > { %v4420_v6 = vpop.f32.mrf.mxu1 }
 0x960   : > { %v4376_v12 = vpop.f32.mrf.mxu2 }
 0x961   : > { %v4377_v8 = vadd.f32 %v5633_v7, %v4376_v12  ;;  %v4390_v47 = vpop.f32.mrf.mxu3 }
 0x963   : > { %v4391_v59 = vadd.f32 %v4390_v47, %v4377_v8 }
 0x965   : > { %v4405_v40 = vadd.f32 %v4404_v9, %v4391_v59 }
 0x967   : > { %v4419_v49 = vadd.f32 %v4418_v61, %v4405_v40 }
 0x968   : > { %v4378_v62 = vpop.f32.mrf.mxu2 }
 0x969   : > { %v4423_v37 = vadd.f32 %v4419_v49, %v7686_v14  ;;  %v4379_v42 = vadd.f32 %v5633_v7, %v4378_v62  ;;  %v4392_v22 = vpop.f32.mrf.mxu3 }
 0x96b   : > { %4425 = vst [vmem:[#allocation2] sm:$0xff] %v4423_v37  ;;  %v4393_v39 = vadd.f32 %v4392_v22, %v4379_v42 }
 0x96d   : > { %v4407_v4 = vadd.f32 %v4406_v13, %v4393_v39 }
 0x96f   : > { %v4421_v29 = vadd.f32 %v4420_v6, %v4407_v4  ;;  %4430 = sbr.rel (%p5277_p3) target bundleno = 2695 (0xa87), region = 176 }
 0x971   : > { %v4424_v45 = vadd.f32 %v4421_v29, %v7689_v21 }
 0x973   : > { %4426 = vst [vmem:[#allocation2 + $0x8] sm:$0xff] %v4424_v45 }
 0x974   : > { %4433 = vadd.xlane.f32.xlu0 %v4423_v37  ;;  %v5694_v33 = vld [vmem:[%s7997_s3] ss:$0 sm:$0xff] }
 0x975   : > { %v5695_v36 = vld [vmem:[%s7998_s30] ss:$0 sm:$0xff] }
 0x97c   : > { %4435 = vadd.xlane.f32.xlu0 %v4424_v45 }
 0x9e7   : > { %v4434_v54 = vpop.xlane.xlu0 %4433 }
 0x9e8   : > { %v4437_v2 = vmul.f32 %v4434_v54, %v6661_v10 }
 0x9ea   : > { %v4439_v14 = vsub.f32 %v4423_v37, %v4437_v2 }
 0x9ec   : > { %v4441_v53 = vmul.f32 %v4439_v14, %v4439_v14 }
 0x9ee   : > { %4443 = vadd.xlane.f32.xlu1 %v4441_v53 }
 0x9ef   : > { %v4436_v26 = vpop.xlane.xlu0 %4435 }
 0x9f0   : > { %v4438_v27 = vmul.f32 %v4436_v26, %v6661_v10 }
 0x9f2   : > { %v4440_v44 = vsub.f32 %v4424_v45, %v4438_v27 }
 0x9f4   : > { %v4442_v56 = vmul.f32 %v4440_v44, %v4440_v44 }
 0x9f6   : > { %4445 = vadd.xlane.f32.xlu1 %v4442_v56 }
 0xa61   : > { %v4444_v20 = vpop.xlane.xlu1 %4443 }
 0xa62   : > { %v4447_v21 = vmul.f32 %v4444_v20, %v6661_v10 }
 0xa64   : > { %v4449_v31 = vadd.f32 1e-05, %v4447_v21 }
 0xa66   : > { %5696 = vrsqrt.f32 %v4449_v31  ;;  %vm4457_vm5 = vweird.f32 %v4449_v31 }
 0xa69   : > { %v4446_v15 = vpop.xlane.xlu1 %4445 }
 0xa6a   : > { %v4448_v3 = vmul.f32 %v4446_v15, %v6661_v10 }
 0xa6c   : > { %v5697_v32 = vpop.eup %5696  ;;  %v4450_v51 = vadd.f32 1e-05, %v4448_v3 }
 0xa6d   : > { %v4452_v57 = vmul.f32 %v5697_v32, %v4449_v31  ;;  %vm4458_vm4 = vweird.f32 %v5697_v32 }
 0xa6e   : > { %5698 = vrsqrt.f32 %v4450_v51  ;;  %vm4459_vm6 = vmor %vm4457_vm5, %vm4458_vm4  ;;  %vm4467_vm8 = vweird.f32 %v4450_v51 }
 0xa6f   : > { %v4453_v60 = vmul.f32 %v5697_v32, %v4452_v57 }
 0xa71   : > { %v4454_v30 = vmul.f32 0.5, %v4453_v60 }
 0xa73   : > { %v4455_v35 = vsub.f32 1.5, %v4454_v30 }
 0xa74   : > { %v5699_v23 = vpop.eup %5698 }
 0xa75   : > { %v4456_v19 = vmul.f32 %v5697_v32, %v4455_v35  ;;  %v4462_v58 = vmul.f32 %v5699_v23, %v4450_v51  ;;  %vm4468_vm7 = vweird.f32 %v5699_v23 }
 0xa76   : > { %vm4469_vm9 = vmor %vm4467_vm8, %vm4468_vm7 }
 0xa77   : > { %v4460_v18 = vsel %vm4459_vm6, %v5697_v32, %v4456_v19  ;;  %v4463_v16 = vmul.f32 %v5699_v23, %v4462_v58 }
 0xa78   : > { %v4471_v10 = vmul.f32 %v4460_v18, %v4439_v14 }
 0xa79   : > { %v4464_v5 = vmul.f32 0.5, %v4463_v16 }
 0xa7a   : > { %v4476_v11 = vmul.f32 %v5694_v33, %v4471_v10 }
 0xa7b   : > { %v4465_v38 = vsub.f32 1.5, %v4464_v5 }
 0xa7c   : > { %v4481_v48 = vadd.f32 %v5695_v36, %v4476_v11 }
 0xa7d   : > { %v4466_v50 = vmul.f32 %v5699_v23, %v4465_v38 }
 0xa7e   : > { %4483 = vst [vmem:[#allocation22] sm:$0xff] %v4481_v48 }
 0xa7f   : > { %v4470_v41 = vsel %vm4469_vm9, %v5699_v23, %v4466_v50 }
 0xa80   : > { %v4472_v0 = vmul.f32 %v4470_v41, %v4440_v44 }
 0xa82   : > { %v4477_v43 = vmul.f32 %v5694_v33, %v4472_v0 }
 0xa84   : > { %v4482_v1 = vadd.f32 %v5695_v36, %v4477_v43 }
 0xa86   : > { %4484 = vst [vmem:[#allocation22 + $0x8] sm:$0xff] %v4482_v1 }
 0xa87 PF: > { %p5482_p4 = scmp.eq.s32.totalorder %s6413_s23, 1  ;;  %s7999_s20 = sld [smem:[#allocation55_spill]] }
 0xa88   : > { %s6266_s11 = smov [#allocation22]   ;;  %s6267_s29 = smov 128  }
 0xa89   : > { %s4493_s9 = sshll.u32 %s6266_s11, 4  ;;  %s6268_s1 = smov 8   ;;  %s4494_s9 = int_to_ptr.vmem [resolvable:$true] %s4493_s9 }
 0xa8d   : > { %s4495_s0 = sshll.u32 %s7999_s20, 4  ;;  %s4496_s0 = int_to_ptr.hbm [resolvable:$true] %s4495_s0 }
 0xa8e   : > { %5423 = dma.vmem_to_hbm [thread:$0]  (%p5482_p4), %s4494_s9, 256, %s4496_s0, [#allocation5], %s6267_s29, %s6267_s29, %s6268_s1  }
 0xa8f   : > { %6219 = dma.done.wait (%p5482_p4), [#allocation5], 256  }
 0xa90   : > { %6221 = vsyncadd (%p5482_p4), [#allocation5], 4294967040 }
 0xa91 PF: > { %s8000_s18 = sld [smem:[#allocation30_spill]]  ;;  %s8004_s3 = smov %s6228_s28 }
 0xa92   : > { %s8001_s7 = sld [smem:[#allocation28_spill]]  ;;  %s8006_s30 = smov %s6240_s4 }
 0xa93   : > { %s8002_s29 = sld [smem:[#allocation33_spill]] }
 0xa94   : > { %s8003_s23 = sld [smem:[#allocation31_spill]] }
 0xa97   : > { %s36_s0 = sadd.s32 1, %s8000_s18  }
 0xa98   : > { %p33_p5 = scmp.ge.s32.totalorder %s36_s0, 4   ;;  %s8005_s28 = smov %s8001_s7 }
 0xa9a   : > { %s8007_s4 = smov %s8003_s23  ;;  %35 = sbr.rel (!%p33_p5) target bundleno = 29 (0x1d), region = 295 }
 0xa9f   :  { %4512 = vsyncpa [#allocation4], 1 }
 0xaa0   :  { %4514 = vsyncpa [#allocation4 + $0x1], 1 }
 0xaa1   :  { %4515 = vsyncpa [#allocation7], 1 }
 0xaa2   :  { %4516 = vsyncpa [#allocation10], 1 }
 0xaa3   :  { %4517 = vsyncpa [#allocation5], 1 }
 0xaa4   :  { %4519 = vsyncpa [#allocation5 + $0x1], 1 }

</bundles_post_ra>
